<compile_context>
chip_gen: v7x
topology: tpu7x:2x2x1
jax: 0.10.0
libtpu: 0.0.40
codegen_flags: <defaults>
</compile_context>

<pallas_src>
import jax
import jax.numpy as jnp
from jax import lax
from jax.experimental import pallas as pl
from jax.experimental.pallas import tpu as pltpu

F32 = jnp.float32
BN_EPS = 1e-5
C_CNN = 64          # channel width of both conv layers (fixed by the module)


def _full(shape):
    n = len(shape)
    return pl.BlockSpec(shape, lambda i, n=n: (0,) * n)


# --------------------------------------------------------------------------
# Single fused kernel for the whole forward pass.
# --------------------------------------------------------------------------
def make_fused_kernel(B, L, C_in, H, n_layers):
    T = L // 2
    n_in = 7 + 3 * n_layers + 14  # number of input refs

    def kernel(*refs):
        x_ref = refs[0]
        c1w_ref, c1s_ref, c1b_ref = refs[1:4]
        c2w_ref, c2s_ref, c2b_ref = refs[4:7]
        lstm_refs = refs[7:7 + 3 * n_layers]
        (watt_ref, batt_ref, sL_ref, bL_ref,
         w1_ref, b1_ref, s1_ref, bb1_ref,
         w2_ref, b2_ref, s2_ref, bb2_ref,
         w3_ref, b3_ref) = refs[7 + 3 * n_layers:n_in]
        o_ref = refs[n_in]
        pad1_scr, pad2_scr, y_scr = refs[n_in + 1:]

        # ---- Conv1d(k=3, padding=1) + BatchNorm(eval) + ReLU, batch folded into
        # the matmul rows.  Zero padding is built in a VMEM scratch; the three
        # kernel taps are row-shifted (by B rows) reads of the padded slab.
        def conv_bn_relu(src, pad_scr, w_ref, scale_ref, bias_ref):
            rows = src.shape[0]
            cout = w_ref.shape[-1]
            pad_scr[...] = jnp.zeros_like(pad_scr)
            pad_scr[B:B + rows, :] = src
            acc = jnp.zeros((rows, cout), F32)
            for k in range(3):                          # 3 taps (kernel_size=3)
                acc = acc + jnp.dot(pad_scr[k * B:k * B + rows, :], w_ref[k],
                                    preferred_element_type=F32)
            return jnp.maximum(acc * scale_ref[0, :] + bias_ref[0, :], 0.0)

        h1 = conv_bn_relu(x_ref[...], pad1_scr, c1w_ref, c1s_ref, c1b_ref)  # (L*B, 64)
        y2 = conv_bn_relu(h1, pad2_scr, c2w_ref, c2s_ref, c2b_ref)          # (L*B, 64)

        # ---- MaxPool1d(kernel_size=2) along time (L assumed even).
        y3 = y2.reshape(T, 2 * B, C_CNN)
        x_l = jnp.maximum(y3[:, 0:B, :], y3[:, B:2 * B, :]).reshape(T * B, C_CNN)

        # ---- Bidirectional LSTM stack (PyTorch gate order i, f, g, o).
        #   * batch folded into the recurrent matmul (M = B rows per step)
        #   * x @ W_ih hoisted: one (T*B, D) x (D, 8H) matmul per layer
        #   * fwd/bwd fused into one fully-unrolled loop, one block-diagonal
        #     (2H, 8H) recurrent matmul per step
        #   * hidden states stored directly into the sequence buffer y_scr
        # Gate lane layout: [i_f i_b | f_f f_b | g_f g_b | o_f o_b], state
        # layout: [h_fwd | h_bwd] (lanes 0:H / H:2H).
        lane = lax.broadcasted_iota(jnp.int32, (B, 8 * H), 1)
        fwd_lane = (lane % (2 * H)) < H
        for layer in range(n_layers):
            wih_ref, whh_ref, bg_ref = lstm_refs[3 * layer:3 * layer + 3]
            gx = jnp.dot(x_l, wih_ref[...], preferred_element_type=F32) + bg_ref[0, :]
            whh = whh_ref[...]
            h_st = jnp.zeros((B, 2 * H), F32)
            c_st = jnp.zeros((B, 2 * H), F32)
            for s in range(T):                          # fully unrolled recurrence
                tf, tb = s, T - 1 - s
                gxs = jnp.where(fwd_lane,
                                gx[tf * B:(tf + 1) * B, :],
                                gx[tb * B:(tb + 1) * B, :])
                gates = gxs + jnp.dot(h_st, whh, preferred_element_type=F32)
                i_g = jax.nn.sigmoid(gates[:, 0:2 * H])
                f_g = jax.nn.sigmoid(gates[:, 2 * H:4 * H])
                g_g = jnp.tanh(gates[:, 4 * H:6 * H])
                o_g = jax.nn.sigmoid(gates[:, 6 * H:8 * H])
                c_st = f_g * c_st + i_g * g_g
                h_st = o_g * jnp.tanh(c_st)
                y_scr[tf * B:(tf + 1) * B, 0:H] = h_st[:, 0:H]
                y_scr[tb * B:(tb + 1) * B, H:2 * H] = h_st[:, H:2 * H]
            x_l = y_scr[...]                            # (T*B, 2H) input to next layer

        # ---- Attention pooling: softmax over time (dim=1), logits on the MXU.
        yv = x_l                                        # (T*B, 2H)
        logits = (jnp.dot(yv, watt_ref[...], preferred_element_type=F32)
                  + batt_ref[0, 0])                     # (T*B, 1)
        lg = logits.reshape(T, B, 1)
        m = jnp.max(lg, axis=0, keepdims=True)
        e = jnp.exp(lg - m)
        aw = e / jnp.sum(e, axis=0, keepdims=True)      # (T, B, 1)
        pooled = jnp.sum(aw * yv.reshape(T, B, 2 * H), axis=0)      # (B, 2H)

        # ---- bn_lstm + fc1/bn/relu + fc2/bn/relu + fc3 (dropouts = identity).
        z = pooled * sL_ref[0, :] + bL_ref[0, :]
        z = jnp.dot(z, w1_ref[...], preferred_element_type=F32) + b1_ref[0, :]
        z = jnp.maximum(z * s1_ref[0, :] + bb1_ref[0, :], 0.0)
        z = jnp.dot(z, w2_ref[...], preferred_element_type=F32) + b2_ref[0, :]
        z = jnp.maximum(z * s2_ref[0, :] + bb2_ref[0, :], 0.0)
        o_ref[...] = jnp.dot(z, w3_ref[...], preferred_element_type=F32) + b3_ref[0, :]

    return kernel


# --------------------------------------------------------------------------
# Wrapper: layout plumbing + single pallas_call.
# --------------------------------------------------------------------------
def forward(params, x_ncl):
    # x_ncl: (B, C_in, L) -- PyTorch NCL layout.
    B, C_in, L = x_ncl.shape
    assert L % 2 == 0, "MaxPool1d(k=2): L must be even (PyTorch floors odd L)"
    T = L // 2
    H = params["sL"].shape[1] // 2
    n_layers = len(params["lstm"])
    out_dim = params["w3"].shape[1]

    # Time-major channels-last slab: row (l*B + b), lanes = channels.
    x_tm = jnp.transpose(x_ncl, (2, 0, 1)).reshape(L * B, C_in)

    args = [x_tm,
            params["conv1_w"], params["bn1_scale"], params["bn1_bias"],
            params["conv2_w"], params["bn2_scale"], params["bn2_bias"]]
    for lp in params["lstm"]:
        args += [lp["wih"], lp["whh"], lp["b"]]
    args += [params["w_att"], params["b_att"], params["sL"], params["bL"],
             params["w1"], params["b1"], params["s1"], params["bb1"],
             params["w2"], params["b2"], params["s2"], params["bb2"],
             params["w3"], params["b3"]]

    kernel = make_fused_kernel(B, L, C_in, H, n_layers)
    return pl.pallas_call(
        kernel,
        out_shape=jax.ShapeDtypeStruct((B, out_dim), F32),
        grid=(1,),
        in_specs=[_full(a.shape) for a in args],
        out_specs=_full((B, out_dim)),
        scratch_shapes=[
            pltpu.VMEM(((L + 2) * B, C_in), F32),   # conv1 zero-padded input
            pltpu.VMEM(((L + 2) * B, C_CNN), F32),  # conv2 zero-padded input
            pltpu.VMEM((T * B, 2 * H), F32),        # LSTM output sequence
        ],
        compiler_params=pltpu.CompilerParams(dimension_semantics=("arbitrary",)),
    )(*args)


# --------------------------------------------------------------------------
# Parameter construction (deterministic, synthetic), including the layout
# packing required by the fused kernel.
# --------------------------------------------------------------------------
def _bn_fold(key, c):
    k1, k2, k3 = jax.random.split(key, 3)
    gamma = 1.0 + 0.1 * jax.random.normal(k1, (c,), F32)
    beta = 0.1 * jax.random.normal(k2, (c,), F32)
    mean = 0.1 * jax.random.normal(k3, (c,), F32)
    var = jnp.ones((c,), F32)
    scale = gamma / jnp.sqrt(var + BN_EPS)
    bias = beta - mean * scale
    return scale[None, :], bias[None, :]


def _pack_bilstm(wih_f, whh_f, b_f, wih_b, whh_b, b_b, H):
    # Inputs: (D_in, 4H) / (H, 4H) / (1, 4H) per direction, gate cols [i|f|g|o].
    # Output layout (8H cols): [i_f i_b | f_f f_b | g_f g_b | o_f o_b].
    wih_cols, b_cols = [], []
    whh_p = jnp.zeros((2 * H, 8 * H), F32)
    for g in range(4):
        wih_cols += [wih_f[:, g * H:(g + 1) * H], wih_b[:, g * H:(g + 1) * H]]
        b_cols += [b_f[:, g * H:(g + 1) * H], b_b[:, g * H:(g + 1) * H]]
        whh_p = whh_p.at[0:H, g * 2 * H:g * 2 * H + H].set(whh_f[:, g * H:(g + 1) * H])
        whh_p = whh_p.at[H:2 * H, g * 2 * H + H:(g + 1) * 2 * H].set(whh_b[:, g * H:(g + 1) * H])
    return {"wih": jnp.concatenate(wih_cols, axis=1),   # (D_in, 8H)
            "whh": whh_p,                               # (2H, 8H) block-diagonal
            "b": jnp.concatenate(b_cols, axis=1)}       # (1, 8H)  (b_ih + b_hh)


def init_params(key, input_dim, hidden_dim, layer_dim, output_dim):
    keys = iter(jax.random.split(key, 128))

    def nrm(shape, s=0.1):
        return s * jax.random.normal(next(keys), shape, F32)

    H = hidden_dim
    p = {}
    # conv1 + bn1 (conv bias folded into the BN shift).
    p["conv1_w"] = nrm((3, input_dim, C_CNN))
    c1b = nrm((C_CNN,))
    s, b = _bn_fold(next(keys), C_CNN)
    p["bn1_scale"], p["bn1_bias"] = s, b + s * c1b
    # conv2 + bn2
    p["conv2_w"] = nrm((3, C_CNN, C_CNN))
    c2b = nrm((C_CNN,))
    s, b = _bn_fold(next(keys), C_CNN)
    p["bn2_scale"], p["bn2_bias"] = s, b + s * c2b

    # bidirectional LSTM stack (gate order i, f, g, o).
    layers = []
    d_in = C_CNN
    for _ in range(layer_dim):
        wih_f, whh_f = nrm((d_in, 4 * H)), nrm((H, 4 * H))
        b_f = nrm((1, 4 * H)) + nrm((1, 4 * H))
        wih_b, whh_b = nrm((d_in, 4 * H)), nrm((H, 4 * H))
        b_b = nrm((1, 4 * H)) + nrm((1, 4 * H))
        layers.append(_pack_bilstm(wih_f, whh_f, b_f, wih_b, whh_b, b_b, H))
        d_in = 2 * H
    p["lstm"] = layers

    # attention + dense head
    p["w_att"], p["b_att"] = nrm((2 * H, 1)), nrm((1, 1))
    p["sL"], p["bL"] = _bn_fold(next(keys), 2 * H)
    p["w1"], p["b1"] = nrm((2 * H, 128)), nrm((1, 128))
    p["s1"], p["bb1"] = _bn_fold(next(keys), 128)
    p["w2"], p["b2"] = nrm((128, 64)), nrm((1, 64))
    p["s2"], p["bb2"] = _bn_fold(next(keys), 64)
    p["w3"], p["b3"] = nrm((64, output_dim)), nrm((1, output_dim))
    return p


if __name__ == "__main__":
    key = jax.random.PRNGKey(0)
    kx, kp = jax.random.split(key)

    B, C_in, L = 2, 4, 16          # batch, input_dim (channels), sequence length
    hidden_dim, layer_dim, output_dim = 32, 1, 5

    x = jax.random.normal(kx, (B, C_in, L), F32)
    params = init_params(kp, C_in, hidden_dim, layer_dim, output_dim)

    out = jax.block_until_ready(jax.jit(forward)(params, x))
    assert out.shape == (B, output_dim)
    assert bool(jnp.all(jnp.isfinite(out)))
    print("KERNEL_OK")
</pallas_src>

<mosaic_0001>
module attributes {stable_mosaic.version = 11 : i64} {
  func.func @kernel(%arg0: i32, %arg1: memref<32x4xf32, #tpu.memory_space<vmem>>, %arg2: memref<3x4x64xf32, #tpu.memory_space<vmem>>, %arg3: memref<1x64xf32, #tpu.memory_space<vmem>>, %arg4: memref<1x64xf32, #tpu.memory_space<vmem>>, %arg5: memref<3x64x64xf32, #tpu.memory_space<vmem>>, %arg6: memref<1x64xf32, #tpu.memory_space<vmem>>, %arg7: memref<1x64xf32, #tpu.memory_space<vmem>>, %arg8: memref<64x256xf32, #tpu.memory_space<vmem>>, %arg9: memref<64x256xf32, #tpu.memory_space<vmem>>, %arg10: memref<1x256xf32, #tpu.memory_space<vmem>>, %arg11: memref<64x1xf32, #tpu.memory_space<vmem>>, %arg12: memref<1x1xf32, #tpu.memory_space<vmem>>, %arg13: memref<1x64xf32, #tpu.memory_space<vmem>>, %arg14: memref<1x64xf32, #tpu.memory_space<vmem>>, %arg15: memref<64x128xf32, #tpu.memory_space<vmem>>, %arg16: memref<1x128xf32, #tpu.memory_space<vmem>>, %arg17: memref<1x128xf32, #tpu.memory_space<vmem>>, %arg18: memref<1x128xf32, #tpu.memory_space<vmem>>, %arg19: memref<128x64xf32, #tpu.memory_space<vmem>>, %arg20: memref<1x64xf32, #tpu.memory_space<vmem>>, %arg21: memref<1x64xf32, #tpu.memory_space<vmem>>, %arg22: memref<1x64xf32, #tpu.memory_space<vmem>>, %arg23: memref<64x5xf32, #tpu.memory_space<vmem>>, %arg24: memref<1x5xf32, #tpu.memory_space<vmem>>, %arg25: memref<2x5xf32, #tpu.memory_space<vmem>>, %arg26: memref<36x4xf32, #tpu.memory_space<vmem>>, %arg27: memref<36x64xf32, #tpu.memory_space<vmem>>, %arg28: memref<16x64xf32, #tpu.memory_space<vmem>>) attributes {dimension_semantics = [#tpu.dimension_semantics<arbitrary>], iteration_bounds = array<i64: 1>, scalar_prefetch = 0 : i64, scratch_operands = 3 : i64, tpu.core_type = #tpu.core_type<tc>, window_params = [{pipeline_mode = #tpu.pipeline_mode<synchronous>, transform_indices = @transform_0, window_bounds = array<i64: 32, 4>}, {pipeline_mode = #tpu.pipeline_mode<synchronous>, transform_indices = @transform_1, window_bounds = array<i64: 3, 4, 64>}, {pipeline_mode = #tpu.pipeline_mode<synchronous>, transform_indices = @transform_2, window_bounds = array<i64: 1, 64>}, {pipeline_mode = #tpu.pipeline_mode<synchronous>, transform_indices = @transform_3, window_bounds = array<i64: 1, 64>}, {pipeline_mode = #tpu.pipeline_mode<synchronous>, transform_indices = @transform_4, window_bounds = array<i64: 3, 64, 64>}, {pipeline_mode = #tpu.pipeline_mode<synchronous>, transform_indices = @transform_5, window_bounds = array<i64: 1, 64>}, {pipeline_mode = #tpu.pipeline_mode<synchronous>, transform_indices = @transform_6, window_bounds = array<i64: 1, 64>}, {pipeline_mode = #tpu.pipeline_mode<synchronous>, transform_indices = @transform_7, window_bounds = array<i64: 64, 256>}, {pipeline_mode = #tpu.pipeline_mode<synchronous>, transform_indices = @transform_8, window_bounds = array<i64: 64, 256>}, {pipeline_mode = #tpu.pipeline_mode<synchronous>, transform_indices = @transform_9, window_bounds = array<i64: 1, 256>}, {pipeline_mode = #tpu.pipeline_mode<synchronous>, transform_indices = @transform_10, window_bounds = array<i64: 64, 1>}, {pipeline_mode = #tpu.pipeline_mode<synchronous>, transform_indices = @transform_11, window_bounds = array<i64: 1, 1>}, {pipeline_mode = #tpu.pipeline_mode<synchronous>, transform_indices = @transform_12, window_bounds = array<i64: 1, 64>}, {pipeline_mode = #tpu.pipeline_mode<synchronous>, transform_indices = @transform_13, window_bounds = array<i64: 1, 64>}, {pipeline_mode = #tpu.pipeline_mode<synchronous>, transform_indices = @transform_14, window_bounds = array<i64: 64, 128>}, {pipeline_mode = #tpu.pipeline_mode<synchronous>, transform_indices = @transform_15, window_bounds = array<i64: 1, 128>}, {pipeline_mode = #tpu.pipeline_mode<synchronous>, transform_indices = @transform_16, window_bounds = array<i64: 1, 128>}, {pipeline_mode = #tpu.pipeline_mode<synchronous>, transform_indices = @transform_17, window_bounds = array<i64: 1, 128>}, {pipeline_mode = #tpu.pipeline_mode<synchronous>, transform_indices = @transform_18, window_bounds = array<i64: 128, 64>}, {pipeline_mode = #tpu.pipeline_mode<synchronous>, transform_indices = @transform_19, window_bounds = array<i64: 1, 64>}, {pipeline_mode = #tpu.pipeline_mode<synchronous>, transform_indices = @transform_20, window_bounds = array<i64: 1, 64>}, {pipeline_mode = #tpu.pipeline_mode<synchronous>, transform_indices = @transform_21, window_bounds = array<i64: 1, 64>}, {pipeline_mode = #tpu.pipeline_mode<synchronous>, transform_indices = @transform_22, window_bounds = array<i64: 64, 5>}, {pipeline_mode = #tpu.pipeline_mode<synchronous>, transform_indices = @transform_23, window_bounds = array<i64: 1, 5>}, {pipeline_mode = #tpu.pipeline_mode<synchronous>, transform_indices = @transform_24, window_bounds = array<i64: 2, 5>}]} {
    %c0 = arith.constant 0 : index
    %c0_0 = arith.constant 0 : index
    %0 = vector.load %arg1[%c0, %c0_0] : memref<32x4xf32, #tpu.memory_space<vmem>>, vector<32x4xf32>
    %cst = arith.constant 0.000000e+00 : f32
    %1 = vector.broadcast %cst : f32 to vector<36x4xf32>
    %c0_1 = arith.constant 0 : index
    %c0_2 = arith.constant 0 : index
    %2 = vector.load %arg26[%c0_1, %c0_2] : memref<36x4xf32, #tpu.memory_space<vmem>>, vector<36x4xf32>
    tpu.vector_store %arg26[%c0_1, %c0_2], %1 {strides = array<i32>} : memref<36x4xf32, #tpu.memory_space<vmem>>, vector<36x4xf32>,
    %c2 = arith.constant 2 : index
    %c0_3 = arith.constant 0 : index
    %3 = vector.load %arg26[%c2, %c0_3] : memref<36x4xf32, #tpu.memory_space<vmem>>, vector<32x4xf32>
    tpu.vector_store %arg26[%c2, %c0_3], %0 {strides = array<i32>} : memref<36x4xf32, #tpu.memory_space<vmem>>, vector<32x4xf32>,
    %cst_4 = arith.constant 0.000000e+00 : f32
    %4 = vector.broadcast %cst_4 : f32 to vector<32x64xf32>
    %c0_5 = arith.constant 0 : index
    %c0_6 = arith.constant 0 : index
    %5 = vector.load %arg26[%c0_5, %c0_6] : memref<36x4xf32, #tpu.memory_space<vmem>>, vector<32x4xf32>
    %c0_7 = arith.constant 0 : index
    %c0_8 = arith.constant 0 : index
    %c0_9 = arith.constant 0 : index
    %6 = vector.load %arg2[%c0_7, %c0_8, %c0_9] : memref<3x4x64xf32, #tpu.memory_space<vmem>>, vector<1x4x64xf32>
    %7 = vector.shape_cast %6 : vector<1x4x64xf32> to vector<4x64xf32>
    %cst_10 = arith.constant dense<0.000000e+00> : vector<32x64xf32>
    %8 = tpu.matmul %5, %7, %cst_10 {dimension_numbers = #tpu.dot_dimension_numbers<[1], [0], [0], [1], [0, 0, 1, 1], [], []>} : vector<32x4xf32>, vector<4x64xf32>, vector<32x64xf32> -> vector<32x64xf32>
    %9 = arith.addf %4, %8 : vector<32x64xf32>
    %c2_11 = arith.constant 2 : index
    %c0_12 = arith.constant 0 : index
    %10 = vector.load %arg26[%c2_11, %c0_12] : memref<36x4xf32, #tpu.memory_space<vmem>>, vector<32x4xf32>
    %c1 = arith.constant 1 : index
    %c0_13 = arith.constant 0 : index
    %c0_14 = arith.constant 0 : index
    %11 = vector.load %arg2[%c1, %c0_13, %c0_14] : memref<3x4x64xf32, #tpu.memory_space<vmem>>, vector<1x4x64xf32>
    %12 = vector.shape_cast %11 : vector<1x4x64xf32> to vector<4x64xf32>
    %cst_15 = arith.constant dense<0.000000e+00> : vector<32x64xf32>
    %13 = tpu.matmul %10, %12, %cst_15 {dimension_numbers = #tpu.dot_dimension_numbers<[1], [0], [0], [1], [0, 0, 1, 1], [], []>} : vector<32x4xf32>, vector<4x64xf32>, vector<32x64xf32> -> vector<32x64xf32>
    %14 = arith.addf %9, %13 : vector<32x64xf32>
    %c4 = arith.constant 4 : index
    %c0_16 = arith.constant 0 : index
    %15 = vector.load %arg26[%c4, %c0_16] : memref<36x4xf32, #tpu.memory_space<vmem>>, vector<32x4xf32>
    %c2_17 = arith.constant 2 : index
    %c0_18 = arith.constant 0 : index
    %c0_19 = arith.constant 0 : index
    %16 = vector.load %arg2[%c2_17, %c0_18, %c0_19] : memref<3x4x64xf32, #tpu.memory_space<vmem>>, vector<1x4x64xf32>
    %17 = vector.shape_cast %16 : vector<1x4x64xf32> to vector<4x64xf32>
    %cst_20 = arith.constant dense<0.000000e+00> : vector<32x64xf32>
    %18 = tpu.matmul %15, %17, %cst_20 {dimension_numbers = #tpu.dot_dimension_numbers<[1], [0], [0], [1], [0, 0, 1, 1], [], []>} : vector<32x4xf32>, vector<4x64xf32>, vector<32x64xf32> -> vector<32x64xf32>
    %19 = arith.addf %14, %18 : vector<32x64xf32>
    %c0_21 = arith.constant 0 : index
    %c0_22 = arith.constant 0 : index
    %20 = vector.load %arg3[%c0_21, %c0_22] : memref<1x64xf32, #tpu.memory_space<vmem>>, vector<1x64xf32>
    %21 = vector.shape_cast %20 : vector<1x64xf32> to vector<64xf32>
    %22 = vector.shape_cast %21 : vector<64xf32> to vector<1x64xf32>
    %23 = vector.broadcast %22 : vector<1x64xf32> to vector<32x64xf32>
    %24 = arith.mulf %19, %23 : vector<32x64xf32>
    %c0_23 = arith.constant 0 : index
    %c0_24 = arith.constant 0 : index
    %25 = vector.load %arg4[%c0_23, %c0_24] : memref<1x64xf32, #tpu.memory_space<vmem>>, vector<1x64xf32>
    %26 = vector.shape_cast %25 : vector<1x64xf32> to vector<64xf32>
    %27 = vector.shape_cast %26 : vector<64xf32> to vector<1x64xf32>
    %28 = vector.broadcast %27 : vector<1x64xf32> to vector<32x64xf32>
    %29 = arith.addf %24, %28 : vector<32x64xf32>
    %cst_25 = arith.constant 0.000000e+00 : f32
    %30 = vector.broadcast %cst_25 : f32 to vector<32x64xf32>
    %31 = arith.maximumf %29, %30 : vector<32x64xf32>
    %cst_26 = arith.constant 0.000000e+00 : f32
    %32 = vector.broadcast %cst_26 : f32 to vector<36x64xf32>
    %c0_27 = arith.constant 0 : index
    %c0_28 = arith.constant 0 : index
    %33 = vector.load %arg27[%c0_27, %c0_28] : memref<36x64xf32, #tpu.memory_space<vmem>>, vector<36x64xf32>
    tpu.vector_store %arg27[%c0_27, %c0_28], %32 {strides = array<i32>} : memref<36x64xf32, #tpu.memory_space<vmem>>, vector<36x64xf32>,
    %c2_29 = arith.constant 2 : index
    %c0_30 = arith.constant 0 : index
    %34 = vector.load %arg27[%c2_29, %c0_30] : memref<36x64xf32, #tpu.memory_space<vmem>>, vector<32x64xf32>
    tpu.vector_store %arg27[%c2_29, %c0_30], %31 {strides = array<i32>} : memref<36x64xf32, #tpu.memory_space<vmem>>, vector<32x64xf32>,
    %cst_31 = arith.constant 0.000000e+00 : f32
    %35 = vector.broadcast %cst_31 : f32 to vector<32x64xf32>
    %c0_32 = arith.constant 0 : index
    %c0_33 = arith.constant 0 : index
    %36 = vector.load %arg27[%c0_32, %c0_33] : memref<36x64xf32, #tpu.memory_space<vmem>>, vector<32x64xf32>
    %c0_34 = arith.constant 0 : index
    %c0_35 = arith.constant 0 : index
    %c0_36 = arith.constant 0 : index
    %37 = vector.load %arg5[%c0_34, %c0_35, %c0_36] : memref<3x64x64xf32, #tpu.memory_space<vmem>>, vector<1x64x64xf32>
    %38 = vector.shape_cast %37 : vector<1x64x64xf32> to vector<64x64xf32>
    %cst_37 = arith.constant dense<0.000000e+00> : vector<32x64xf32>
    %39 = tpu.matmul %36, %38, %cst_37 {dimension_numbers = #tpu.dot_dimension_numbers<[1], [0], [0], [1], [0, 0, 1, 1], [], []>} : vector<32x64xf32>, vector<64x64xf32>, vector<32x64xf32> -> vector<32x64xf32>
    %40 = arith.addf %35, %39 : vector<32x64xf32>
    %c2_38 = arith.constant 2 : index
    %c0_39 = arith.constant 0 : index
    %41 = vector.load %arg27[%c2_38, %c0_39] : memref<36x64xf32, #tpu.memory_space<vmem>>, vector<32x64xf32>
    %c1_40 = arith.constant 1 : index
    %c0_41 = arith.constant 0 : index
    %c0_42 = arith.constant 0 : index
    %42 = vector.load %arg5[%c1_40, %c0_41, %c0_42] : memref<3x64x64xf32, #tpu.memory_space<vmem>>, vector<1x64x64xf32>
    %43 = vector.shape_cast %42 : vector<1x64x64xf32> to vector<64x64xf32>
    %cst_43 = arith.constant dense<0.000000e+00> : vector<32x64xf32>
    %44 = tpu.matmul %41, %43, %cst_43 {dimension_numbers = #tpu.dot_dimension_numbers<[1], [0], [0], [1], [0, 0, 1, 1], [], []>} : vector<32x64xf32>, vector<64x64xf32>, vector<32x64xf32> -> vector<32x64xf32>
    %45 = arith.addf %40, %44 : vector<32x64xf32>
    %c4_44 = arith.constant 4 : index
    %c0_45 = arith.constant 0 : index
    %46 = vector.load %arg27[%c4_44, %c0_45] : memref<36x64xf32, #tpu.memory_space<vmem>>, vector<32x64xf32>
    %c2_46 = arith.constant 2 : index
    %c0_47 = arith.constant 0 : index
    %c0_48 = arith.constant 0 : index
    %47 = vector.load %arg5[%c2_46, %c0_47, %c0_48] : memref<3x64x64xf32, #tpu.memory_space<vmem>>, vector<1x64x64xf32>
    %48 = vector.shape_cast %47 : vector<1x64x64xf32> to vector<64x64xf32>
    %cst_49 = arith.constant dense<0.000000e+00> : vector<32x64xf32>
    %49 = tpu.matmul %46, %48, %cst_49 {dimension_numbers = #tpu.dot_dimension_numbers<[1], [0], [0], [1], [0, 0, 1, 1], [], []>} : vector<32x64xf32>, vector<64x64xf32>, vector<32x64xf32> -> vector<32x64xf32>
    %50 = arith.addf %45, %49 : vector<32x64xf32>
    %c0_50 = arith.constant 0 : index
    %c0_51 = arith.constant 0 : index
    %51 = vector.load %arg6[%c0_50, %c0_51] : memref<1x64xf32, #tpu.memory_space<vmem>>, vector<1x64xf32>
    %52 = vector.shape_cast %51 : vector<1x64xf32> to vector<64xf32>
    %53 = vector.shape_cast %52 : vector<64xf32> to vector<1x64xf32>
    %54 = vector.broadcast %53 : vector<1x64xf32> to vector<32x64xf32>
    %55 = arith.mulf %50, %54 : vector<32x64xf32>
    %c0_52 = arith.constant 0 : index
    %c0_53 = arith.constant 0 : index
    %56 = vector.load %arg7[%c0_52, %c0_53] : memref<1x64xf32, #tpu.memory_space<vmem>>, vector<1x64xf32>
    %57 = vector.shape_cast %56 : vector<1x64xf32> to vector<64xf32>
    %58 = vector.shape_cast %57 : vector<64xf32> to vector<1x64xf32>
    %59 = vector.broadcast %58 : vector<1x64xf32> to vector<32x64xf32>
    %60 = arith.addf %55, %59 : vector<32x64xf32>
    %cst_54 = arith.constant 0.000000e+00 : f32
    %61 = vector.broadcast %cst_54 : f32 to vector<32x64xf32>
    %62 = arith.maximumf %60, %61 : vector<32x64xf32>
    %63 = vector.shape_cast %62 : vector<32x64xf32> to vector<8x4x64xf32>
    %64 = vector.extract_strided_slice %63 {offsets = [0, 0, 0], sizes = [8, 2, 64], strides = [1, 1, 1]} : vector<8x4x64xf32> to vector<8x2x64xf32>
    %65 = vector.extract_strided_slice %63 {offsets = [0, 2, 0], sizes = [8, 2, 64], strides = [1, 1, 1]} : vector<8x4x64xf32> to vector<8x2x64xf32>
    %66 = arith.maximumf %64, %65 : vector<8x2x64xf32>
    %67 = vector.shape_cast %66 : vector<8x2x64xf32> to vector<16x64xf32>
    %68 = tpu.iota {dimensions = array<i32: 1>} : vector<2x256xi32>
    %c64_i32 = arith.constant 64 : i32
    %c0_i32 = arith.constant 0 : i32
    %69 = arith.cmpi eq, %c64_i32, %c0_i32 : i32
    %c1_i32 = arith.constant 1 : i32
    %70 = arith.select %69, %c1_i32, %c64_i32 : i32
    %71 = vector.broadcast %70 : i32 to vector<2x256xi32>
    %72 = arith.remsi %68, %71 : vector<2x256xi32>
    %c0_i32_55 = arith.constant 0 : i32
    %73 = vector.broadcast %c0_i32_55 : i32 to vector<2x256xi32>
    %74 = arith.cmpi ne, %72, %73 : vector<2x256xi32>
    %c0_i32_56 = arith.constant 0 : i32
    %75 = vector.broadcast %c0_i32_56 : i32 to vector<2x256xi32>
    %76 = arith.cmpi slt, %72, %75 : vector<2x256xi32>
    %c0_i32_57 = arith.constant 0 : i32
    %77 = arith.cmpi slt, %70, %c0_i32_57 : i32
    %78 = vector.broadcast %77 : i1 to vector<2x256xi1>
    %79 = vector.broadcast %78 : vector<2x256xi1> to vector<2x256xi1>
    %80 = arith.xori %76, %79 : vector<2x256xi1>
    %81 = arith.andi %80, %74 : vector<2x256xi1>
    %82 = vector.broadcast %70 : i32 to vector<2x256xi32>
    %83 = arith.addi %72, %82 : vector<2x256xi32>
    %84 = arith.select %81, %83, %72 : vector<2x256xi1>, vector<2x256xi32>
    %c32_i32 = arith.constant 32 : i32
    %85 = vector.broadcast %c32_i32 : i32 to vector<2x256xi32>
    %86 = arith.cmpi slt, %84, %85 : vector<2x256xi32>
    %c0_58 = arith.constant 0 : index
    %c0_59 = arith.constant 0 : index
    %87 = vector.load %arg8[%c0_58, %c0_59] : memref<64x256xf32, #tpu.memory_space<vmem>>, vector<64x256xf32>
    %cst_60 = arith.constant dense<0.000000e+00> : vector<16x256xf32>
    %88 = tpu.matmul %67, %87, %cst_60 {dimension_numbers = #tpu.dot_dimension_numbers<[1], [0], [0], [1], [0, 0, 1, 1], [], []>} : vector<16x64xf32>, vector<64x256xf32>, vector<16x256xf32> -> vector<16x256xf32>
    %c0_61 = arith.constant 0 : index
    %c0_62 = arith.constant 0 : index
    %89 = vector.load %arg10[%c0_61, %c0_62] : memref<1x256xf32, #tpu.memory_space<vmem>>, vector<1x256xf32>
    %90 = vector.shape_cast %89 : vector<1x256xf32> to vector<256xf32>
    %91 = vector.shape_cast %90 : vector<256xf32> to vector<1x256xf32>
    %92 = vector.broadcast %91 : vector<1x256xf32> to vector<16x256xf32>
    %93 = arith.addf %88, %92 : vector<16x256xf32>
    %c0_63 = arith.constant 0 : index
    %c0_64 = arith.constant 0 : index
    %94 = vector.load %arg9[%c0_63, %c0_64] : memref<64x256xf32, #tpu.memory_space<vmem>>, vector<64x256xf32>
    %cst_65 = arith.constant 0.000000e+00 : f32
    %95 = vector.broadcast %cst_65 : f32 to vector<2x64xf32>
    %cst_66 = arith.constant 0.000000e+00 : f32
    %96 = vector.broadcast %cst_66 : f32 to vector<2x64xf32>
    %97 = vector.extract_strided_slice %93 {offsets = [0, 0], sizes = [2, 256], strides = [1, 1]} : vector<16x256xf32> to vector<2x256xf32>
    %98 = vector.extract_strided_slice %93 {offsets = [14, 0], sizes = [2, 256], strides = [1, 1]} : vector<16x256xf32> to vector<2x256xf32>
    %99 = arith.select %86, %97, %98 : vector<2x256xi1>, vector<2x256xf32>
    %cst_67 = arith.constant dense<0.000000e+00> : vector<2x256xf32>
    %100 = tpu.matmul %95, %94, %cst_67 {dimension_numbers = #tpu.dot_dimension_numbers<[1], [0], [0], [1], [0, 0, 1, 1], [], []>} : vector<2x64xf32>, vector<64x256xf32>, vector<2x256xf32> -> vector<2x256xf32>
    %101 = arith.addf %99, %100 : vector<2x256xf32>
    %102 = vector.extract_strided_slice %101 {offsets = [0, 0], sizes = [2, 64], strides = [1, 1]} : vector<2x256xf32> to vector<2x64xf32>
    %103 = arith.negf %102 : vector<2x64xf32>
    %104 = math.exp %103 : vector<2x64xf32>
    %cst_68 = arith.constant 1.000000e+00 : f32
    %105 = vector.broadcast %cst_68 : f32 to vector<2x64xf32>
    %106 = arith.addf %105, %104 : vector<2x64xf32>
    %107 = arith.divf %105, %106 : vector<2x64xf32>
    %108 = vector.extract_strided_slice %101 {offsets = [0, 64], sizes = [2, 64], strides = [1, 1]} : vector<2x256xf32> to vector<2x64xf32>
    %109 = arith.negf %108 : vector<2x64xf32>
    %110 = math.exp %109 : vector<2x64xf32>
    %cst_69 = arith.constant 1.000000e+00 : f32
    %111 = vector.broadcast %cst_69 : f32 to vector<2x64xf32>
    %112 = arith.addf %111, %110 : vector<2x64xf32>
    %113 = arith.divf %111, %112 : vector<2x64xf32>
    %114 = vector.extract_strided_slice %101 {offsets = [0, 128], sizes = [2, 64], strides = [1, 1]} : vector<2x256xf32> to vector<2x64xf32>
    %115 = math.tanh %114 : vector<2x64xf32>
    %116 = vector.extract_strided_slice %101 {offsets = [0, 192], sizes = [2, 64], strides = [1, 1]} : vector<2x256xf32> to vector<2x64xf32>
    %117 = arith.negf %116 : vector<2x64xf32>
    %118 = math.exp %117 : vector<2x64xf32>
    %cst_70 = arith.constant 1.000000e+00 : f32
    %119 = vector.broadcast %cst_70 : f32 to vector<2x64xf32>
    %120 = arith.addf %119, %118 : vector<2x64xf32>
    %121 = arith.divf %119, %120 : vector<2x64xf32>
    %122 = arith.mulf %113, %96 : vector<2x64xf32>
    %123 = arith.mulf %107, %115 : vector<2x64xf32>
    %124 = arith.addf %122, %123 : vector<2x64xf32>
    %125 = math.tanh %124 : vector<2x64xf32>
    %126 = arith.mulf %121, %125 : vector<2x64xf32>
    %127 = vector.extract_strided_slice %126 {offsets = [0, 0], sizes = [2, 32], strides = [1, 1]} : vector<2x64xf32> to vector<2x32xf32>
    %c0_71 = arith.constant 0 : index
    %c0_72 = arith.constant 0 : index
    %128 = vector.load %arg28[%c0_71, %c0_72] : memref<16x64xf32, #tpu.memory_space<vmem>>, vector<2x32xf32>
    tpu.vector_store %arg28[%c0_71, %c0_72], %127 {strides = array<i32>} : memref<16x64xf32, #tpu.memory_space<vmem>>, vector<2x32xf32>,
    %129 = vector.extract_strided_slice %126 {offsets = [0, 32], sizes = [2, 32], strides = [1, 1]} : vector<2x64xf32> to vector<2x32xf32>
    %c14 = arith.constant 14 : index
    %c32 = arith.constant 32 : index
    %130 = vector.load %arg28[%c14, %c32] : memref<16x64xf32, #tpu.memory_space<vmem>>, vector<2x32xf32>
    tpu.vector_store %arg28[%c14, %c32], %129 {strides = array<i32>} : memref<16x64xf32, #tpu.memory_space<vmem>>, vector<2x32xf32>,
    %131 = vector.extract_strided_slice %93 {offsets = [2, 0], sizes = [2, 256], strides = [1, 1]} : vector<16x256xf32> to vector<2x256xf32>
    %132 = vector.extract_strided_slice %93 {offsets = [12, 0], sizes = [2, 256], strides = [1, 1]} : vector<16x256xf32> to vector<2x256xf32>
    %133 = arith.select %86, %131, %132 : vector<2x256xi1>, vector<2x256xf32>
    %cst_73 = arith.constant dense<0.000000e+00> : vector<2x256xf32>
    %134 = tpu.matmul %126, %94, %cst_73 {dimension_numbers = #tpu.dot_dimension_numbers<[1], [0], [0], [1], [0, 0, 1, 1], [], []>} : vector<2x64xf32>, vector<64x256xf32>, vector<2x256xf32> -> vector<2x256xf32>
    %135 = arith.addf %133, %134 : vector<2x256xf32>
    %136 = vector.extract_strided_slice %135 {offsets = [0, 0], sizes = [2, 64], strides = [1, 1]} : vector<2x256xf32> to vector<2x64xf32>
    %137 = arith.negf %136 : vector<2x64xf32>
    %138 = math.exp %137 : vector<2x64xf32>
    %cst_74 = arith.constant 1.000000e+00 : f32
    %139 = vector.broadcast %cst_74 : f32 to vector<2x64xf32>
    %140 = arith.addf %139, %138 : vector<2x64xf32>
    %141 = arith.divf %139, %140 : vector<2x64xf32>
    %142 = vector.extract_strided_slice %135 {offsets = [0, 64], sizes = [2, 64], strides = [1, 1]} : vector<2x256xf32> to vector<2x64xf32>
    %143 = arith.negf %142 : vector<2x64xf32>
    %144 = math.exp %143 : vector<2x64xf32>
    %cst_75 = arith.constant 1.000000e+00 : f32
    %145 = vector.broadcast %cst_75 : f32 to vector<2x64xf32>
    %146 = arith.addf %145, %144 : vector<2x64xf32>
    %147 = arith.divf %145, %146 : vector<2x64xf32>
    %148 = vector.extract_strided_slice %135 {offsets = [0, 128], sizes = [2, 64], strides = [1, 1]} : vector<2x256xf32> to vector<2x64xf32>
    %149 = math.tanh %148 : vector<2x64xf32>
    %150 = vector.extract_strided_slice %135 {offsets = [0, 192], sizes = [2, 64], strides = [1, 1]} : vector<2x256xf32> to vector<2x64xf32>
    %151 = arith.negf %150 : vector<2x64xf32>
    %152 = math.exp %151 : vector<2x64xf32>
    %cst_76 = arith.constant 1.000000e+00 : f32
    %153 = vector.broadcast %cst_76 : f32 to vector<2x64xf32>
    %154 = arith.addf %153, %152 : vector<2x64xf32>
    %155 = arith.divf %153, %154 : vector<2x64xf32>
    %156 = arith.mulf %147, %124 : vector<2x64xf32>
    %157 = arith.mulf %141, %149 : vector<2x64xf32>
    %158 = arith.addf %156, %157 : vector<2x64xf32>
    %159 = math.tanh %158 : vector<2x64xf32>
    %160 = arith.mulf %155, %159 : vector<2x64xf32>
    %161 = vector.extract_strided_slice %160 {offsets = [0, 0], sizes = [2, 32], strides = [1, 1]} : vector<2x64xf32> to vector<2x32xf32>
    %c2_77 = arith.constant 2 : index
    %c0_78 = arith.constant 0 : index
    %162 = vector.load %arg28[%c2_77, %c0_78] : memref<16x64xf32, #tpu.memory_space<vmem>>, vector<2x32xf32>
    tpu.vector_store %arg28[%c2_77, %c0_78], %161 {strides = array<i32>} : memref<16x64xf32, #tpu.memory_space<vmem>>, vector<2x32xf32>,
    %163 = vector.extract_strided_slice %160 {offsets = [0, 32], sizes = [2, 32], strides = [1, 1]} : vector<2x64xf32> to vector<2x32xf32>
    %c12 = arith.constant 12 : index
    %c32_79 = arith.constant 32 : index
    %164 = vector.load %arg28[%c12, %c32_79] : memref<16x64xf32, #tpu.memory_space<vmem>>, vector<2x32xf32>
    tpu.vector_store %arg28[%c12, %c32_79], %163 {strides = array<i32>} : memref<16x64xf32, #tpu.memory_space<vmem>>, vector<2x32xf32>,
    %165 = vector.extract_strided_slice %93 {offsets = [4, 0], sizes = [2, 256], strides = [1, 1]} : vector<16x256xf32> to vector<2x256xf32>
    %166 = vector.extract_strided_slice %93 {offsets = [10, 0], sizes = [2, 256], strides = [1, 1]} : vector<16x256xf32> to vector<2x256xf32>
    %167 = arith.select %86, %165, %166 : vector<2x256xi1>, vector<2x256xf32>
    %cst_80 = arith.constant dense<0.000000e+00> : vector<2x256xf32>
    %168 = tpu.matmul %160, %94, %cst_80 {dimension_numbers = #tpu.dot_dimension_numbers<[1], [0], [0], [1], [0, 0, 1, 1], [], []>} : vector<2x64xf32>, vector<64x256xf32>, vector<2x256xf32> -> vector<2x256xf32>
    %169 = arith.addf %167, %168 : vector<2x256xf32>
    %170 = vector.extract_strided_slice %169 {offsets = [0, 0], sizes = [2, 64], strides = [1, 1]} : vector<2x256xf32> to vector<2x64xf32>
    %171 = arith.negf %170 : vector<2x64xf32>
    %172 = math.exp %171 : vector<2x64xf32>
    %cst_81 = arith.constant 1.000000e+00 : f32
    %173 = vector.broadcast %cst_81 : f32 to vector<2x64xf32>
    %174 = arith.addf %173, %172 : vector<2x64xf32>
    %175 = arith.divf %173, %174 : vector<2x64xf32>
    %176 = vector.extract_strided_slice %169 {offsets = [0, 64], sizes = [2, 64], strides = [1, 1]} : vector<2x256xf32> to vector<2x64xf32>
    %177 = arith.negf %176 : vector<2x64xf32>
    %178 = math.exp %177 : vector<2x64xf32>
    %cst_82 = arith.constant 1.000000e+00 : f32
    %179 = vector.broadcast %cst_82 : f32 to vector<2x64xf32>
    %180 = arith.addf %179, %178 : vector<2x64xf32>
    %181 = arith.divf %179, %180 : vector<2x64xf32>
    %182 = vector.extract_strided_slice %169 {offsets = [0, 128], sizes = [2, 64], strides = [1, 1]} : vector<2x256xf32> to vector<2x64xf32>
    %183 = math.tanh %182 : vector<2x64xf32>
    %184 = vector.extract_strided_slice %169 {offsets = [0, 192], sizes = [2, 64], strides = [1, 1]} : vector<2x256xf32> to vector<2x64xf32>
    %185 = arith.negf %184 : vector<2x64xf32>
    %186 = math.exp %185 : vector<2x64xf32>
    %cst_83 = arith.constant 1.000000e+00 : f32
    %187 = vector.broadcast %cst_83 : f32 to vector<2x64xf32>
    %188 = arith.addf %187, %186 : vector<2x64xf32>
    %189 = arith.divf %187, %188 : vector<2x64xf32>
    %190 = arith.mulf %181, %158 : vector<2x64xf32>
    %191 = arith.mulf %175, %183 : vector<2x64xf32>
    %192 = arith.addf %190, %191 : vector<2x64xf32>
    %193 = math.tanh %192 : vector<2x64xf32>
    %194 = arith.mulf %189, %193 : vector<2x64xf32>
    %195 = vector.extract_strided_slice %194 {offsets = [0, 0], sizes = [2, 32], strides = [1, 1]} : vector<2x64xf32> to vector<2x32xf32>
    %c4_84 = arith.constant 4 : index
    %c0_85 = arith.constant 0 : index
    %196 = vector.load %arg28[%c4_84, %c0_85] : memref<16x64xf32, #tpu.memory_space<vmem>>, vector<2x32xf32>
    tpu.vector_store %arg28[%c4_84, %c0_85], %195 {strides = array<i32>} : memref<16x64xf32, #tpu.memory_space<vmem>>, vector<2x32xf32>,
    %197 = vector.extract_strided_slice %194 {offsets = [0, 32], sizes = [2, 32], strides = [1, 1]} : vector<2x64xf32> to vector<2x32xf32>
    %c10 = arith.constant 10 : index
    %c32_86 = arith.constant 32 : index
    %198 = vector.load %arg28[%c10, %c32_86] : memref<16x64xf32, #tpu.memory_space<vmem>>, vector<2x32xf32>
    tpu.vector_store %arg28[%c10, %c32_86], %197 {strides = array<i32>} : memref<16x64xf32, #tpu.memory_space<vmem>>, vector<2x32xf32>,
    %199 = vector.extract_strided_slice %93 {offsets = [6, 0], sizes = [2, 256], strides = [1, 1]} : vector<16x256xf32> to vector<2x256xf32>
    %200 = vector.extract_strided_slice %93 {offsets = [8, 0], sizes = [2, 256], strides = [1, 1]} : vector<16x256xf32> to vector<2x256xf32>
    %201 = arith.select %86, %199, %200 : vector<2x256xi1>, vector<2x256xf32>
    %cst_87 = arith.constant dense<0.000000e+00> : vector<2x256xf32>
    %202 = tpu.matmul %194, %94, %cst_87 {dimension_numbers = #tpu.dot_dimension_numbers<[1], [0], [0], [1], [0, 0, 1, 1], [], []>} : vector<2x64xf32>, vector<64x256xf32>, vector<2x256xf32> -> vector<2x256xf32>
    %203 = arith.addf %201, %202 : vector<2x256xf32>
    %204 = vector.extract_strided_slice %203 {offsets = [0, 0], sizes = [2, 64], strides = [1, 1]} : vector<2x256xf32> to vector<2x64xf32>
    %205 = arith.negf %204 : vector<2x64xf32>
    %206 = math.exp %205 : vector<2x64xf32>
    %cst_88 = arith.constant 1.000000e+00 : f32
    %207 = vector.broadcast %cst_88 : f32 to vector<2x64xf32>
    %208 = arith.addf %207, %206 : vector<2x64xf32>
    %209 = arith.divf %207, %208 : vector<2x64xf32>
    %210 = vector.extract_strided_slice %203 {offsets = [0, 64], sizes = [2, 64], strides = [1, 1]} : vector<2x256xf32> to vector<2x64xf32>
    %211 = arith.negf %210 : vector<2x64xf32>
    %212 = math.exp %211 : vector<2x64xf32>
    %cst_89 = arith.constant 1.000000e+00 : f32
    %213 = vector.broadcast %cst_89 : f32 to vector<2x64xf32>
    %214 = arith.addf %213, %212 : vector<2x64xf32>
    %215 = arith.divf %213, %214 : vector<2x64xf32>
    %216 = vector.extract_strided_slice %203 {offsets = [0, 128], sizes = [2, 64], strides = [1, 1]} : vector<2x256xf32> to vector<2x64xf32>
    %217 = math.tanh %216 : vector<2x64xf32>
    %218 = vector.extract_strided_slice %203 {offsets = [0, 192], sizes = [2, 64], strides = [1, 1]} : vector<2x256xf32> to vector<2x64xf32>
    %219 = arith.negf %218 : vector<2x64xf32>
    %220 = math.exp %219 : vector<2x64xf32>
    %cst_90 = arith.constant 1.000000e+00 : f32
    %221 = vector.broadcast %cst_90 : f32 to vector<2x64xf32>
    %222 = arith.addf %221, %220 : vector<2x64xf32>
    %223 = arith.divf %221, %222 : vector<2x64xf32>
    %224 = arith.mulf %215, %192 : vector<2x64xf32>
    %225 = arith.mulf %209, %217 : vector<2x64xf32>
    %226 = arith.addf %224, %225 : vector<2x64xf32>
    %227 = math.tanh %226 : vector<2x64xf32>
    %228 = arith.mulf %223, %227 : vector<2x64xf32>
    %229 = vector.extract_strided_slice %228 {offsets = [0, 0], sizes = [2, 32], strides = [1, 1]} : vector<2x64xf32> to vector<2x32xf32>
    %c6 = arith.constant 6 : index
    %c0_91 = arith.constant 0 : index
    %230 = vector.load %arg28[%c6, %c0_91] : memref<16x64xf32, #tpu.memory_space<vmem>>, vector<2x32xf32>
    tpu.vector_store %arg28[%c6, %c0_91], %229 {strides = array<i32>} : memref<16x64xf32, #tpu.memory_space<vmem>>, vector<2x32xf32>,
    %231 = vector.extract_strided_slice %228 {offsets = [0, 32], sizes = [2, 32], strides = [1, 1]} : vector<2x64xf32> to vector<2x32xf32>
    %c8 = arith.constant 8 : index
    %c32_92 = arith.constant 32 : index
    %232 = vector.load %arg28[%c8, %c32_92] : memref<16x64xf32, #tpu.memory_space<vmem>>, vector<2x32xf32>
    tpu.vector_store %arg28[%c8, %c32_92], %231 {strides = array<i32>} : memref<16x64xf32, #tpu.memory_space<vmem>>, vector<2x32xf32>,
    %233 = vector.extract_strided_slice %93 {offsets = [8, 0], sizes = [2, 256], strides = [1, 1]} : vector<16x256xf32> to vector<2x256xf32>
    %234 = vector.extract_strided_slice %93 {offsets = [6, 0], sizes = [2, 256], strides = [1, 1]} : vector<16x256xf32> to vector<2x256xf32>
    %235 = arith.select %86, %233, %234 : vector<2x256xi1>, vector<2x256xf32>
    %cst_93 = arith.constant dense<0.000000e+00> : vector<2x256xf32>
    %236 = tpu.matmul %228, %94, %cst_93 {dimension_numbers = #tpu.dot_dimension_numbers<[1], [0], [0], [1], [0, 0, 1, 1], [], []>} : vector<2x64xf32>, vector<64x256xf32>, vector<2x256xf32> -> vector<2x256xf32>
    %237 = arith.addf %235, %236 : vector<2x256xf32>
    %238 = vector.extract_strided_slice %237 {offsets = [0, 0], sizes = [2, 64], strides = [1, 1]} : vector<2x256xf32> to vector<2x64xf32>
    %239 = arith.negf %238 : vector<2x64xf32>
    %240 = math.exp %239 : vector<2x64xf32>
    %cst_94 = arith.constant 1.000000e+00 : f32
    %241 = vector.broadcast %cst_94 : f32 to vector<2x64xf32>
    %242 = arith.addf %241, %240 : vector<2x64xf32>
    %243 = arith.divf %241, %242 : vector<2x64xf32>
    %244 = vector.extract_strided_slice %237 {offsets = [0, 64], sizes = [2, 64], strides = [1, 1]} : vector<2x256xf32> to vector<2x64xf32>
    %245 = arith.negf %244 : vector<2x64xf32>
    %246 = math.exp %245 : vector<2x64xf32>
    %cst_95 = arith.constant 1.000000e+00 : f32
    %247 = vector.broadcast %cst_95 : f32 to vector<2x64xf32>
    %248 = arith.addf %247, %246 : vector<2x64xf32>
    %249 = arith.divf %247, %248 : vector<2x64xf32>
    %250 = vector.extract_strided_slice %237 {offsets = [0, 128], sizes = [2, 64], strides = [1, 1]} : vector<2x256xf32> to vector<2x64xf32>
    %251 = math.tanh %250 : vector<2x64xf32>
    %252 = vector.extract_strided_slice %237 {offsets = [0, 192], sizes = [2, 64], strides = [1, 1]} : vector<2x256xf32> to vector<2x64xf32>
    %253 = arith.negf %252 : vector<2x64xf32>
    %254 = math.exp %253 : vector<2x64xf32>
    %cst_96 = arith.constant 1.000000e+00 : f32
    %255 = vector.broadcast %cst_96 : f32 to vector<2x64xf32>
    %256 = arith.addf %255, %254 : vector<2x64xf32>
    %257 = arith.divf %255, %256 : vector<2x64xf32>
    %258 = arith.mulf %249, %226 : vector<2x64xf32>
    %259 = arith.mulf %243, %251 : vector<2x64xf32>
    %260 = arith.addf %258, %259 : vector<2x64xf32>
    %261 = math.tanh %260 : vector<2x64xf32>
    %262 = arith.mulf %257, %261 : vector<2x64xf32>
    %263 = vector.extract_strided_slice %262 {offsets = [0, 0], sizes = [2, 32], strides = [1, 1]} : vector<2x64xf32> to vector<2x32xf32>
    %c8_97 = arith.constant 8 : index
    %c0_98 = arith.constant 0 : index
    %264 = vector.load %arg28[%c8_97, %c0_98] : memref<16x64xf32, #tpu.memory_space<vmem>>, vector<2x32xf32>
    tpu.vector_store %arg28[%c8_97, %c0_98], %263 {strides = array<i32>} : memref<16x64xf32, #tpu.memory_space<vmem>>, vector<2x32xf32>,
    %265 = vector.extract_strided_slice %262 {offsets = [0, 32], sizes = [2, 32], strides = [1, 1]} : vector<2x64xf32> to vector<2x32xf32>
    %c6_99 = arith.constant 6 : index
    %c32_100 = arith.constant 32 : index
    %266 = vector.load %arg28[%c6_99, %c32_100] : memref<16x64xf32, #tpu.memory_space<vmem>>, vector<2x32xf32>
    tpu.vector_store %arg28[%c6_99, %c32_100], %265 {strides = array<i32>} : memref<16x64xf32, #tpu.memory_space<vmem>>, vector<2x32xf32>,
    %267 = vector.extract_strided_slice %93 {offsets = [10, 0], sizes = [2, 256], strides = [1, 1]} : vector<16x256xf32> to vector<2x256xf32>
    %268 = vector.extract_strided_slice %93 {offsets = [4, 0], sizes = [2, 256], strides = [1, 1]} : vector<16x256xf32> to vector<2x256xf32>
    %269 = arith.select %86, %267, %268 : vector<2x256xi1>, vector<2x256xf32>
    %cst_101 = arith.constant dense<0.000000e+00> : vector<2x256xf32>
    %270 = tpu.matmul %262, %94, %cst_101 {dimension_numbers = #tpu.dot_dimension_numbers<[1], [0], [0], [1], [0, 0, 1, 1], [], []>} : vector<2x64xf32>, vector<64x256xf32>, vector<2x256xf32> -> vector<2x256xf32>
    %271 = arith.addf %269, %270 : vector<2x256xf32>
    %272 = vector.extract_strided_slice %271 {offsets = [0, 0], sizes = [2, 64], strides = [1, 1]} : vector<2x256xf32> to vector<2x64xf32>
    %273 = arith.negf %272 : vector<2x64xf32>
    %274 = math.exp %273 : vector<2x64xf32>
    %cst_102 = arith.constant 1.000000e+00 : f32
    %275 = vector.broadcast %cst_102 : f32 to vector<2x64xf32>
    %276 = arith.addf %275, %274 : vector<2x64xf32>
    %277 = arith.divf %275, %276 : vector<2x64xf32>
    %278 = vector.extract_strided_slice %271 {offsets = [0, 64], sizes = [2, 64], strides = [1, 1]} : vector<2x256xf32> to vector<2x64xf32>
    %279 = arith.negf %278 : vector<2x64xf32>
    %280 = math.exp %279 : vector<2x64xf32>
    %cst_103 = arith.constant 1.000000e+00 : f32
    %281 = vector.broadcast %cst_103 : f32 to vector<2x64xf32>
    %282 = arith.addf %281, %280 : vector<2x64xf32>
    %283 = arith.divf %281, %282 : vector<2x64xf32>
    %284 = vector.extract_strided_slice %271 {offsets = [0, 128], sizes = [2, 64], strides = [1, 1]} : vector<2x256xf32> to vector<2x64xf32>
    %285 = math.tanh %284 : vector<2x64xf32>
    %286 = vector.extract_strided_slice %271 {offsets = [0, 192], sizes = [2, 64], strides = [1, 1]} : vector<2x256xf32> to vector<2x64xf32>
    %287 = arith.negf %286 : vector<2x64xf32>
    %288 = math.exp %287 : vector<2x64xf32>
    %cst_104 = arith.constant 1.000000e+00 : f32
    %289 = vector.broadcast %cst_104 : f32 to vector<2x64xf32>
    %290 = arith.addf %289, %288 : vector<2x64xf32>
    %291 = arith.divf %289, %290 : vector<2x64xf32>
    %292 = arith.mulf %283, %260 : vector<2x64xf32>
    %293 = arith.mulf %277, %285 : vector<2x64xf32>
    %294 = arith.addf %292, %293 : vector<2x64xf32>
    %295 = math.tanh %294 : vector<2x64xf32>
    %296 = arith.mulf %291, %295 : vector<2x64xf32>
    %297 = vector.extract_strided_slice %296 {offsets = [0, 0], sizes = [2, 32], strides = [1, 1]} : vector<2x64xf32> to vector<2x32xf32>
    %c10_105 = arith.constant 10 : index
    %c0_106 = arith.constant 0 : index
    %298 = vector.load %arg28[%c10_105, %c0_106] : memref<16x64xf32, #tpu.memory_space<vmem>>, vector<2x32xf32>
    tpu.vector_store %arg28[%c10_105, %c0_106], %297 {strides = array<i32>} : memref<16x64xf32, #tpu.memory_space<vmem>>, vector<2x32xf32>,
    %299 = vector.extract_strided_slice %296 {offsets = [0, 32], sizes = [2, 32], strides = [1, 1]} : vector<2x64xf32> to vector<2x32xf32>
    %c4_107 = arith.constant 4 : index
    %c32_108 = arith.constant 32 : index
    %300 = vector.load %arg28[%c4_107, %c32_108] : memref<16x64xf32, #tpu.memory_space<vmem>>, vector<2x32xf32>
    tpu.vector_store %arg28[%c4_107, %c32_108], %299 {strides = array<i32>} : memref<16x64xf32, #tpu.memory_space<vmem>>, vector<2x32xf32>,
    %301 = vector.extract_strided_slice %93 {offsets = [12, 0], sizes = [2, 256], strides = [1, 1]} : vector<16x256xf32> to vector<2x256xf32>
    %302 = vector.extract_strided_slice %93 {offsets = [2, 0], sizes = [2, 256], strides = [1, 1]} : vector<16x256xf32> to vector<2x256xf32>
    %303 = arith.select %86, %301, %302 : vector<2x256xi1>, vector<2x256xf32>
    %cst_109 = arith.constant dense<0.000000e+00> : vector<2x256xf32>
    %304 = tpu.matmul %296, %94, %cst_109 {dimension_numbers = #tpu.dot_dimension_numbers<[1], [0], [0], [1], [0, 0, 1, 1], [], []>} : vector<2x64xf32>, vector<64x256xf32>, vector<2x256xf32> -> vector<2x256xf32>
    %305 = arith.addf %303, %304 : vector<2x256xf32>
    %306 = vector.extract_strided_slice %305 {offsets = [0, 0], sizes = [2, 64], strides = [1, 1]} : vector<2x256xf32> to vector<2x64xf32>
    %307 = arith.negf %306 : vector<2x64xf32>
    %308 = math.exp %307 : vector<2x64xf32>
    %cst_110 = arith.constant 1.000000e+00 : f32
    %309 = vector.broadcast %cst_110 : f32 to vector<2x64xf32>
    %310 = arith.addf %309, %308 : vector<2x64xf32>
    %311 = arith.divf %309, %310 : vector<2x64xf32>
    %312 = vector.extract_strided_slice %305 {offsets = [0, 64], sizes = [2, 64], strides = [1, 1]} : vector<2x256xf32> to vector<2x64xf32>
    %313 = arith.negf %312 : vector<2x64xf32>
    %314 = math.exp %313 : vector<2x64xf32>
    %cst_111 = arith.constant 1.000000e+00 : f32
    %315 = vector.broadcast %cst_111 : f32 to vector<2x64xf32>
    %316 = arith.addf %315, %314 : vector<2x64xf32>
    %317 = arith.divf %315, %316 : vector<2x64xf32>
    %318 = vector.extract_strided_slice %305 {offsets = [0, 128], sizes = [2, 64], strides = [1, 1]} : vector<2x256xf32> to vector<2x64xf32>
    %319 = math.tanh %318 : vector<2x64xf32>
    %320 = vector.extract_strided_slice %305 {offsets = [0, 192], sizes = [2, 64], strides = [1, 1]} : vector<2x256xf32> to vector<2x64xf32>
    %321 = arith.negf %320 : vector<2x64xf32>
    %322 = math.exp %321 : vector<2x64xf32>
    %cst_112 = arith.constant 1.000000e+00 : f32
    %323 = vector.broadcast %cst_112 : f32 to vector<2x64xf32>
    %324 = arith.addf %323, %322 : vector<2x64xf32>
    %325 = arith.divf %323, %324 : vector<2x64xf32>
    %326 = arith.mulf %317, %294 : vector<2x64xf32>
    %327 = arith.mulf %311, %319 : vector<2x64xf32>
    %328 = arith.addf %326, %327 : vector<2x64xf32>
    %329 = math.tanh %328 : vector<2x64xf32>
    %330 = arith.mulf %325, %329 : vector<2x64xf32>
    %331 = vector.extract_strided_slice %330 {offsets = [0, 0], sizes = [2, 32], strides = [1, 1]} : vector<2x64xf32> to vector<2x32xf32>
    %c12_113 = arith.constant 12 : index
    %c0_114 = arith.constant 0 : index
    %332 = vector.load %arg28[%c12_113, %c0_114] : memref<16x64xf32, #tpu.memory_space<vmem>>, vector<2x32xf32>
    tpu.vector_store %arg28[%c12_113, %c0_114], %331 {strides = array<i32>} : memref<16x64xf32, #tpu.memory_space<vmem>>, vector<2x32xf32>,
    %333 = vector.extract_strided_slice %330 {offsets = [0, 32], sizes = [2, 32], strides = [1, 1]} : vector<2x64xf32> to vector<2x32xf32>
    %c2_115 = arith.constant 2 : index
    %c32_116 = arith.constant 32 : index
    %334 = vector.load %arg28[%c2_115, %c32_116] : memref<16x64xf32, #tpu.memory_space<vmem>>, vector<2x32xf32>
    tpu.vector_store %arg28[%c2_115, %c32_116], %333 {strides = array<i32>} : memref<16x64xf32, #tpu.memory_space<vmem>>, vector<2x32xf32>,
    %335 = vector.extract_strided_slice %93 {offsets = [14, 0], sizes = [2, 256], strides = [1, 1]} : vector<16x256xf32> to vector<2x256xf32>
    %336 = vector.extract_strided_slice %93 {offsets = [0, 0], sizes = [2, 256], strides = [1, 1]} : vector<16x256xf32> to vector<2x256xf32>
    %337 = arith.select %86, %335, %336 : vector<2x256xi1>, vector<2x256xf32>
    %cst_117 = arith.constant dense<0.000000e+00> : vector<2x256xf32>
    %338 = tpu.matmul %330, %94, %cst_117 {dimension_numbers = #tpu.dot_dimension_numbers<[1], [0], [0], [1], [0, 0, 1, 1], [], []>} : vector<2x64xf32>, vector<64x256xf32>, vector<2x256xf32> -> vector<2x256xf32>
    %339 = arith.addf %337, %338 : vector<2x256xf32>
    %340 = vector.extract_strided_slice %339 {offsets = [0, 0], sizes = [2, 64], strides = [1, 1]} : vector<2x256xf32> to vector<2x64xf32>
    %341 = arith.negf %340 : vector<2x64xf32>
    %342 = math.exp %341 : vector<2x64xf32>
    %cst_118 = arith.constant 1.000000e+00 : f32
    %343 = vector.broadcast %cst_118 : f32 to vector<2x64xf32>
    %344 = arith.addf %343, %342 : vector<2x64xf32>
    %345 = arith.divf %343, %344 : vector<2x64xf32>
    %346 = vector.extract_strided_slice %339 {offsets = [0, 64], sizes = [2, 64], strides = [1, 1]} : vector<2x256xf32> to vector<2x64xf32>
    %347 = arith.negf %346 : vector<2x64xf32>
    %348 = math.exp %347 : vector<2x64xf32>
    %cst_119 = arith.constant 1.000000e+00 : f32
    %349 = vector.broadcast %cst_119 : f32 to vector<2x64xf32>
    %350 = arith.addf %349, %348 : vector<2x64xf32>
    %351 = arith.divf %349, %350 : vector<2x64xf32>
    %352 = vector.extract_strided_slice %339 {offsets = [0, 128], sizes = [2, 64], strides = [1, 1]} : vector<2x256xf32> to vector<2x64xf32>
    %353 = math.tanh %352 : vector<2x64xf32>
    %354 = vector.extract_strided_slice %339 {offsets = [0, 192], sizes = [2, 64], strides = [1, 1]} : vector<2x256xf32> to vector<2x64xf32>
    %355 = arith.negf %354 : vector<2x64xf32>
    %356 = math.exp %355 : vector<2x64xf32>
    %cst_120 = arith.constant 1.000000e+00 : f32
    %357 = vector.broadcast %cst_120 : f32 to vector<2x64xf32>
    %358 = arith.addf %357, %356 : vector<2x64xf32>
    %359 = arith.divf %357, %358 : vector<2x64xf32>
    %360 = arith.mulf %351, %328 : vector<2x64xf32>
    %361 = arith.mulf %345, %353 : vector<2x64xf32>
    %362 = arith.addf %360, %361 : vector<2x64xf32>
    %363 = math.tanh %362 : vector<2x64xf32>
    %364 = arith.mulf %359, %363 : vector<2x64xf32>
    %365 = vector.extract_strided_slice %364 {offsets = [0, 0], sizes = [2, 32], strides = [1, 1]} : vector<2x64xf32> to vector<2x32xf32>
    %c14_121 = arith.constant 14 : index
    %c0_122 = arith.constant 0 : index
    %366 = vector.load %arg28[%c14_121, %c0_122] : memref<16x64xf32, #tpu.memory_space<vmem>>, vector<2x32xf32>
    tpu.vector_store %arg28[%c14_121, %c0_122], %365 {strides = array<i32>} : memref<16x64xf32, #tpu.memory_space<vmem>>, vector<2x32xf32>,
    %367 = vector.extract_strided_slice %364 {offsets = [0, 32], sizes = [2, 32], strides = [1, 1]} : vector<2x64xf32> to vector<2x32xf32>
    %c0_123 = arith.constant 0 : index
    %c32_124 = arith.constant 32 : index
    %368 = vector.load %arg28[%c0_123, %c32_124] : memref<16x64xf32, #tpu.memory_space<vmem>>, vector<2x32xf32>
    tpu.vector_store %arg28[%c0_123, %c32_124], %367 {strides = array<i32>} : memref<16x64xf32, #tpu.memory_space<vmem>>, vector<2x32xf32>,
    %c0_125 = arith.constant 0 : index
    %c0_126 = arith.constant 0 : index
    %369 = vector.load %arg28[%c0_125, %c0_126] : memref<16x64xf32, #tpu.memory_space<vmem>>, vector<16x64xf32>
    %c0_127 = arith.constant 0 : index
    %c0_128 = arith.constant 0 : index
    %370 = vector.load %arg11[%c0_127, %c0_128] : memref<64x1xf32, #tpu.memory_space<vmem>>, vector<64x1xf32>
    %cst_129 = arith.constant dense<0.000000e+00> : vector<16x1xf32>
    %371 = tpu.matmul %369, %370, %cst_129 {dimension_numbers = #tpu.dot_dimension_numbers<[1], [0], [0], [1], [0, 0, 1, 1], [], []>} : vector<16x64xf32>, vector<64x1xf32>, vector<16x1xf32> -> vector<16x1xf32>
    %c0_130 = arith.constant 0 : index
    %c0_131 = arith.constant 0 : index
    %372 = vector.load %arg12[%c0_130, %c0_131] : memref<1x1xf32, #tpu.memory_space<vmem>>, vector<1x1xf32>
    %373 = vector.extract %372[0, 0] : f32 from vector<1x1xf32>
    %374 = vector.broadcast %373 : f32 to vector<16x1xf32>
    %375 = arith.addf %371, %374 : vector<16x1xf32>
    %376 = vector.shape_cast %375 : vector<16x1xf32> to vector<8x2x1xf32>
    %cst_132 = arith.constant dense<0xFF800000> : vector<2x1xf32>
    %377 = vector.multi_reduction <maximumf>, %376, %cst_132 [0] : vector<8x2x1xf32> to vector<2x1xf32>
    %378 = vector.shape_cast %377 : vector<2x1xf32> to vector<1x2x1xf32>
    %379 = vector.broadcast %378 : vector<1x2x1xf32> to vector<8x2x1xf32>
    %380 = arith.subf %376, %379 : vector<8x2x1xf32>
    %381 = math.exp %380 : vector<8x2x1xf32>
    %cst_133 = arith.constant dense<0.000000e+00> : vector<2x1xf32>
    %382 = vector.multi_reduction <add>, %381, %cst_133 [0] : vector<8x2x1xf32> to vector<2x1xf32>
    %383 = vector.shape_cast %382 : vector<2x1xf32> to vector<1x2x1xf32>
    %384 = vector.broadcast %383 : vector<1x2x1xf32> to vector<8x2x1xf32>
    %385 = arith.divf %381, %384 : vector<8x2x1xf32>
    %386 = vector.shape_cast %369 : vector<16x64xf32> to vector<8x2x64xf32>
    %387 = vector.broadcast %385 : vector<8x2x1xf32> to vector<8x2x64xf32>
    %388 = arith.mulf %387, %386 : vector<8x2x64xf32>
    %cst_134 = arith.constant dense<0.000000e+00> : vector<2x64xf32>
    %389 = vector.multi_reduction <add>, %388, %cst_134 [0] : vector<8x2x64xf32> to vector<2x64xf32>
    %c0_135 = arith.constant 0 : index
    %c0_136 = arith.constant 0 : index
    %390 = vector.load %arg13[%c0_135, %c0_136] : memref<1x64xf32, #tpu.memory_space<vmem>>, vector<1x64xf32>
    %391 = vector.shape_cast %390 : vector<1x64xf32> to vector<64xf32>
    %392 = vector.shape_cast %391 : vector<64xf32> to vector<1x64xf32>
    %393 = vector.broadcast %392 : vector<1x64xf32> to vector<2x64xf32>
    %394 = arith.mulf %389, %393 : vector<2x64xf32>
    %c0_137 = arith.constant 0 : index
    %c0_138 = arith.constant 0 : index
    %395 = vector.load %arg14[%c0_137, %c0_138] : memref<1x64xf32, #tpu.memory_space<vmem>>, vector<1x64xf32>
    %396 = vector.shape_cast %395 : vector<1x64xf32> to vector<64xf32>
    %397 = vector.shape_cast %396 : vector<64xf32> to vector<1x64xf32>
    %398 = vector.broadcast %397 : vector<1x64xf32> to vector<2x64xf32>
    %399 = arith.addf %394, %398 : vector<2x64xf32>
    %c0_139 = arith.constant 0 : index
    %c0_140 = arith.constant 0 : index
    %400 = vector.load %arg15[%c0_139, %c0_140] : memref<64x128xf32, #tpu.memory_space<vmem>>, vector<64x128xf32>
    %cst_141 = arith.constant dense<0.000000e+00> : vector<2x128xf32>
    %401 = tpu.matmul %399, %400, %cst_141 {dimension_numbers = #tpu.dot_dimension_numbers<[1], [0], [0], [1], [0, 0, 1, 1], [], []>} : vector<2x64xf32>, vector<64x128xf32>, vector<2x128xf32> -> vector<2x128xf32>
    %c0_142 = arith.constant 0 : index
    %c0_143 = arith.constant 0 : index
    %402 = vector.load %arg16[%c0_142, %c0_143] : memref<1x128xf32, #tpu.memory_space<vmem>>, vector<1x128xf32>
    %403 = vector.shape_cast %402 : vector<1x128xf32> to vector<128xf32>
    %404 = vector.shape_cast %403 : vector<128xf32> to vector<1x128xf32>
    %405 = vector.broadcast %404 : vector<1x128xf32> to vector<2x128xf32>
    %406 = arith.addf %401, %405 : vector<2x128xf32>
    %c0_144 = arith.constant 0 : index
    %c0_145 = arith.constant 0 : index
    %407 = vector.load %arg17[%c0_144, %c0_145] : memref<1x128xf32, #tpu.memory_space<vmem>>, vector<1x128xf32>
    %408 = vector.shape_cast %407 : vector<1x128xf32> to vector<128xf32>
    %409 = vector.shape_cast %408 : vector<128xf32> to vector<1x128xf32>
    %410 = vector.broadcast %409 : vector<1x128xf32> to vector<2x128xf32>
    %411 = arith.mulf %406, %410 : vector<2x128xf32>
    %c0_146 = arith.constant 0 : index
    %c0_147 = arith.constant 0 : index
    %412 = vector.load %arg18[%c0_146, %c0_147] : memref<1x128xf32, #tpu.memory_space<vmem>>, vector<1x128xf32>
    %413 = vector.shape_cast %412 : vector<1x128xf32> to vector<128xf32>
    %414 = vector.shape_cast %413 : vector<128xf32> to vector<1x128xf32>
    %415 = vector.broadcast %414 : vector<1x128xf32> to vector<2x128xf32>
    %416 = arith.addf %411, %415 : vector<2x128xf32>
    %cst_148 = arith.constant 0.000000e+00 : f32
    %417 = vector.broadcast %cst_148 : f32 to vector<2x128xf32>
    %418 = arith.maximumf %416, %417 : vector<2x128xf32>
    %c0_149 = arith.constant 0 : index
    %c0_150 = arith.constant 0 : index
    %419 = vector.load %arg19[%c0_149, %c0_150] : memref<128x64xf32, #tpu.memory_space<vmem>>, vector<128x64xf32>
    %cst_151 = arith.constant dense<0.000000e+00> : vector<2x64xf32>
    %420 = tpu.matmul %418, %419, %cst_151 {dimension_numbers = #tpu.dot_dimension_numbers<[1], [0], [0], [1], [0, 0, 1, 1], [], []>} : vector<2x128xf32>, vector<128x64xf32>, vector<2x64xf32> -> vector<2x64xf32>
    %c0_152 = arith.constant 0 : index
    %c0_153 = arith.constant 0 : index
    %421 = vector.load %arg20[%c0_152, %c0_153] : memref<1x64xf32, #tpu.memory_space<vmem>>, vector<1x64xf32>
    %422 = vector.shape_cast %421 : vector<1x64xf32> to vector<64xf32>
    %423 = vector.shape_cast %422 : vector<64xf32> to vector<1x64xf32>
    %424 = vector.broadcast %423 : vector<1x64xf32> to vector<2x64xf32>
    %425 = arith.addf %420, %424 : vector<2x64xf32>
    %c0_154 = arith.constant 0 : index
    %c0_155 = arith.constant 0 : index
    %426 = vector.load %arg21[%c0_154, %c0_155] : memref<1x64xf32, #tpu.memory_space<vmem>>, vector<1x64xf32>
    %427 = vector.shape_cast %426 : vector<1x64xf32> to vector<64xf32>
    %428 = vector.shape_cast %427 : vector<64xf32> to vector<1x64xf32>
    %429 = vector.broadcast %428 : vector<1x64xf32> to vector<2x64xf32>
    %430 = arith.mulf %425, %429 : vector<2x64xf32>
    %c0_156 = arith.constant 0 : index
    %c0_157 = arith.constant 0 : index
    %431 = vector.load %arg22[%c0_156, %c0_157] : memref<1x64xf32, #tpu.memory_space<vmem>>, vector<1x64xf32>
    %432 = vector.shape_cast %431 : vector<1x64xf32> to vector<64xf32>
    %433 = vector.shape_cast %432 : vector<64xf32> to vector<1x64xf32>
    %434 = vector.broadcast %433 : vector<1x64xf32> to vector<2x64xf32>
    %435 = arith.addf %430, %434 : vector<2x64xf32>
    %cst_158 = arith.constant 0.000000e+00 : f32
    %436 = vector.broadcast %cst_158 : f32 to vector<2x64xf32>
    %437 = arith.maximumf %435, %436 : vector<2x64xf32>
    %c0_159 = arith.constant 0 : index
    %c0_160 = arith.constant 0 : index
    %438 = vector.load %arg23[%c0_159, %c0_160] : memref<64x5xf32, #tpu.memory_space<vmem>>, vector<64x5xf32>
    %cst_161 = arith.constant dense<0.000000e+00> : vector<2x5xf32>
    %439 = tpu.matmul %437, %438, %cst_161 {dimension_numbers = #tpu.dot_dimension_numbers<[1], [0], [0], [1], [0, 0, 1, 1], [], []>} : vector<2x64xf32>, vector<64x5xf32>, vector<2x5xf32> -> vector<2x5xf32>
    %c0_162 = arith.constant 0 : index
    %c0_163 = arith.constant 0 : index
    %440 = vector.load %arg24[%c0_162, %c0_163] : memref<1x5xf32, #tpu.memory_space<vmem>>, vector<1x5xf32>
    %441 = vector.shape_cast %440 : vector<1x5xf32> to vector<5xf32>
    %442 = vector.shape_cast %441 : vector<5xf32> to vector<1x5xf32>
    %443 = vector.broadcast %442 : vector<1x5xf32> to vector<2x5xf32>
    %444 = arith.addf %439, %443 : vector<2x5xf32>
    %c0_164 = arith.constant 0 : index
    %c0_165 = arith.constant 0 : index
    %445 = vector.load %arg25[%c0_164, %c0_165] : memref<2x5xf32, #tpu.memory_space<vmem>>, vector<2x5xf32>
    tpu.vector_store %arg25[%c0_164, %c0_165], %444 {strides = array<i32>} : memref<2x5xf32, #tpu.memory_space<vmem>>, vector<2x5xf32>,
    return
  }
  func.func @transform_0(%arg0: i32) -> (i32, i32) {
    %c0_i32 = arith.constant 0 : i32
    %c0_i32_0 = arith.constant 0 : i32
    %c0_i32_1 = arith.constant 0 : i32
    return %c0_i32, %c0_i32_0 : i32, i32
  }
  func.func @transform_1(%arg0: i32) -> (i32, i32, i32) {
    %c0_i32 = arith.constant 0 : i32
    %c0_i32_0 = arith.constant 0 : i32
    %c0_i32_1 = arith.constant 0 : i32
    %c0_i32_2 = arith.constant 0 : i32
    return %c0_i32, %c0_i32_0, %c0_i32_1 : i32, i32, i32
  }
  func.func @transform_2(%arg0: i32) -> (i32, i32) {
    %c0_i32 = arith.constant 0 : i32
    %c0_i32_0 = arith.constant 0 : i32
    %c0_i32_1 = arith.constant 0 : i32
    return %c0_i32, %c0_i32_0 : i32, i32
  }
  func.func @transform_3(%arg0: i32) -> (i32, i32) {
    %c0_i32 = arith.constant 0 : i32
    %c0_i32_0 = arith.constant 0 : i32
    %c0_i32_1 = arith.constant 0 : i32
    return %c0_i32, %c0_i32_0 : i32, i32
  }
  func.func @transform_4(%arg0: i32) -> (i32, i32, i32) {
    %c0_i32 = arith.constant 0 : i32
    %c0_i32_0 = arith.constant 0 : i32
    %c0_i32_1 = arith.constant 0 : i32
    %c0_i32_2 = arith.constant 0 : i32
    return %c0_i32, %c0_i32_0, %c0_i32_1 : i32, i32, i32
  }
  func.func @transform_5(%arg0: i32) -> (i32, i32) {
    %c0_i32 = arith.constant 0 : i32
    %c0_i32_0 = arith.constant 0 : i32
    %c0_i32_1 = arith.constant 0 : i32
    return %c0_i32, %c0_i32_0 : i32, i32
  }
  func.func @transform_6(%arg0: i32) -> (i32, i32) {
    %c0_i32 = arith.constant 0 : i32
    %c0_i32_0 = arith.constant 0 : i32
    %c0_i32_1 = arith.constant 0 : i32
    return %c0_i32, %c0_i32_0 : i32, i32
  }
  func.func @transform_7(%arg0: i32) -> (i32, i32) {
    %c0_i32 = arith.constant 0 : i32
    %c0_i32_0 = arith.constant 0 : i32
    %c0_i32_1 = arith.constant 0 : i32
    return %c0_i32, %c0_i32_0 : i32, i32
  }
  func.func @transform_8(%arg0: i32) -> (i32, i32) {
    %c0_i32 = arith.constant 0 : i32
    %c0_i32_0 = arith.constant 0 : i32
    %c0_i32_1 = arith.constant 0 : i32
    return %c0_i32, %c0_i32_0 : i32, i32
  }
  func.func @transform_9(%arg0: i32) -> (i32, i32) {
    %c0_i32 = arith.constant 0 : i32
    %c0_i32_0 = arith.constant 0 : i32
    %c0_i32_1 = arith.constant 0 : i32
    return %c0_i32, %c0_i32_0 : i32, i32
  }
  func.func @transform_10(%arg0: i32) -> (i32, i32) {
    %c0_i32 = arith.constant 0 : i32
    %c0_i32_0 = arith.constant 0 : i32
    %c0_i32_1 = arith.constant 0 : i32
    return %c0_i32, %c0_i32_0 : i32, i32
  }
  func.func @transform_11(%arg0: i32) -> (i32, i32) {
    %c0_i32 = arith.constant 0 : i32
    %c0_i32_0 = arith.constant 0 : i32
    %c0_i32_1 = arith.constant 0 : i32
    return %c0_i32, %c0_i32_0 : i32, i32
  }
  func.func @transform_12(%arg0: i32) -> (i32, i32) {
    %c0_i32 = arith.constant 0 : i32
    %c0_i32_0 = arith.constant 0 : i32
    %c0_i32_1 = arith.constant 0 : i32
    return %c0_i32, %c0_i32_0 : i32, i32
  }
  func.func @transform_13(%arg0: i32) -> (i32, i32) {
    %c0_i32 = arith.constant 0 : i32
    %c0_i32_0 = arith.constant 0 : i32
    %c0_i32_1 = arith.constant 0 : i32
    return %c0_i32, %c0_i32_0 : i32, i32
  }
  func.func @transform_14(%arg0: i32) -> (i32, i32) {
    %c0_i32 = arith.constant 0 : i32
    %c0_i32_0 = arith.constant 0 : i32
    %c0_i32_1 = arith.constant 0 : i32
    return %c0_i32, %c0_i32_0 : i32, i32
  }
  func.func @transform_15(%arg0: i32) -> (i32, i32) {
    %c0_i32 = arith.constant 0 : i32
    %c0_i32_0 = arith.constant 0 : i32
    %c0_i32_1 = arith.constant 0 : i32
    return %c0_i32, %c0_i32_0 : i32, i32
  }
  func.func @transform_16(%arg0: i32) -> (i32, i32) {
    %c0_i32 = arith.constant 0 : i32
    %c0_i32_0 = arith.constant 0 : i32
    %c0_i32_1 = arith.constant 0 : i32
    return %c0_i32, %c0_i32_0 : i32, i32
  }
  func.func @transform_17(%arg0: i32) -> (i32, i32) {
    %c0_i32 = arith.constant 0 : i32
    %c0_i32_0 = arith.constant 0 : i32
    %c0_i32_1 = arith.constant 0 : i32
    return %c0_i32, %c0_i32_0 : i32, i32
  }
  func.func @transform_18(%arg0: i32) -> (i32, i32) {
    %c0_i32 = arith.constant 0 : i32
    %c0_i32_0 = arith.constant 0 : i32
    %c0_i32_1 = arith.constant 0 : i32
    return %c0_i32, %c0_i32_0 : i32, i32
  }
  func.func @transform_19(%arg0: i32) -> (i32, i32) {
    %c0_i32 = arith.constant 0 : i32
    %c0_i32_0 = arith.constant 0 : i32
    %c0_i32_1 = arith.constant 0 : i32
    return %c0_i32, %c0_i32_0 : i32, i32
  }
  func.func @transform_20(%arg0: i32) -> (i32, i32) {
    %c0_i32 = arith.constant 0 : i32
    %c0_i32_0 = arith.constant 0 : i32
    %c0_i32_1 = arith.constant 0 : i32
    return %c0_i32, %c0_i32_0 : i32, i32
  }
  func.func @transform_21(%arg0: i32) -> (i32, i32) {
    %c0_i32 = arith.constant 0 : i32
    %c0_i32_0 = arith.constant 0 : i32
    %c0_i32_1 = arith.constant 0 : i32
    return %c0_i32, %c0_i32_0 : i32, i32
  }
  func.func @transform_22(%arg0: i32) -> (i32, i32) {
    %c0_i32 = arith.constant 0 : i32
    %c0_i32_0 = arith.constant 0 : i32
    %c0_i32_1 = arith.constant 0 : i32
    return %c0_i32, %c0_i32_0 : i32, i32
  }
  func.func @transform_23(%arg0: i32) -> (i32, i32) {
    %c0_i32 = arith.constant 0 : i32
    %c0_i32_0 = arith.constant 0 : i32
    %c0_i32_1 = arith.constant 0 : i32
    return %c0_i32, %c0_i32_0 : i32, i32
  }
  func.func @transform_24(%arg0: i32) -> (i32, i32) {
    %c0_i32 = arith.constant 0 : i32
    %c0_i32_0 = arith.constant 0 : i32
    %c0_i32_1 = arith.constant 0 : i32
    return %c0_i32, %c0_i32_0 : i32, i32
  }
}

</mosaic_0001>

<bundles_post_ra>
// kernel: forward.1
= control target key start
LH: loop header
LB: loop body
LE: loop exit
PB: predicated region body
PF: predicated region fallthrough
CT: control target
= control target key end

     0   :  { %s5034_s0 = inlined_call_operand.vmem [shape: f32[32,4], index: 0, kind: input, shape index: {}]   ;;  %s5035_s1 = inlined_call_operand.hbm [shape: f32[3,4,64], index: 1, kind: input, shape index: {}]   ;;  %s5036_s2 = inlined_call_operand.hbm [shape: f32[1,64], index: 2, kind: input, shape index: {}]   ;;  %s5037_s3 = inlined_call_operand.hbm [shape: f32[1,64], index: 3, kind: input, shape index: {}]   ;;  %s5038_s4 = inlined_call_operand.vmem [shape: f32[3,64,64], index: 4, kind: input, shape index: {}]   ;;  %s5039_s5 = inlined_call_operand.hbm [shape: f32[1,64], index: 5, kind: input, shape index: {}]   ;;  %s5040_s6 = inlined_call_operand.hbm [shape: f32[1,64], index: 6, kind: input, shape index: {}]   ;;  %s5041_s7 = inlined_call_operand.vmem [shape: f32[64,256], index: 7, kind: input, shape index: {}]   ;;  %s5042_s8 = inlined_call_operand.hbm [shape: f32[64,256], index: 8, kind: input, shape index: {}]   ;;  %s5043_s9 = inlined_call_operand.hbm [shape: f32[1,256], index: 9, kind: input, shape index: {}]   ;;  %s5044_s10 = inlined_call_operand.vmem [shape: f32[64,1], index: 10, kind: input, shape index: {}]   ;;  %s5045_s11 = inlined_call_operand.<no memory space> [shape: f32[1,1], index: 11, kind: input, shape index: {}]   ;;  %s5046_s12 = inlined_call_operand.hbm [shape: f32[1,64], index: 12, kind: input, shape index: {}]   ;;  %s5047_s13 = inlined_call_operand.hbm [shape: f32[1,64], index: 13, kind: input, shape index: {}]   ;;  %s5048_s14 = inlined_call_operand.vmem [shape: f32[64,128], index: 14, kind: input, shape index: {}]   ;;  %s5049_s15 = inlined_call_operand.hbm [shape: f32[1,128], index: 15, kind: input, shape index: {}]   ;;  %s5050_s16 = inlined_call_operand.hbm [shape: f32[1,128], index: 16, kind: input, shape index: {}]   ;;  %s5051_s17 = inlined_call_operand.hbm [shape: f32[1,128], index: 17, kind: input, shape index: {}]   ;;  %s5052_s18 = inlined_call_operand.vmem [shape: f32[128,64], index: 18, kind: input, shape index: {}]   ;;  %s5053_s19 = inlined_call_operand.hbm [shape: f32[1,64], index: 19, kind: input, shape index: {}]   ;;  %s5054_s20 = inlined_call_operand.hbm [shape: f32[1,64], index: 20, kind: input, shape index: {}]   ;;  %s5055_s21 = inlined_call_operand.hbm [shape: f32[1,64], index: 21, kind: input, shape index: {}]   ;;  %s5056_s22 = inlined_call_operand.vmem [shape: f32[64,5], index: 22, kind: input, shape index: {}]   ;;  %s5057_s23 = inlined_call_operand.hbm [shape: f32[1,5], index: 23, kind: input, shape index: {}]   ;;  %s5058_s24 = inlined_call_operand.hbm [shape: f32[2,5], index: 24, kind: output, shape index: {}]  }
   0x1   :  { %5069 = sst [smem:[#allocation43_spill]] %s5034_s0  ;;  %v29_v0 = vstv %s5045_s11 }
   0x2   :  { %5070 = sst [smem:[#allocation44_spill]] %s5035_s1  ;;  %30 = vst [vmem:[#allocation5] sm:$0x1] %v29_v0 }
   0x3   :  { %5071 = sst [smem:[#allocation45_spill]] %s5036_s2 }
   0x4   :  { %5072 = sst [smem:[#allocation46_spill]] %s5037_s3 }
   0x5   :  { %5073 = sst [smem:[#allocation47_spill]] %s5038_s4 }
   0x6   :  { %5074 = sst [smem:[#allocation48_spill]] %s5039_s5 }
   0x7   :  { %5075 = sst [smem:[#allocation49_spill]] %s5040_s6 }
   0x8   :  { %5076 = sst [smem:[#allocation50_spill]] %s5041_s7 }
   0x9   :  { %5077 = sst [smem:[#allocation51_spill]] %s5042_s8 }
   0xa   :  { %5078 = sst [smem:[#allocation52_spill]] %s5058_s24 }
   0xb   :  { %31 = vsyncpa [#allocation7], 0 }
   0xc   :  { %32 = vsyncpa [#allocation10], 0 }
   0xd   :  { %33 = vsyncpa [#allocation13], 0 }
   0xe   :  { %34 = vsyncpa [#allocation16], 0 }
   0xf   :  { %35 = vsyncpa [#allocation19], 0 }
  0x10   :  { %36 = vsyncpa [#allocation22], 0 }
  0x11   :  { %37 = vsyncpa [#allocation25], 0 }
  0x12   :  { %38 = vsyncpa [#allocation28], 0 }
  0x13   :  { %39 = vsyncpa [#allocation31], 0 }
  0x14   :  { %40 = vsyncpa [#allocation8], 0  ;;  %s4067_s27 = smov [#allocation9]   ;;  %s4068_s6 = smov [#allocation12]  }
  0x15   :  { %s61_s28 = sshll.u32 %s4067_s27, 4  ;;  %s83_s2 = sshll.u32 %s4068_s6, 4  ;;  %s62_s28 = int_to_ptr.vmem [resolvable:$true] %s61_s28  ;;  %s84_s2 = int_to_ptr.vmem [resolvable:$true] %s83_s2 }
  0x16   :  { %s5079_s11 = sld [smem:[#allocation45_spill]] }
  0x1c   :  { %s3673_s7 = scalar_lea.hbm %s5079_s11, 16 }
  0x1d   :  { %p3674_p0 = scmp.ne.s32.totalorder %s5079_s11, %s3673_s7  ;;  %p3677_p1 = scmp.lt.u32.totalorder %s3673_s7, %s5079_s11 }
  0x1f   :  { %p3679_p2 = pnand %p3677_p1, %p3674_p0 }
  0x21   :  { %3682 = shalt.err (!%p3679_p2)
}
  0x22   :  { %s3683_s4 = scalar_lea.vmem %s62_s28, 16  ;;  %s3687_s1 = scalar_lea.vmem %s62_s28, 32 }
  0x23   :  { %p3684_p3 = scmp.ne.s32.totalorder %s62_s28, %s3683_s4  ;;  %p3688_p4 = scmp.lt.s32.totalorder %s62_s28, %s62_s28 }
  0x24   :  { %p3689_p5 = scmp.lt.s32.totalorder %s3687_s1, %s3683_s4 }
  0x26   :  { %p3690_p6 = por %p3689_p5, %p3688_p4 }
  0x28   :  { %p3691_p7 = pnand %p3690_p6, %p3684_p3 }
  0x2a   :  { %3694 = shalt.err (!%p3691_p7)
}
  0x2b   :  { %64 = dma.hbm_to_vmem [thread:$0]  %s5079_s11, 16, %s62_s28, [#allocation10]  }
  0x2c   :  { %s5080_s29 = sld [smem:[#allocation48_spill]] }
  0x32   :  { %s3695_s0 = scalar_lea.hbm %s5080_s29, 16 }
  0x33   :  { %p3696_p8 = scmp.ne.s32.totalorder %s5080_s29, %s3695_s0  ;;  %p3699_p9 = scmp.lt.u32.totalorder %s3695_s0, %s5080_s29 }
  0x35   :  { %p3701_p10 = pnand %p3699_p9, %p3696_p8 }
  0x37   :  { %3704 = shalt.err (!%p3701_p10)
}
  0x38   :  { %s3705_s8 = scalar_lea.vmem %s84_s2, 16  ;;  %s3709_s4 = scalar_lea.vmem %s84_s2, 32 }
  0x39   :  { %p3706_p11 = scmp.ne.s32.totalorder %s84_s2, %s3705_s8  ;;  %p3710_p12 = scmp.lt.s32.totalorder %s84_s2, %s84_s2 }
  0x3a   :  { %p3711_p13 = scmp.lt.s32.totalorder %s3709_s4, %s3705_s8 }
  0x3c   :  { %p3712_p0 = por %p3711_p13, %p3710_p12 }
  0x3e   :  { %p3713_p1 = pnand %p3712_p0, %p3706_p11 }
  0x40   :  { %3716 = shalt.err (!%p3713_p1)
}
  0x41   :  { %86 = dma.hbm_to_vmem [thread:$0]  %s5080_s29, 16, %s84_s2, [#allocation13]  }
  0x42   :  { %s4069_s1 = smov [#allocation15]   ;;  %s5081_s6 = sld [smem:[#allocation51_spill]] }
  0x43   :  { %s104_s5 = sshll.u32 %s4069_s1, 4  ;;  %s105_s5 = int_to_ptr.vmem [resolvable:$true] %s104_s5 }
  0x48   :  { %s3717_s0 = scalar_lea.hbm %s5081_s6, 2048 }
  0x49   :  { %p3718_p2 = scmp.ne.s32.totalorder %s5081_s6, %s3717_s0  ;;  %p3721_p3 = scmp.lt.u32.totalorder %s3717_s0, %s5081_s6 }
  0x4b   :  { %p3723_p4 = pnand %p3721_p3, %p3718_p2 }
  0x4d   :  { %3726 = shalt.err (!%p3723_p4)
}
  0x4e   :  { %s3727_s8 = scalar_lea.vmem %s105_s5, 2048  ;;  %p3732_p6 = scmp.lt.s32.totalorder %s105_s5, %s105_s5 }
  0x4f   :  { %p3728_p5 = scmp.ne.s32.totalorder %s105_s5, %s3727_s8  ;;  %p3733_p7 = scmp.lt.s32.totalorder %s3727_s8, %s3727_s8 }
  0x51   :  { %p3734_p8 = por %p3733_p7, %p3732_p6 }
  0x53   :  { %p3735_p9 = pnand %p3734_p8, %p3728_p5 }
  0x55   :  { %3738 = shalt.err (!%p3735_p9)
}
  0x56   :  { %s4070_s2 = smov 256   ;;  %s4071_s29 = smov 16  }
  0x57   :  { %110 = dma.hbm_to_vmem [thread:$0]  %s5081_s6, 2048, %s105_s5, [#allocation16], %s4070_s2, %s4070_s2, %s4071_s29  }
  0x58   :  { %s4072_s11 = smov [#allocation18]   ;;  %s4073_s26 = smov [#allocation21]  }
  0x59   :  { %s131_s1 = sshll.u32 %s4072_s11, 4  ;;  %s153_s27 = sshll.u32 %s4073_s26, 4  ;;  %s132_s1 = int_to_ptr.vmem [resolvable:$true] %s131_s1  ;;  %s154_s27 = int_to_ptr.vmem [resolvable:$true] %s153_s27 }
  0x5a   :  { %s3739_s7 = scalar_lea.hbm %s5046_s12, 16 }
  0x5b   :  { %p3740_p10 = scmp.ne.s32.totalorder %s5046_s12, %s3739_s7  ;;  %p3743_p11 = scmp.lt.u32.totalorder %s3739_s7, %s5046_s12 }
  0x5d   :  { %p3745_p12 = pnand %p3743_p11, %p3740_p10 }
  0x5f   :  { %3748 = shalt.err (!%p3745_p12)
}
  0x60   :  { %s3749_s5 = scalar_lea.vmem %s132_s1, 16  ;;  %s3753_s6 = scalar_lea.vmem %s132_s1, 32 }
  0x61   :  { %p3750_p13 = scmp.ne.s32.totalorder %s132_s1, %s3749_s5  ;;  %p3754_p0 = scmp.lt.s32.totalorder %s132_s1, %s132_s1 }
  0x62   :  { %p3755_p1 = scmp.lt.s32.totalorder %s3753_s6, %s3749_s5 }
  0x64   :  { %p3756_p2 = por %p3755_p1, %p3754_p0 }
  0x66   :  { %p3757_p3 = pnand %p3756_p2, %p3750_p13 }
  0x68   :  { %3760 = shalt.err (!%p3757_p3)
}
  0x69   :  { %134 = dma.hbm_to_vmem [thread:$0]  %s5046_s12, 16, %s132_s1, [#allocation19]  }
  0x6a   :  { %s3761_s24 = scalar_lea.hbm %s5049_s15, 16 }
  0x6b   :  { %p3762_p4 = scmp.ne.s32.totalorder %s5049_s15, %s3761_s24  ;;  %p3765_p5 = scmp.lt.u32.totalorder %s3761_s24, %s5049_s15 }
  0x6d   :  { %p3767_p6 = pnand %p3765_p5, %p3762_p4 }
  0x6f   :  { %3770 = shalt.err (!%p3767_p6)
}
  0x70   :  { %s3771_s7 = scalar_lea.vmem %s154_s27, 16  ;;  %s3775_s3 = scalar_lea.vmem %s154_s27, 32 }
  0x71   :  { %p3772_p7 = scmp.ne.s32.totalorder %s154_s27, %s3771_s7  ;;  %p3776_p8 = scmp.lt.s32.totalorder %s154_s27, %s154_s27 }
  0x72   :  { %p3777_p9 = scmp.lt.s32.totalorder %s3775_s3, %s3771_s7 }
  0x74   :  { %p3778_p10 = por %p3777_p9, %p3776_p8 }
  0x76   :  { %p3779_p11 = pnand %p3778_p10, %p3772_p7 }
  0x78   :  { %3782 = shalt.err (!%p3779_p11)
}
  0x79   :  { %156 = dma.hbm_to_vmem [thread:$0]  %s5049_s15, 16, %s154_s27, [#allocation22]  }
  0x7a   :  { %s4074_s25 = smov [#allocation24]   ;;  %s4075_s5 = smov [#allocation27]  }
  0x7b   :  { %s173_s8 = sshll.u32 %s4074_s25, 4  ;;  %s195_s6 = sshll.u32 %s4075_s5, 4  ;;  %s174_s8 = int_to_ptr.vmem [resolvable:$true] %s173_s8  ;;  %s196_s6 = int_to_ptr.vmem [resolvable:$true] %s195_s6 }
  0x7c   :  { %s3783_s4 = scalar_lea.hbm %s5051_s17, 16 }
  0x7d   :  { %p3784_p12 = scmp.ne.s32.totalorder %s5051_s17, %s3783_s4  ;;  %p3787_p13 = scmp.lt.u32.totalorder %s3783_s4, %s5051_s17 }
  0x7f   :  { %p3789_p0 = pnand %p3787_p13, %p3784_p12 }
  0x81   :  { %3792 = shalt.err (!%p3789_p0)
}
  0x82   :  { %s3793_s15 = scalar_lea.vmem %s174_s8, 16  ;;  %s3797_s27 = scalar_lea.vmem %s174_s8, 32 }
  0x83   :  { %p3794_p1 = scmp.ne.s32.totalorder %s174_s8, %s3793_s15  ;;  %p3798_p2 = scmp.lt.s32.totalorder %s174_s8, %s174_s8 }
  0x84   :  { %p3799_p3 = scmp.lt.s32.totalorder %s3797_s27, %s3793_s15 }
  0x86   :  { %p3800_p4 = por %p3799_p3, %p3798_p2 }
  0x88   :  { %p3801_p5 = pnand %p3800_p4, %p3794_p1 }
  0x8a   :  { %3804 = shalt.err (!%p3801_p5)
}
  0x8b   :  { %176 = dma.hbm_to_vmem [thread:$0]  %s5051_s17, 16, %s174_s8, [#allocation25]  }
  0x8c   :  { %s3805_s12 = scalar_lea.hbm %s5054_s20, 16 }
  0x8d   :  { %p3806_p6 = scmp.ne.s32.totalorder %s5054_s20, %s3805_s12  ;;  %p3809_p7 = scmp.lt.u32.totalorder %s3805_s12, %s5054_s20 }
  0x8f   :  { %p3811_p8 = pnand %p3809_p7, %p3806_p6 }
  0x91   :  { %3814 = shalt.err (!%p3811_p8)
}
  0x92   :  { %s3815_s29 = scalar_lea.vmem %s196_s6, 16  ;;  %s3819_s4 = scalar_lea.vmem %s196_s6, 32 }
  0x93   :  { %p3816_p9 = scmp.ne.s32.totalorder %s196_s6, %s3815_s29  ;;  %p3820_p10 = scmp.lt.s32.totalorder %s196_s6, %s196_s6 }
  0x94   :  { %p3821_p11 = scmp.lt.s32.totalorder %s3819_s4, %s3815_s29 }
  0x96   :  { %p3822_p12 = por %p3821_p11, %p3820_p10 }
  0x98   :  { %p3823_p13 = pnand %p3822_p12, %p3816_p9 }
  0x9a   :  { %3826 = shalt.err (!%p3823_p13)
}
  0x9b   :  { %198 = dma.hbm_to_vmem [thread:$0]  %s5054_s20, 16, %s196_s6, [#allocation28]  }
  0x9c   :  { %s4076_s28 = smov [#allocation6]   ;;  %s5082_s15 = sld [smem:[#allocation44_spill]] }
  0x9d   :  { %s48_s24 = sshll.u32 %s4076_s28, 4  ;;  %s49_s24 = int_to_ptr.vmem [resolvable:$true] %s48_s24 }
  0xa2   :  { %s3827_s27 = scalar_lea.hbm %s5082_s15, 192 }
  0xa3   :  { %p3828_p0 = scmp.ne.s32.totalorder %s5082_s15, %s3827_s27  ;;  %p3831_p1 = scmp.lt.u32.totalorder %s3827_s27, %s5082_s15 }
  0xa5   :  { %p3833_p2 = pnand %p3831_p1, %p3828_p0 }
  0xa7   :  { %3836 = shalt.err (!%p3833_p2)
}
  0xa8   :  { %s3837_s12 = scalar_lea.vmem %s49_s24, 192  ;;  %p3842_p4 = scmp.lt.s32.totalorder %s49_s24, %s49_s24 }
  0xa9   :  { %p3838_p3 = scmp.ne.s32.totalorder %s49_s24, %s3837_s12  ;;  %p3843_p5 = scmp.lt.s32.totalorder %s3837_s12, %s3837_s12 }
  0xab   :  { %p3844_p6 = por %p3843_p5, %p3842_p4 }
  0xad   :  { %p3845_p7 = pnand %p3844_p6, %p3838_p3 }
  0xaf   :  { %3848 = shalt.err (!%p3845_p7)
}
  0xb0   :  { %s4077_s20 = smov 64   ;;  %s4078_s6 = smov 4  }
  0xb1   :  { %54 = dma.hbm_to_vmem [thread:$0]  %s5082_s15, 192, %s49_s24, [#allocation7], %s4077_s20, %s4077_s20, %s4078_s6  }
  0xb2   :  { %s4079_s5 = smov [#allocation11]   ;;  %s4080_s29 = smov [#allocation14]  }
  0xb3   :  { %s71_s2 = sshll.u32 %s4079_s5, 4  ;;  %s93_s4 = sshll.u32 %s4080_s29, 4  ;;  %s72_s2 = int_to_ptr.vmem [resolvable:$true] %s71_s2  ;;  %s94_s4 = int_to_ptr.vmem [resolvable:$true] %s93_s4 }
  0xb4   :  { %s5083_s28 = sld [smem:[#allocation46_spill]] }
  0xba   :  { %s3849_s11 = scalar_lea.hbm %s5083_s28, 16 }
  0xbb   :  { %p3850_p8 = scmp.ne.s32.totalorder %s5083_s28, %s3849_s11  ;;  %p3853_p9 = scmp.lt.u32.totalorder %s3849_s11, %s5083_s28 }
  0xbd   :  { %p3855_p10 = pnand %p3853_p9, %p3850_p8 }
  0xbf   :  { %3858 = shalt.err (!%p3855_p10)
}
  0xc0   :  { %s3859_s24 = scalar_lea.vmem %s72_s2, 16  ;;  %s3863_s15 = scalar_lea.vmem %s72_s2, 32 }
  0xc1   :  { %p3860_p11 = scmp.ne.s32.totalorder %s72_s2, %s3859_s24  ;;  %p3864_p12 = scmp.lt.s32.totalorder %s72_s2, %s72_s2 }
  0xc2   :  { %p3865_p13 = scmp.lt.s32.totalorder %s3863_s15, %s3859_s24 }
  0xc4   :  { %p3866_p0 = por %p3865_p13, %p3864_p12 }
  0xc6   :  { %p3867_p1 = pnand %p3866_p0, %p3860_p11 }
  0xc8   :  { %3870 = shalt.err (!%p3867_p1)
}
  0xc9   :  { %74 = dma.hbm_to_vmem [thread:$0]  %s5083_s28, 16, %s72_s2, [#allocation10]  }
  0xca   :  { %s5084_s1 = sld [smem:[#allocation49_spill]] }
  0xd0   :  { %s3871_s25 = scalar_lea.hbm %s5084_s1, 16 }
  0xd1   :  { %p3872_p2 = scmp.ne.s32.totalorder %s5084_s1, %s3871_s25  ;;  %p3875_p3 = scmp.lt.u32.totalorder %s3871_s25, %s5084_s1 }
  0xd3   :  { %p3877_p4 = pnand %p3875_p3, %p3872_p2 }
  0xd5   :  { %3880 = shalt.err (!%p3877_p4)
}
  0xd6   :  { %s3881_s11 = scalar_lea.vmem %s94_s4, 16  ;;  %s3885_s26 = scalar_lea.vmem %s94_s4, 32 }
  0xd7   :  { %p3882_p5 = scmp.ne.s32.totalorder %s94_s4, %s3881_s11  ;;  %p3886_p6 = scmp.lt.s32.totalorder %s94_s4, %s94_s4 }
  0xd8   :  { %p3887_p7 = scmp.lt.s32.totalorder %s3885_s26, %s3881_s11 }
  0xda   :  { %p3888_p8 = por %p3887_p7, %p3886_p6 }
  0xdc   :  { %p3889_p9 = pnand %p3888_p8, %p3882_p5 }
  0xde   :  { %3892 = shalt.err (!%p3889_p9)
}
  0xdf   :  { %96 = dma.hbm_to_vmem [thread:$0]  %s5084_s1, 16, %s94_s4, [#allocation13]  }
  0xe0   :  { %s4081_s27 = smov [#allocation17]   ;;  %s4082_s30 = smov [#allocation20]  }
  0xe1   :  { %s117_s0 = sshll.u32 %s4081_s27, 4  ;;  %s141_s24 = sshll.u32 %s4082_s30, 4  ;;  %s118_s0 = int_to_ptr.vmem [resolvable:$true] %s117_s0  ;;  %s142_s24 = int_to_ptr.vmem [resolvable:$true] %s141_s24 }
  0xe2   :  { %s3893_s3 = scalar_lea.hbm %s5043_s9, 32 }
  0xe3   :  { %p3894_p10 = scmp.ne.s32.totalorder %s5043_s9, %s3893_s3  ;;  %p3897_p11 = scmp.lt.u32.totalorder %s3893_s3, %s5043_s9 }
  0xe5   :  { %p3899_p12 = pnand %p3897_p11, %p3894_p10 }
  0xe7   :  { %3902 = shalt.err (!%p3899_p12)
}
  0xe8   :  { %s3903_s4 = scalar_lea.vmem %s118_s0, 32  ;;  %p3908_p0 = scmp.lt.s32.totalorder %s118_s0, %s118_s0 }
  0xe9   :  { %p3904_p13 = scmp.ne.s32.totalorder %s118_s0, %s3903_s4  ;;  %p3909_p1 = scmp.lt.s32.totalorder %s3903_s4, %s3903_s4 }
  0xeb   :  { %p3910_p2 = por %p3909_p1, %p3908_p0 }
  0xed   :  { %p3911_p3 = pnand %p3910_p2, %p3904_p13 }
  0xef   :  { %3914 = shalt.err (!%p3911_p3)
}
  0xf0   :  { %120 = dma.hbm_to_vmem [thread:$0]  %s5043_s9, 32, %s118_s0, [#allocation16]  }
  0xf1   :  { %s3915_s11 = scalar_lea.hbm %s5047_s13, 16 }
  0xf2   :  { %p3916_p4 = scmp.ne.s32.totalorder %s5047_s13, %s3915_s11  ;;  %p3919_p5 = scmp.lt.u32.totalorder %s3915_s11, %s5047_s13 }
  0xf4   :  { %p3921_p6 = pnand %p3919_p5, %p3916_p4 }
  0xf6   :  { %3924 = shalt.err (!%p3921_p6)
}
  0xf7   :  { %s3925_s30 = scalar_lea.vmem %s142_s24, 16  ;;  %s3929_s15 = scalar_lea.vmem %s142_s24, 32 }
  0xf8   :  { %p3926_p7 = scmp.ne.s32.totalorder %s142_s24, %s3925_s30  ;;  %p3930_p8 = scmp.lt.s32.totalorder %s142_s24, %s142_s24 }
  0xf9   :  { %p3931_p9 = scmp.lt.s32.totalorder %s3929_s15, %s3925_s30 }
  0xfb   :  { %p3932_p10 = por %p3931_p9, %p3930_p8 }
  0xfd   :  { %p3933_p11 = pnand %p3932_p10, %p3926_p7 }
  0xff   :  { %3936 = shalt.err (!%p3933_p11)
}
 0x100   :  { %144 = dma.hbm_to_vmem [thread:$0]  %s5047_s13, 16, %s142_s24, [#allocation19]  }
 0x101   :  { %s4083_s7 = smov [#allocation23]   ;;  %s4084_s12 = smov [#allocation26]  }
 0x102   :  { %s163_s3 = sshll.u32 %s4083_s7, 4  ;;  %s185_s6 = sshll.u32 %s4084_s12, 4  ;;  %s164_s3 = int_to_ptr.vmem [resolvable:$true] %s163_s3  ;;  %s186_s6 = int_to_ptr.vmem [resolvable:$true] %s185_s6 }
 0x103   :  { %s3937_s4 = scalar_lea.hbm %s5050_s16, 16 }
 0x104   :  { %p3938_p12 = scmp.ne.s32.totalorder %s5050_s16, %s3937_s4  ;;  %p3941_p13 = scmp.lt.u32.totalorder %s3937_s4, %s5050_s16 }
 0x106   :  { %p3943_p0 = pnand %p3941_p13, %p3938_p12 }
 0x108   :  { %3946 = shalt.err (!%p3943_p0)
}
 0x109   :  { %s3947_s13 = scalar_lea.vmem %s164_s3, 16  ;;  %s3951_s24 = scalar_lea.vmem %s164_s3, 32 }
 0x10a   :  { %p3948_p1 = scmp.ne.s32.totalorder %s164_s3, %s3947_s13  ;;  %p3952_p2 = scmp.lt.s32.totalorder %s164_s3, %s164_s3 }
 0x10b   :  { %p3953_p3 = scmp.lt.s32.totalorder %s3951_s24, %s3947_s13 }
 0x10d   :  { %p3954_p4 = por %p3953_p3, %p3952_p2 }
 0x10f   :  { %p3955_p5 = pnand %p3954_p4, %p3948_p1 }
 0x111   :  { %3958 = shalt.err (!%p3955_p5)
}
 0x112   :  { %166 = dma.hbm_to_vmem [thread:$0]  %s5050_s16, 16, %s164_s3, [#allocation22]  }
 0x113   :  { %s3959_s27 = scalar_lea.hbm %s5053_s19, 16 }
 0x114   :  { %p3960_p6 = scmp.ne.s32.totalorder %s5053_s19, %s3959_s27  ;;  %p3963_p7 = scmp.lt.u32.totalorder %s3959_s27, %s5053_s19 }
 0x116   :  { %p3965_p8 = pnand %p3963_p7, %p3960_p6 }
 0x118   :  { %3968 = shalt.err (!%p3965_p8)
}
 0x119   :  { %s3969_s7 = scalar_lea.vmem %s186_s6, 16  ;;  %s3973_s12 = scalar_lea.vmem %s186_s6, 32 }
 0x11a   :  { %p3970_p9 = scmp.ne.s32.totalorder %s186_s6, %s3969_s7  ;;  %p3974_p10 = scmp.lt.s32.totalorder %s186_s6, %s186_s6 }
 0x11b   :  { %p3975_p11 = scmp.lt.s32.totalorder %s3973_s12, %s3969_s7 }
 0x11d   :  { %p3976_p12 = por %p3975_p11, %p3974_p10 }
 0x11f   :  { %p3977_p13 = pnand %p3976_p12, %p3970_p9 }
 0x121   :  { %3980 = shalt.err (!%p3977_p13)
}
 0x122   :  { %188 = dma.hbm_to_vmem [thread:$0]  %s5053_s19, 16, %s186_s6, [#allocation25]  }
 0x123   :  { %s4085_s25 = smov [#allocation29]   ;;  %s4086_s4 = smov [#allocation30]  }
 0x124   :  { %s205_s5 = sshll.u32 %s4085_s25, 4  ;;  %s217_s1 = sshll.u32 %s4086_s4, 4  ;;  %s206_s5 = int_to_ptr.vmem [resolvable:$true] %s205_s5  ;;  %s218_s1 = int_to_ptr.vmem [resolvable:$true] %s217_s1 }
 0x125   :  { %s3981_s8 = scalar_lea.hbm %s5055_s21, 16 }
 0x126   :  { %p3982_p0 = scmp.ne.s32.totalorder %s5055_s21, %s3981_s8  ;;  %p3985_p1 = scmp.lt.u32.totalorder %s3981_s8, %s5055_s21 }
 0x128   :  { %p3987_p2 = pnand %p3985_p1, %p3982_p0 }
 0x12a   :  { %3990 = shalt.err (!%p3987_p2)
}
 0x12b   :  { %s3991_s19 = scalar_lea.vmem %s206_s5, 16  ;;  %s3995_s6 = scalar_lea.vmem %s206_s5, 32 }
 0x12c   :  { %p3992_p3 = scmp.ne.s32.totalorder %s206_s5, %s3991_s19  ;;  %p3996_p4 = scmp.lt.s32.totalorder %s206_s5, %s206_s5 }
 0x12d   :  { %p3997_p5 = scmp.lt.s32.totalorder %s3995_s6, %s3991_s19 }
 0x12f   :  { %p3998_p6 = por %p3997_p5, %p3996_p4 }
 0x131   :  { %p3999_p7 = pnand %p3998_p6, %p3992_p3 }
 0x133   :  { %4002 = shalt.err (!%p3999_p7)
}
 0x134   :  { %208 = dma.hbm_to_vmem [thread:$0]  %s5055_s21, 16, %s206_s5, [#allocation28]  }
 0x135   :  { %s4003_s15 = scalar_lea.hbm %s5057_s23, 16 }
 0x136   :  { %p4004_p8 = scmp.ne.s32.totalorder %s5057_s23, %s4003_s15  ;;  %p4007_p9 = scmp.lt.u32.totalorder %s4003_s15, %s5057_s23 }
 0x138   :  { %p4009_p10 = pnand %p4007_p9, %p4004_p8 }
 0x13a   :  { %4012 = shalt.err (!%p4009_p10)
}
 0x13b   :  { %s4013_s16 = scalar_lea.vmem %s218_s1, 16  ;;  %s4017_s3 = scalar_lea.vmem %s218_s1, 32 }
 0x13c   :  { %p4014_p11 = scmp.ne.s32.totalorder %s218_s1, %s4013_s16  ;;  %p4018_p12 = scmp.lt.s32.totalorder %s218_s1, %s218_s1 }
 0x13d   :  { %p4019_p13 = scmp.lt.s32.totalorder %s4017_s3, %s4013_s16 }
 0x13f   :  { %p4020_p0 = por %p4019_p13, %p4018_p12 }
 0x141   :  { %p4021_p1 = pnand %p4020_p0, %p4014_p11 }
 0x143   :  { %4024 = shalt.err (!%p4021_p1)
}
 0x144   :  { %220 = dma.hbm_to_vmem [thread:$0]  %s5057_s23, 16, %s218_s1, [#allocation31]  }
 0x145   :  { %4047 = dma.done.wait [#allocation7], 192  }
 0x146   :  { %4048 = vsyncadd [#allocation7], 4294967104 }
 0x147   :  { %4049 = dma.done.wait [#allocation10], 32  }
 0x148   :  { %4050 = vsyncadd [#allocation10], 4294967264 }
 0x149   :  { %4051 = dma.done.wait [#allocation13], 32  }
 0x14a   :  { %4052 = vsyncadd [#allocation13], 4294967264 }
 0x14b   :  { %4053 = dma.done.wait [#allocation16], 2080  }
 0x14c   :  { %4054 = vsyncadd [#allocation16], 4294965216 }
 0x14d   :  { %4055 = dma.done.wait [#allocation19], 32  }
 0x14e   :  { %4056 = vsyncadd [#allocation19], 4294967264 }
 0x14f   :  { %4057 = dma.done.wait [#allocation22], 32  }
 0x150   :  { %4058 = vsyncadd [#allocation22], 4294967264 }
 0x151   :  { %4059 = dma.done.wait [#allocation25], 32  }
 0x152   :  { %4060 = vsyncadd [#allocation25], 4294967264 }
 0x153   :  { %4061 = dma.done.wait [#allocation28], 32  }
 0x154   :  { %4062 = vsyncadd [#allocation28], 4294967264 }
 0x155   :  { %4063 = dma.done.wait [#allocation31], 16  }
 0x156   :  { %4064 = vsyncadd [#allocation31], 4294967280  ;;  %vm273_vm0 = vcmask 31744   ;;  %vm278_vm1 = vcmask 27648   ;;  %v4087_v1 = vmov 0.0   ;;  %vm307_vm2 = vcmask 1043456  }
 0x157   :  { %274 = vst.msk [vmem:[#allocation2] sm:$0xff] %vm273_vm0, %v4087_v1  ;;  %275 = vst.msk [vmem:[#allocation2 + $0x8] sm:$0xff] %vm273_vm0, %v4087_v1  ;;  %v294_v2 = vld [vmem:[#allocation6 + $0x4] sm:$0xf]  ;;  %s5085_s4 = sld [smem:[#allocation43_spill]]  ;;  %s5086_s19 = sld [smem:[#allocation47_spill]] }
 0x158   :  { %276 = vst.msk [vmem:[#allocation2 + $0x10] sm:$0xff] %vm273_vm0, %v4087_v1  ;;  %277 = vst.msk [vmem:[#allocation2 + $0x18] sm:$0xff] %vm273_vm0, %v4087_v1  ;;  %v288_v4 = vld [vmem:[#allocation6] sm:$0xf]  ;;  %3072 = vmatprep.subr.msk.mxu0 %vm307_vm2, %v294_v2  ;;  %v501_v11 = vld [vmem:[#allocation6 + $0x8] sm:$0xf] }
 0x159   :  { %279 = vst.msk [vmem:[#allocation2 + $0x20] sm:$0xf] %vm278_vm1, %v4087_v1  ;;  %3073 = vmatpush3.msk.msra.mxu0 %vm307_vm2, %v294_v2  ;;  %vm632_vm3 = vcmask 523264   ;;  %vm637_vm4 = vcmask 519168   ;;  %v2898_v36 = vld [vmem:[#allocation9] ss:$0 sm:$0xff] }
 0x15a   :  { %3080 = vmatprep.subr.msk.mxu0 %vm307_vm2, %v288_v4  ;;  %634 = vst.msk [vmem:[#allocation3 + $0x8] sm:$0xff] %vm632_vm3, %v4087_v1  ;;  %635 = vst.msk [vmem:[#allocation3 + $0x10] sm:$0xff] %vm632_vm3, %v4087_v1  ;;  %v2899_v38 = vld [vmem:[#allocation11] ss:$0 sm:$0xff]  ;;  %s5087_s24 = sld [smem:[#allocation50_spill]]  ;;  %vm1352_vm7 = vcmask 254976  }
 0x15b   :  { %633 = vst.msk [vmem:[#allocation3] sm:$0xff] %vm632_vm3, %v4087_v1  ;;  %636 = vst.msk [vmem:[#allocation3 + $0x18] sm:$0xff] %vm632_vm3, %v4087_v1  ;;  %vm1354_vm8 = vcmask 517376   ;;  %vm1472_vm9 = vcmask 257026   ;;  %vm1474_vm10 = vcmask 519426   ;;  %vm1706_vm11 = vcmask 261126  }
 0x15c   :  { %638 = vst.msk [vmem:[#allocation3 + $0x20] sm:$0xf] %vm637_vm4, %v4087_v1  ;;  %vm1708_vm12 = vcmask 523526   ;;  %vm1589_vm13 = vcmask 259076   ;;  %vm1591_vm14 = vcmask 521476   ;;  %vm2313_vm15 = vcmask 1024  }
 0x15d   :  { %v269_v3 = vld [vmem:[%s5085_s4] sm:$0xff]  ;;  %v270_v5 = vld [vmem:[%s5085_s4 + $0x8] sm:$0xff]  ;;  %v271_v6 = vld [vmem:[%s5085_s4 + $0x10] sm:$0xff]  ;;  %vm2523_vm1 = vcmask 517120   ;;  %s4093_s13 = smov [#allocation32]  }
 0x15e   :  { %280 = vst.msk [vmem:[#allocation2 + $0x2] sm:$0xff] %vm273_vm0, %v269_v3  ;;  %v272_v7 = vld [vmem:[%s5085_s4 + $0x18] sm:$0xff]  ;;  %281 = vst.msk [vmem:[#allocation2 + $0xa] sm:$0xff] %vm273_vm0, %v270_v5  ;;  %v2900_v21 = vld [vmem:[%s5086_s19 + $0x40] sm:$0xff]  ;;  %s2866_s11 = sshll.u32 %s4093_s13, 4  ;;  %s2867_s11 = int_to_ptr.vmem [resolvable:$true] %s2866_s11 }
 0x15f   :  { %282 = vst.msk [vmem:[#allocation2 + $0x12] sm:$0xff] %vm273_vm0, %v271_v6  ;;  %283 = vst.msk [vmem:[#allocation2 + $0x1a] sm:$0xff] %vm273_vm0, %v272_v7  ;;  %v2901_v22 = vld [vmem:[%s5086_s19 + $0x48] sm:$0xff]  ;;  %v2902_v24 = vld [vmem:[%s5086_s19 + $0x50] sm:$0xff]  ;;  %p4030_p3 = scmp.lt.s32.totalorder %s2867_s11, %s2867_s11 }
 0x160   :  { %v3254_v23 = vpack.c.bf16 %v2901_v22, %v2900_v21  ;;  %v2903_v25 = vld [vmem:[%s5086_s19 + $0x58] sm:$0xff]  ;;  %v2904_v27 = vld [vmem:[%s5086_s19 + $0x60] sm:$0xff]  ;;  %v2905_v28 = vld [vmem:[%s5086_s19 + $0x68] sm:$0xff] }
 0x161   :  { %v3258_v26 = vpack.c.bf16 %v2903_v25, %v2902_v24  ;;  %v3262_v29 = vpack.c.bf16 %v2905_v28, %v2904_v27  ;;  %v2906_v30 = vld [vmem:[%s5086_s19 + $0x70] sm:$0xff]  ;;  %v2907_v31 = vld [vmem:[%s5086_s19 + $0x78] sm:$0xff]  ;;  %v647_v33 = vld [vmem:[%s5086_s19] sm:$0xff] }
 0x162   :  { %3255 = vmatprep.subr.bf16.mxu1 %v3254_v23  ;;  %v3266_v32 = vpack.c.bf16 %v2907_v31, %v2906_v30  ;;  %v648_v34 = vld [vmem:[%s5086_s19 + $0x8] sm:$0xff]  ;;  %v649_v54 = vld [vmem:[%s5086_s19 + $0x10] sm:$0xff]  ;;  %v650_v55 = vld [vmem:[%s5086_s19 + $0x18] sm:$0xff] }
 0x163   :  { %3257 = vmatpush3.bf16.msra.mxu1 %v3254_v23  ;;  %v3270_v35 = vpack.c.bf16 %v648_v34, %v647_v33  ;;  %v3274_v57 = vpack.c.bf16 %v650_v55, %v649_v54  ;;  %v651_v59 = vld [vmem:[%s5086_s19 + $0x20] sm:$0xff]  ;;  %v652_v60 = vld [vmem:[%s5086_s19 + $0x28] sm:$0xff]  ;;  %v653_v0 = vld [vmem:[%s5086_s19 + $0x30] sm:$0xff] }
 0x164   :  { %3259 = vmatprep.subr.bf16.mxu1 %v3258_v26  ;;  %v3278_v62 = vpack.c.bf16 %v652_v60, %v651_v59  ;;  %v654_v2 = vld [vmem:[%s5086_s19 + $0x38] sm:$0xff]  ;;  %v2916_v5 = vld [vmem:[%s5086_s19 + $0x80] sm:$0xff]  ;;  %v2917_v6 = vld [vmem:[%s5086_s19 + $0x88] sm:$0xff] }
 0x165   :  { %v289_v8 = vld [vmem:[#allocation2 + $0x2] sm:$0xff]  ;;  %v290_v9 = vld [vmem:[#allocation2 + $0xa] sm:$0xff]  ;;  %v3286_v7 = vpack.c.bf16 %v2917_v6, %v2916_v5  ;;  %v1078_v25 = vld [vmem:[%s5087_s24 + $0x18] sm:$0xff] }
 0x166   :  { %3074 = vmatprep.mubr.msk.f32.mxu0 %vm273_vm0, %v289_v8  ;;  %v291_v10 = vld [vmem:[#allocation2 + $0x12] sm:$0xff]  ;;  %v292_v12 = vld [vmem:[#allocation2 + $0x1a] sm:$0xff]  ;;  %v285_v14 = vld [vmem:[#allocation2 + $0x8] sm:$0xff] }
 0x167   :  { %3075 = vmatmul.mubr.msk.f32.vlgmr.msra.gmra.mrb[0].mxu0 %vm273_vm0, %v290_v9  ;;  %v284_v13 = vld [vmem:[#allocation2] sm:$0xff]  ;;  %v286_v15 = vld [vmem:[#allocation2 + $0x10] sm:$0xff]  ;;  %v287_v16 = vld [vmem:[#allocation2 + $0x18] sm:$0xff]  ;;  %3261 = vmatpush3.bf16.msra.mxu1 %v3258_v26 }
 0x168   :  { %3081 = vmatpush3.msk.msra.mxu0 %vm307_vm2, %v288_v4  ;;  %3077 = vmatprep.mubr.msk.f32.mxu0 %vm273_vm0, %v291_v10  ;;  %v496_v17 = vld [vmem:[#allocation2 + $0x4] sm:$0xff]  ;;  %v497_v18 = vld [vmem:[#allocation2 + $0xc] sm:$0xff]  ;;  %v498_v19 = vld [vmem:[#allocation2 + $0x14] sm:$0xff]  ;;  %v3282_v4 = vpack.c.bf16 %v654_v2, %v653_v0 }
 0x169   :  { %3088 = vmatprep.subr.msk.mxu0 %vm307_vm2, %v501_v11  ;;  %v499_v20 = vld [vmem:[#allocation2 + $0x1c] sm:$0xff]  ;;  %3263 = vmatprep.subr.bf16.mxu1 %v3262_v29  ;;  %v2918_v8 = vld [vmem:[%s5086_s19 + $0x90] sm:$0xff]  ;;  %v1076_v24 = vld [vmem:[%s5087_s24 + $0x8] sm:$0xff] }
 0x16a   :  { %v2919_v9 = vld [vmem:[%s5086_s19 + $0x98] sm:$0xff]  ;;  %v3302_v26 = vpack.c.bf16 %v1078_v25, %v1076_v24  ;;  %v1075_v27 = vld [vmem:[%s5087_s24] sm:$0xff]  ;;  %v1077_v28 = vld [vmem:[%s5087_s24 + $0x10] sm:$0xff] }
 0x16b   :  { %3078 = vmatmul.mubr.msk.f32.gmra.mrb[2].mxu0 %vm273_vm0, %v292_v12  ;;  %3265 = vmatpush3.bf16.msra.mxu1 %v3262_v29  ;;  %v3290_v10 = vpack.c.bf16 %v2919_v9, %v2918_v8  ;;  %v2920_v12 = vld [vmem:[%s5086_s19 + $0xa0] sm:$0xff]  ;;  %v3304_v29 = vpack.c.bf16 %v1077_v28, %v1075_v27  ;;  %v1080_v30 = vld [vmem:[%s5087_s24 + $0x28] sm:$0xff]  ;;  %v1082_v31 = vld [vmem:[%s5087_s24 + $0x38] sm:$0xff] }
 0x16c   :  { %3082 = vmatprep.mubr.msk.f32.mxu0 %vm273_vm0, %v284_v13  ;;  %3267 = vmatprep.subr.bf16.mxu1 %v3266_v32  ;;  %v2921_v13 = vld [vmem:[%s5086_s19 + $0xa8] sm:$0xff]  ;;  %v1079_v33 = vld [vmem:[%s5087_s24 + $0x20] sm:$0xff]  ;;  %v1081_v34 = vld [vmem:[%s5087_s24 + $0x30] sm:$0xff] }
 0x16d   :  { %v1231_v54 = vld [vmem:[#allocation15 + $0x28] sm:$0xff]  ;;  %v1233_v55 = vld [vmem:[#allocation15 + $0x38] sm:$0xff]  ;;  %v1236_v0 = vld [vmem:[#allocation15 + $0x50] sm:$0xff] }
 0x16e   :  { %v1235_v60 = vld [vmem:[#allocation15 + $0x48] sm:$0xff]  ;;  %v1238_v6 = vld [vmem:[#allocation15 + $0x60] sm:$0xff]  ;;  %v2928_v9 = vld [vmem:[#allocation12] ss:$0 sm:$0xff] }
 0x16f   :  { %3083 = vmatmul.mubr.msk.f32.vlgmr.msra.gmra.mrb[0].mxu0 %vm273_vm0, %v285_v14  ;;  %3269 = vmatpush3.bf16.msra.mxu1 %v3266_v32  ;;  %v3306_v32 = vpack.c.bf16 %v1082_v31, %v1080_v30 }
 0x170   :  { %3089 = vmatpush3.msk.msra.mxu0 %vm307_vm2, %v501_v11  ;;  %3085 = vmatprep.mubr.msk.f32.mxu0 %vm273_vm0, %v286_v15  ;;  %v3294_v15 = vpack.c.bf16 %v2921_v13, %v2920_v12  ;;  %vm2858_vm2 = vcmask 33792  }
 0x171   :  { %3271 = vmatprep.subr.bf16.mxu1 %v3270_v35  ;;  %3303 = vmatprep.subr.bf16.mxu0 %v3302_v26 }
 0x173   :  { %3086 = vmatmul.mubr.msk.f32.gmra.mrb[2].mxu0 %vm273_vm0, %v287_v16 }
 0x174   :  { %3090 = vmatprep.mubr.msk.f32.mxu0 %vm273_vm0, %v496_v17  ;;  %v2922_v17 = vld [vmem:[%s5086_s19 + $0xb0] sm:$0xff] }
 0x177   :  { %3091 = vmatmul.mubr.msk.f32.vlgmr.msra.gmra.mrb[0].mxu0 %vm273_vm0, %v497_v18  ;;  %v2923_v18 = vld [vmem:[%s5086_s19 + $0xb8] sm:$0xff] }
 0x178   :  { %3093 = vmatprep.mubr.msk.f32.mxu0 %vm273_vm0, %v498_v19  ;;  %3305 = vmatpush1.bf16.msra.mxu0 %v3304_v29 }
 0x179   :  { %3307 = vmatprep.subr.bf16.mxu0 %v3306_v32 }
 0x17b   :  { %3094 = vmatmul.mubr.msk.f32.gmra.mrb[2].mxu0 %vm273_vm0, %v499_v20  ;;  %v3298_v20 = vpack.c.bf16 %v2923_v18, %v2922_v17  ;;  %vm4091_vm0 = vmmov 0  }
 0x17c   :  { %1213 = vmatprep.mubr.f32.mxu0 %v4087_v1 }
 0x24a   :  { %v3092_v37 = vpop.f32.mrb[0].mxu0 }
 0x24b   :  { %v614_v39 = vmul.f32 %v3092_v37, %v2898_v36  ;;  %v583_v40 = vpop.f32.mrb[1].mxu0  ;;  %v1086_v37 = vld [vmem:[%s5087_s24 + $0x58] sm:$0xff] }
 0x24c   :  { %v613_v41 = vmul.f32 %v2898_v36, %v583_v40  ;;  %v1085_v40 = vld [vmem:[%s5087_s24 + $0x50] sm:$0xff] }
 0x24d   :  { %v625_v42 = vadd.f32 %v2899_v38, %v614_v39  ;;  %v1083_v39 = vld [vmem:[%s5087_s24 + $0x40] sm:$0xff] }
 0x24e   :  { %v624_v43 = vadd.f32 %v2899_v38, %v613_v41  ;;  %v3095_v44 = vpop.f32.mrb[2].mxu0  ;;  %v3312_v41 = vpack.c.bf16 %v1085_v40, %v1083_v39 }
 0x24f   :  { %v629_v45 = vmax.f32 %v625_v42, 0.0  ;;  %v616_v46 = vmul.f32 %v3095_v44, %v2898_v36  ;;  %v593_v47 = vpop.f32.mrb[3].mxu0  ;;  %v1088_v42 = vld [vmem:[%s5087_s24 + $0x68] sm:$0xff] }
 0x250   :  { %v628_v48 = vmax.f32 %v624_v43, 0.0  ;;  %v615_v49 = vmul.f32 %v2898_v36, %v593_v47  ;;  %v1084_v36 = vld [vmem:[%s5087_s24 + $0x48] sm:$0xff]  ;;  %v1090_v43 = vld [vmem:[%s5087_s24 + $0x78] sm:$0xff] }
 0x251   :  { %640 = vst.msk [vmem:[#allocation3 + $0xa] sm:$0xff] %vm632_vm3, %v629_v45  ;;  %v627_v50 = vadd.f32 %v2899_v38, %v616_v46  ;;  %v3314_v44 = vpack.c.bf16 %v1090_v43, %v1088_v42  ;;  %v1087_v45 = vld [vmem:[%s5087_s24 + $0x60] sm:$0xff]  ;;  %v1089_v46 = vld [vmem:[%s5087_s24 + $0x70] sm:$0xff] }
 0x252   :  { %639 = vst.msk [vmem:[#allocation3 + $0x2] sm:$0xff] %vm632_vm3, %v628_v48  ;;  %v626_v51 = vadd.f32 %v2899_v38, %v615_v49  ;;  %v3310_v38 = vpack.c.bf16 %v1086_v37, %v1084_v36  ;;  %v3316_v47 = vpack.c.bf16 %v1089_v46, %v1087_v45  ;;  %v1227_v48 = vld [vmem:[#allocation15 + $0x8] sm:$0xff]  ;;  %v1229_v49 = vld [vmem:[#allocation15 + $0x18] sm:$0xff] }
 0x253   :  { %v631_v52 = vmax.f32 %v627_v50, 0.0  ;;  %v4606_v50 = vpack.c.bf16 %v1229_v49, %v1227_v48 }
 0x254   :  { %v630_v53 = vmax.f32 %v626_v51, 0.0  ;;  %v1226_v51 = vld [vmem:[#allocation15] sm:$0xff] }
 0x255   :  { %642 = vst.msk [vmem:[#allocation3 + $0x1a] sm:$0xff] %vm632_vm3, %v631_v52  ;;  %v1228_v52 = vld [vmem:[#allocation15 + $0x10] sm:$0xff] }
 0x256   :  { %641 = vst.msk [vmem:[#allocation3 + $0x12] sm:$0xff] %vm632_vm3, %v630_v53  ;;  %v4608_v53 = vpack.c.bf16 %v1228_v52, %v1226_v51 }
 0x258   :  { %v656_v58 = vld [vmem:[#allocation3 + $0xa] sm:$0xff] }
 0x259   :  { %v655_v56 = vld [vmem:[#allocation3 + $0x2] sm:$0xff] }
 0x25a   :  { %3112 = vmatprep.mubr.msk.f32.mxu1 %vm632_vm3, %v655_v56  ;;  %v643_v3 = vld [vmem:[#allocation3] sm:$0xff]  ;;  %v644_v11 = vld [vmem:[#allocation3 + $0x8] sm:$0xff]  ;;  %v4613_v56 = vpack.c.bf16 %v1233_v55, %v1231_v54 }
 0x25b   :  { %3113 = vmatmul.mubr.msk.f32.vlgmr.msra.gmra.mrb[0].mxu1 %vm632_vm3, %v656_v58  ;;  %v862_v19 = vld [vmem:[#allocation3 + $0x4] sm:$0xff] }
 0x25c   :  { %3273 = vmatpush3.bf16.msra.mxu1 %v3270_v35  ;;  %v658_v63 = vld [vmem:[#allocation3 + $0x1a] sm:$0xff]  ;;  %v3308_v35 = vpack.c.bf16 %v1081_v34, %v1079_v33 }
 0x25d   :  { %v657_v61 = vld [vmem:[#allocation3 + $0x12] sm:$0xff]  ;;  %3275 = vmatprep.subr.bf16.mxu1 %v3274_v57  ;;  %v865_v23 = vld [vmem:[#allocation3 + $0x1c] sm:$0xff] }
 0x25e   :  { %3115 = vmatprep.mubr.msk.f32.mxu1 %vm632_vm3, %v657_v61  ;;  %v645_v14 = vld [vmem:[#allocation3 + $0x10] sm:$0xff]  ;;  %v646_v16 = vld [vmem:[#allocation3 + $0x18] sm:$0xff]  ;;  %3309 = vmatpush1.bf16.msra.mxu0 %v3308_v35  ;;  %v1237_v61 = vld [vmem:[#allocation15 + $0x58] sm:$0xff] }
 0x25f   :  { %3116 = vmatmul.mubr.msk.f32.gmra.mrb[2].mxu1 %vm632_vm3, %v658_v63  ;;  %v863_v21 = vld [vmem:[#allocation3 + $0xc] sm:$0xff]  ;;  %v864_v22 = vld [vmem:[#allocation3 + $0x14] sm:$0xff]  ;;  %3311 = vmatprep.subr.bf16.mxu0 %v3310_v38  ;;  %v1232_v58 = vld [vmem:[#allocation15 + $0x30] sm:$0xff] }
 0x260   :  { %3277 = vmatpush3.bf16.msra.mxu1 %v3274_v57  ;;  %3134 = vmatprep.mubr.msk.f32.mxu1 %vm632_vm3, %v643_v3  ;;  %v1230_v57 = vld [vmem:[#allocation15 + $0x20] sm:$0xff]  ;;  %v1239_v3 = vld [vmem:[#allocation15 + $0x68] sm:$0xff] }
 0x261   :  { %3279 = vmatprep.subr.bf16.mxu1 %v3278_v62  ;;  %v4615_v59 = vpack.c.bf16 %v1232_v58, %v1230_v57  ;;  %v1234_v63 = vld [vmem:[#allocation15 + $0x40] sm:$0xff] }
 0x262   :  { %3313 = vmatpush1.bf16.msra.mxu0 %v3312_v41  ;;  %v4621_v2 = vpack.c.bf16 %v1236_v0, %v1234_v63 }
 0x263   :  { %3315 = vmatprep.subr.bf16.mxu0 %v3314_v44 }
 0x264   :  { %3281 = vmatpush3.bf16.msra.mxu1 %v3278_v62  ;;  %v4619_v62 = vpack.c.bf16 %v1237_v61, %v1235_v60 }
 0x265   :  { %3283 = vmatprep.subr.bf16.mxu1 %v3282_v4 }
 0x266   :  { %3317 = vmatpush1.bf16.msra.mxu0 %v3316_v47 }
 0x267   :  { %3319 = vmatprep.subr.bf16.mxu0 %v4606_v50 }
 0x268   :  { %3285 = vmatpush3.bf16.msra.mxu1 %v3282_v4  ;;  %v1241_v4 = vld [vmem:[#allocation15 + $0x78] sm:$0xff] }
 0x269   :  { %3287 = vmatprep.subr.bf16.mxu1 %v3286_v7  ;;  %v4625_v5 = vpack.c.bf16 %v1241_v4, %v1239_v3 }
 0x26b   :  { %3135 = vmatmul.mubr.msk.f32.vlgmr.msra.gmra.mrb[0].mxu1 %vm632_vm3, %v644_v11  ;;  %v2929_v11 = vld [vmem:[#allocation14] ss:$0 sm:$0xff] }
 0x26c   :  { %3137 = vmatprep.mubr.msk.f32.mxu1 %vm632_vm3, %v645_v14  ;;  %3289 = vmatpush3.bf16.msra.mxu1 %v3286_v7  ;;  %v1240_v7 = vld [vmem:[#allocation15 + $0x70] sm:$0xff]  ;;  %v1046_v14 = vlaneseq }
 0x26d   :  { %3291 = vmatprep.subr.bf16.mxu1 %v3290_v10  ;;  %v4627_v8 = vpack.c.bf16 %v1240_v7, %v1238_v6 }
 0x26e   :  { %v4633_v24 = vshrl.u32 %v1046_v14, 7 }
 0x26f   :  { %3138 = vmatmul.mubr.msk.f32.gmra.mrb[2].mxu1 %vm632_vm3, %v646_v16 }
 0x270   :  { %3293 = vmatpush3.bf16.msra.mxu1 %v3290_v10  ;;  %3156 = vmatprep.mubr.msk.f32.mxu1 %vm632_vm3, %v862_v19  ;;  %v1095_v7 = vsub.s32 0, %v4633_v24 }
 0x271   :  { %3295 = vmatprep.subr.bf16.mxu1 %v3294_v15 }
 0x274   :  { %3297 = vmatpush3.bf16.msra.mxu1 %v3294_v15  ;;  %v4088_v15 = vmov 1983009808  }
 0x275   :  { %3299 = vmatprep.subr.bf16.mxu1 %v3298_v20  ;;  %v1114_v16 = vunpack.c.l.s4 %v4088_v15 }
 0x277   :  { %v1115_v25 = vunpack.c.0.s8 %v1114_v16 }
 0x278   :  { %3301 = vmatpush3.bf16.msra.mxu1 %v3298_v20 }
 0x279   :  { %3335 = vmatprep.subr.bf16.mxu1 %v4606_v50  ;;  %v4636_v36 = vsub.s32 %v1115_v25, %v4633_v24 }
 0x27b   :  { %3157 = vmatmul.mubr.msk.f32.vlgmr.msra.gmra.mrb[0].mxu1 %vm632_vm3, %v863_v21 }
 0x27c   :  { %3159 = vmatprep.mubr.msk.f32.mxu1 %vm632_vm3, %v864_v22  ;;  %3337 = vmatpush1.bf16.msra.mxu1 %v4608_v53 }
 0x27d   :  { %3339 = vmatprep.subr.bf16.mxu1 %v4613_v56 }
 0x27f   :  { %3160 = vmatmul.mubr.msk.f32.gmra.mrb[2].mxu1 %vm632_vm3, %v865_v23 }
 0x280   :  { %1428 = vmatprep.mubr.f32.mxu1 %v4087_v1  ;;  %3341 = vmatpush1.bf16.msra.mxu1 %v4615_v59 }
 0x281   :  { %3343 = vmatprep.subr.bf16.mxu1 %v4619_v62 }
 0x284   :  { %3345 = vmatpush1.bf16.msra.mxu1 %v4621_v2 }
 0x285   :  { %3347 = vmatprep.subr.bf16.mxu1 %v4625_v5 }
 0x288   :  { %3349 = vmatpush1.bf16.msra.mxu1 %v4627_v8 }
 0x289   :  { %3367 = vmatprep.subr.bf16.mxu1 %v4606_v50 }
 0x34e   :  { %v3158_v10 = vpop.f32.mrb[0].mxu1 }
 0x34f   :  { %v984_v12 = vmul.f32 %v3158_v10, %v2928_v9  ;;  %v953_v13 = vpop.f32.mrb[1].mxu1  ;;  %v1091_v10 = vld [vmem:[#allocation17] sm:$0x3] }
 0x350   :  { %v983_v17 = vmul.f32 %v2928_v9, %v953_v13 }
 0x351   :  { %v995_v18 = vadd.f32 %v2929_v11, %v984_v12  ;;  %v1096_v12 = vrot.slane %v1091_v10, %v1095_v7 }
 0x352   :  { %v994_v19 = vadd.f32 %v2929_v11, %v983_v17  ;;  %v3161_v20 = vpop.f32.mrb[2].mxu1 }
 0x353   :  { %v999_v21 = vmax.f32 %v995_v18, 0.0  ;;  %v986_v22 = vmul.f32 %v3161_v20, %v2928_v9  ;;  %v963_v23 = vpop.f32.mrb[3].mxu1 }
 0x354   :  { %v998_v26 = vmax.f32 %v994_v19, 0.0  ;;  %v985_v27 = vmul.f32 %v2928_v9, %v963_v23  ;;  %v1047_v9 = vand.u32 127, %v1046_v14 }
 0x355   :  { %v1007_v28 = vcombine.high %v999_v21, %v999_v21  ;;  %v2932_v29 = vrot.slane %v999_v21, 10  ;;  %v997_v30 = vadd.f32 %v2929_v11, %v986_v22 }
 0x356   :  { %v1006_v31 = vcombine.high %v998_v26, %v998_v26  ;;  %v2930_v32 = vrot.slane %v998_v26, 10  ;;  %v996_v33 = vadd.f32 %v2929_v11, %v985_v27  ;;  %v1099_v11 = vsub.s32 1, %v4633_v24 }
 0x357   :  { %v2933_v34 = vrot.slane %v1007_v28, 10  ;;  %v1001_v35 = vmax.f32 %v997_v30, 0.0  ;;  %v1040_v39 = vmax.f32 %v999_v21, %v2932_v29  ;;  %v1048_v13 = vadd.s32 128, %v1047_v9 }
 0x358   :  { %v2931_v37 = vrot.slane %v1006_v31, 10  ;;  %v1000_v38 = vmax.f32 %v996_v33, 0.0  ;;  %v1038_v43 = vmax.f32 %v998_v26, %v2930_v32  ;;  %v1100_v15 = vrot.slane %v1091_v10, %v1099_v11 }
 0x359   :  { %v1041_v40 = vmax.f32 %v1007_v28, %v2933_v34  ;;  %v1009_v41 = vcombine.high %v1001_v35, %v1001_v35  ;;  %v2936_v42 = vrot.slane %v1001_v35, 10  ;;  %v1053_v17 = vand.u32 63, %v1047_v9 }
 0x35a   :  { %v1039_v44 = vmax.f32 %v1006_v31, %v2931_v37  ;;  %v1008_v45 = vcombine.high %v1000_v38, %v1000_v38  ;;  %v2934_v46 = vrot.slane %v1000_v38, 10  ;;  %v1060_v20 = vand.u32 63, %v1048_v13 }
 0x35b   :  { %v1112_v47 = vcombine.low %v1040_v39, %v1041_v40  ;;  %v2937_v48 = vrot.slane %v1009_v41, 10  ;;  %v1044_v54 = vmax.f32 %v1001_v35, %v2936_v42  ;;  %vm4667_vm5 = vcmp.lt.s32.totalorder %v1053_v17, 32 }
 0x35c   :  { %v1111_v49 = vcombine.low %v1038_v43, %v1039_v44  ;;  %v2935_v51 = vrot.slane %v1008_v45, 10  ;;  %v1042_v58 = vmax.f32 %v1000_v38, %v2934_v46  ;;  %vm4671_vm6 = vcmp.lt.s32.totalorder %v1060_v20, 32 }
 0x35d   :  { %v1126_v52 = vrot.slane %v1112_v47, %v4636_v36  ;;  %v1045_v55 = vmax.f32 %v1009_v41, %v2937_v48 }
 0x35e   :  { %v1119_v57 = vrot.slane %v1111_v49, %v4636_v36  ;;  %v1043_v60 = vmax.f32 %v1008_v45, %v2935_v51 }
 0x35f   :  { %v1129_v61 = vcombine.low %v1044_v54, %v1045_v55 }
 0x360   :  { %v1127_v63 = vcombine.low %v1119_v57, %v1126_v52  ;;  %v1128_v0 = vcombine.low %v1042_v58, %v1043_v60 }
 0x361   :  { %v1143_v3 = vrot.slane %v1129_v61, %v4636_v36 }
 0x362   :  { %2938 = vmatmul.mubr.msk.f32.vlgmr.msra.gmra.mrb[4].mxu0 %vm632_vm3, %v1127_v63  ;;  %v1136_v4 = vrot.slane %v1128_v0, %v4636_v36 }
 0x363   :  { %3321 = vmatpush1.bf16.msra.mxu0 %v4608_v53  ;;  %1219 = vmatprep.mubr.f32.mxu0 %v4087_v1 }
 0x364   :  { %3323 = vmatprep.subr.bf16.mxu0 %v4613_v56  ;;  %v1144_v6 = vcombine.low %v1136_v4, %v1143_v3 }
 0x366   :  { %2939 = vmatmul.mubr.msk.f32.gmra.mrb[6].mxu0 %vm632_vm3, %v1144_v6 }
 0x367   :  { %3325 = vmatpush1.bf16.msra.mxu0 %v4615_v59  ;;  %1317 = vmatprep.mubr.f32.mxu0 %v4087_v1 }
 0x368   :  { %3327 = vmatprep.subr.bf16.mxu0 %v4619_v62 }
 0x36b   :  { %3329 = vmatpush1.bf16.msra.mxu0 %v4621_v2 }
 0x36c   :  { %3331 = vmatprep.subr.bf16.mxu0 %v4625_v5 }
 0x36f   :  { %3333 = vmatpush1.bf16.msra.mxu0 %v4627_v8 }
 0x370   :  { %3351 = vmatprep.subr.bf16.mxu0 %v4606_v50 }
 0x372   :  { %1318 = vmatmul.mubr.f32.vlgmr.msra.gmra.mrb[8].mxu0 %v4087_v1 }
 0x373   :  { %3353 = vmatpush1.bf16.msra.mxu0 %v4608_v53  ;;  %1545 = vmatprep.mubr.f32.mxu0 %v4087_v1 }
 0x374   :  { %3355 = vmatprep.subr.bf16.mxu0 %v4613_v56 }
 0x377   :  { %3357 = vmatpush1.bf16.msra.mxu0 %v4615_v59 }
 0x378   :  { %3359 = vmatprep.subr.bf16.mxu0 %v4619_v62 }
 0x37b   :  { %3361 = vmatpush1.bf16.msra.mxu0 %v4621_v2 }
 0x37c   :  { %3363 = vmatprep.subr.bf16.mxu0 %v4625_v5 }
 0x37f   :  { %3365 = vmatpush1.bf16.msra.mxu0 %v4627_v8 }
 0x380   :  { %3383 = vmatprep.subr.bf16.mxu0 %v4606_v50 }
 0x435   :  { %v1215_v16 = vpop.f32.mrb[4].mxu0 }
 0x436   :  { %v1216_v18 = vadd.f32 %v1215_v16, %v1096_v12  ;;  %v1217_v19 = vpop.f32.mrb[5].mxu0 }
 0x437   :  { %v1218_v21 = vadd.f32 %v1217_v19, %v1100_v15 }
 0x438   :  { %v1712_v27 = vrot.slane %v1216_v18, 6  ;;  %v1827_v28 = vrot.slane %v1216_v18, 2 }
 0x439   :  { %v1221_v22 = vpop.f32.mrb[6].mxu0  ;;  %v1713_v30 = vrot.slane %v1218_v21, 6  ;;  %v1828_v31 = vrot.slane %v1218_v21, 2 }
 0x43a   :  { %v1222_v25 = vadd.f32 %v1221_v22, %v1096_v12  ;;  %v1223_v26 = vpop.f32.mrb[7].mxu0 }
 0x43b   :  { %v1224_v29 = vadd.f32 %v1223_v26, %v1100_v15 }
 0x43c   :  { %v1244_v32 = vrot.slane %v1222_v25, 6  ;;  %v1356_v33 = vrot.slane %v1222_v25, 2  ;;  %v4677_v34 = vsel %vm4667_vm5, %v1222_v25, %v1712_v27  ;;  %v4681_v35 = vsel %vm4667_vm5, %v1222_v25, %v1827_v28 }
 0x43d   :  { %v1245_v37 = vrot.slane %v1224_v29, 6  ;;  %v1357_v38 = vrot.slane %v1224_v29, 2  ;;  %v4685_v39 = vsel %vm4671_vm6, %v1224_v29, %v1713_v30  ;;  %v4689_v40 = vsel %vm4671_vm6, %v1224_v29, %v1828_v31 }
 0x43e   :  { %v4693_v41 = vsel %vm4667_vm5, %v1216_v18, %v1244_v32  ;;  %v4697_v42 = vsel %vm4667_vm5, %v1216_v18, %v1356_v33 }
 0x43f   :  { %v4701_v43 = vsel %vm4671_vm6, %v1218_v21, %v1245_v37  ;;  %v4705_v44 = vsel %vm4671_vm6, %v1218_v21, %v1357_v38 }
 0x445   :  { %v1319_v45 = vpop.f32.mrb[8].mxu0 }
 0x446   :  { %v1324_v46 = vadd.f32 %v1319_v45, %v4693_v41  ;;  %v1321_v47 = vpop.f32.mrb[9].mxu0 }
 0x447   :  { %v1325_v49 = vadd.f32 %v1321_v47, %v4701_v43 }
 0x448   :  { %v2940_v48 = vmul.f32 -1.442695, %v1324_v46 }
 0x449   :  { %v2941_v58 = vmul.f32 -1.442695, %v1325_v49 }
 0x44a   :  { %3559 = vpow2.f32 %v2940_v48 }
 0x44b   :  { %3561 = vtanh.f32 %v1325_v49 }
 0x454   :  { %v3560_v51 = vpop.eup %3559 }
 0x455   :  { %v1329_v52 = vadd.f32 1.0, %v3560_v51  ;;  %v3562_v54 = vpop.eup %3561 }
 0x457   :  { %3563 = vrcp.f32 %v1329_v52 }
 0x458   :  { %3565 = vpow2.f32 %v2941_v58 }
 0x461   :  { %v3564_v55 = vpop.eup %3563 }
 0x462   :  { %v1340_v57 = vmul.f32 %v3564_v55, %v3562_v54  ;;  %v3566_v60 = vpop.eup %3565  ;;  %v1339_v63 = vmul.f32 0.0, %v3564_v55 }
 0x463   :  { %v1336_v61 = vadd.f32 1.0, %v3566_v60 }
 0x464   :  { %1342 = vrot.lane.b32.xlu0 %v1340_v57, %s4077_s20 }
 0x465   :  { %3567 = vrcp.f32 %v1336_v61 }
 0x46f   :  { %v3568_v4 = vpop.eup %3567 }
 0x4d6   :  { %v1343_v0 = vpop.permute.xlu0 %1342 }
 0x4d7   :  { %v1345_v3 = vadd.f32 %v1343_v0, %v1339_v63 }
 0x4d9   :  { %3569 = vtanh.f32 %v1345_v3  ;;  %v1457_v21 = vrot.slane %v1345_v3, 6 }
 0x4e3   :  { %v3570_v6 = vpop.eup %3569 }
 0x4e4   :  { %v1347_v7 = vmul.f32 %v3570_v6, %v3568_v4 }
 0x4e6   :  { %1349 = vrot.lane.b32.xlu0 %v1347_v7, %s4077_s20 }
 0x558   :  { %v1350_v9 = vpop.permute.xlu0 %1349 }
 0x559   :  { %1353 = vst.msk [vmem:[#allocation4] sm:$0x3] %vm1352_vm7, %v1350_v9  ;;  %2942 = vmatmul.mubr.msk.f32.vlgmr.msra.gmra.mrb[4].mxu1 %vm632_vm3, %v1350_v9 }
 0x55a   :  { %1355 = vst.msk [vmem:[#allocation4 + $0xe] sm:$0x3] %vm1354_vm8, %v1350_v9  ;;  %3369 = vmatpush1.bf16.msra.mxu1 %v4608_v53  ;;  %1662 = vmatprep.mubr.f32.mxu1 %v4087_v1 }
 0x55b   :  { %3371 = vmatprep.subr.bf16.mxu1 %v4613_v56 }
 0x55e   :  { %3373 = vmatpush1.bf16.msra.mxu1 %v4615_v59 }
 0x55f   :  { %3375 = vmatprep.subr.bf16.mxu1 %v4619_v62 }
 0x562   :  { %3377 = vmatpush1.bf16.msra.mxu1 %v4621_v2 }
 0x563   :  { %3379 = vmatprep.subr.bf16.mxu1 %v4625_v5 }
 0x566   :  { %3381 = vmatpush1.bf16.msra.mxu1 %v4627_v8 }
 0x567   :  { %3399 = vmatprep.subr.bf16.mxu1 %v4606_v50 }
 0x62c   :  { %v1430_v10 = vpop.f32.mrb[4].mxu1 }
 0x62d   :  { %v1437_v11 = vrot.slane %v1430_v10, 6  ;;  %v1432_v12 = vpop.f32.mrb[5].mxu1 }
 0x62e   :  { %v1438_v16 = vrot.slane %v1432_v12, 6 }
 0x62f   :  { %v1441_v13 = vadd.f32 %v1437_v11, %v4697_v42 }
 0x630   :  { %v1442_v17 = vadd.f32 %v1438_v16, %v4705_v44 }
 0x631   :  { %v2943_v15 = vmul.f32 -1.442695, %v1441_v13 }
 0x632   :  { %v2944_v26 = vmul.f32 -1.442695, %v1442_v17 }
 0x633   :  { %3571 = vpow2.f32 %v2943_v15 }
 0x634   :  { %3573 = vtanh.f32 %v1442_v17 }
 0x63d   :  { %v3572_v18 = vpop.eup %3571 }
 0x63e   :  { %v1446_v19 = vadd.f32 1.0, %v3572_v18  ;;  %v3574_v20 = vpop.eup %3573 }
 0x640   :  { %3575 = vrcp.f32 %v1446_v19 }
 0x641   :  { %3577 = vpow2.f32 %v2944_v26 }
 0x64a   :  { %v3576_v22 = vpop.eup %3575 }
 0x64b   :  { %v1460_v23 = vmul.f32 %v3576_v22, %v3574_v20  ;;  %v1459_v25 = vmul.f32 %v3576_v22, %v1457_v21  ;;  %v3578_v14 = vpop.eup %3577 }
 0x64c   :  { %v1453_v27 = vadd.f32 1.0, %v3578_v14 }
 0x64d   :  { %1462 = vrot.lane.b32.xlu1 %v1460_v23, %s4077_s20 }
 0x64e   :  { %3579 = vrcp.f32 %v1453_v27 }
 0x658   :  { %v3580_v30 = vpop.eup %3579 }
 0x6bf   :  { %v1463_v28 = vpop.permute.xlu1 %1462 }
 0x6c0   :  { %v1465_v29 = vadd.f32 %v1463_v28, %v1459_v25 }
 0x6c2   :  { %3581 = vtanh.f32 %v1465_v29  ;;  %v1574_v57 = vrot.slane %v1465_v29, 6 }
 0x6cc   :  { %v3582_v31 = vpop.eup %3581 }
 0x6cd   :  { %v4726_v32 = vmul.f32 %v3582_v31, %v3580_v30 }
 0x6cf   :  { %v1476_v33 = vrot.slane %v4726_v32, 2 }
 0x6d1   :  { %1477 = vrot.lane.b32.xlu1 %v1476_v33, %s4077_s20 }
 0x743   :  { %v1478_v37 = vpop.permute.xlu1 %1477 }
 0x744   :  { %2945 = vmatmul.mubr.msk.f32.vlgmr.msra.gmra.mrb[10].mxu0 %vm632_vm3, %v1478_v37 }
 0x745   :  { %3385 = vmatpush1.bf16.msra.mxu0 %v4608_v53  ;;  %1787 = vmatprep.mubr.f32.mxu0 %v4087_v1 }
 0x746   :  { %3387 = vmatprep.subr.bf16.mxu0 %v4613_v56 }
 0x749   :  { %3389 = vmatpush1.bf16.msra.mxu0 %v4615_v59 }
 0x74a   :  { %3391 = vmatprep.subr.bf16.mxu0 %v4619_v62 }
 0x74d   :  { %3393 = vmatpush1.bf16.msra.mxu0 %v4621_v2 }
 0x74e   :  { %3395 = vmatprep.subr.bf16.mxu0 %v4625_v5 }
 0x751   :  { %3397 = vmatpush1.bf16.msra.mxu0 %v4627_v8 }
 0x752   :  { %3415 = vmatprep.subr.bf16.mxu0 %v4606_v50 }
 0x817   :  { %v1547_v38 = vpop.f32.mrb[10].mxu0 }
 0x818   :  { %v1554_v45 = vrot.slane %v1547_v38, 4  ;;  %v1549_v46 = vpop.f32.mrb[11].mxu0 }
 0x819   :  { %v1555_v49 = vrot.slane %v1549_v46, 4 }
 0x81a   :  { %v1558_v47 = vadd.f32 %v1554_v45, %v4693_v41 }
 0x81b   :  { %v1559_v51 = vadd.f32 %v1555_v49, %v4701_v43 }
 0x81c   :  { %v2946_v48 = vmul.f32 -1.442695, %v1558_v47 }
 0x81d   :  { %v2947_v63 = vmul.f32 -1.442695, %v1559_v51 }
 0x81e   :  { %3583 = vpow2.f32 %v2946_v48 }
 0x81f   :  { %3585 = vtanh.f32 %v1559_v51 }
 0x828   :  { %v3584_v52 = vpop.eup %3583 }
 0x829   :  { %v1563_v54 = vadd.f32 1.0, %v3584_v52  ;;  %v3586_v55 = vpop.eup %3585 }
 0x82b   :  { %3587 = vrcp.f32 %v1563_v54 }
 0x82c   :  { %3589 = vpow2.f32 %v2947_v63 }
 0x835   :  { %v3588_v58 = vpop.eup %3587 }
 0x836   :  { %v1577_v60 = vmul.f32 %v3588_v58, %v3586_v55  ;;  %v1576_v61 = vmul.f32 %v3588_v58, %v1574_v57  ;;  %v3590_v0 = vpop.eup %3589 }
 0x837   :  { %v1570_v41 = vadd.f32 1.0, %v3590_v0 }
 0x838   :  { %1579 = vrot.lane.b32.xlu0 %v1577_v60, %s4077_s20 }
 0x839   :  { %3591 = vrcp.f32 %v1570_v41 }
 0x843   :  { %v3592_v43 = vpop.eup %3591 }
 0x8aa   :  { %v1580_v3 = vpop.permute.xlu0 %1579 }
 0x8ab   :  { %v1582_v4 = vadd.f32 %v1580_v3, %v1576_v61 }
 0x8ad   :  { %3593 = vtanh.f32 %v1582_v4  ;;  %v1691_v22 = vrot.slane %v1582_v4, 6 }
 0x8b7   :  { %v3594_v6 = vpop.eup %3593 }
 0x8b8   :  { %v4743_v7 = vmul.f32 %v3594_v6, %v3592_v43 }
 0x8ba   :  { %v1593_v9 = vrot.slane %v4743_v7, 4 }
 0x8bc   :  { %1594 = vrot.lane.b32.xlu1 %v1593_v9, %s4077_s20 }
 0x92e   :  { %v1595_v10 = vpop.permute.xlu1 %1594 }
 0x92f   :  { %2948 = vmatmul.mubr.msk.f32.vlgmr.msra.gmra.mrb[6].mxu1 %vm632_vm3, %v1595_v10 }
 0x930   :  { %3401 = vmatpush1.bf16.msra.mxu1 %v4608_v53  ;;  %1899 = vmatprep.mubr.f32.mxu1 %v4087_v1 }
 0x931   :  { %3403 = vmatprep.subr.bf16.mxu1 %v4613_v56 }
 0x934   :  { %3405 = vmatpush1.bf16.msra.mxu1 %v4615_v59 }
 0x935   :  { %3407 = vmatprep.subr.bf16.mxu1 %v4619_v62 }
 0x938   :  { %3409 = vmatpush1.bf16.msra.mxu1 %v4621_v2 }
 0x939   :  { %3411 = vmatprep.subr.bf16.mxu1 %v4625_v5 }
 0x93c   :  { %3413 = vmatpush1.bf16.msra.mxu1 %v4627_v8 }
 0x93d   :  { %3431 = vmatprep.subr.bf16.mxu1 %v4606_v50 }
 0xa02   :  { %v1664_v11 = vpop.f32.mrb[6].mxu1 }
 0xa03   :  { %v1671_v12 = vrot.slane %v1664_v11, 2  ;;  %v1666_v13 = vpop.f32.mrb[7].mxu1 }
 0xa04   :  { %v1672_v17 = vrot.slane %v1666_v13, 2 }
 0xa05   :  { %v1675_v15 = vadd.f32 %v1671_v12, %v4697_v42 }
 0xa06   :  { %v1676_v18 = vadd.f32 %v1672_v17, %v4705_v44 }
 0xa07   :  { %v2949_v16 = vmul.f32 -1.442695, %v1675_v15 }
 0xa08   :  { %v2950_v50 = vmul.f32 -1.442695, %v1676_v18 }
 0xa09   :  { %3595 = vpow2.f32 %v2949_v16 }
 0xa0a   :  { %3597 = vtanh.f32 %v1676_v18 }
 0xa13   :  { %v3596_v19 = vpop.eup %3595 }
 0xa14   :  { %v1680_v20 = vadd.f32 1.0, %v3596_v19  ;;  %v3598_v21 = vpop.eup %3597 }
 0xa16   :  { %3599 = vrcp.f32 %v1680_v20 }
 0xa17   :  { %3601 = vpow2.f32 %v2950_v50 }
 0xa20   :  { %v3600_v23 = vpop.eup %3599 }
 0xa21   :  { %v1694_v25 = vmul.f32 %v3600_v23, %v3598_v21  ;;  %v1693_v26 = vmul.f32 %v3600_v23, %v1691_v22  ;;  %v3602_v14 = vpop.eup %3601 }
 0xa22   :  { %v1687_v42 = vadd.f32 1.0, %v3602_v14 }
 0xa23   :  { %1696 = vrot.lane.b32.xlu0 %v1694_v25, %s4077_s20 }
 0xa24   :  { %3603 = vrcp.f32 %v1687_v42 }
 0xa2e   :  { %v3604_v44 = vpop.eup %3603 }
 0xa95   :  { %v1697_v27 = vpop.permute.xlu0 %1696 }
 0xa96   :  { %v1699_v28 = vadd.f32 %v1697_v27, %v1693_v26 }
 0xa98   :  { %3605 = vtanh.f32 %v1699_v28  ;;  %v1810_v52 = vrot.slane %v1699_v28, 6 }
 0xaa2   :  { %v3606_v29 = vpop.eup %3605 }
 0xaa3   :  { %v4760_v30 = vmul.f32 %v3606_v29, %v3604_v44 }
 0xaa5   :  { %v1718_v31 = vrot.slane %v4760_v30, 6 }
 0xaa7   :  { %1719 = vrot.lane.b32.xlu1 %v1718_v31, %s4077_s20 }
 0xb19   :  { %v1720_v33 = vpop.permute.xlu1 %1719 }
 0xb1a   :  { %2951 = vmatmul.mubr.msk.f32.vlgmr.msra.gmra.mrb[12].mxu0 %vm632_vm3, %v1720_v33 }
 0xb1b   :  { %3417 = vmatpush1.bf16.msra.mxu0 %v4608_v53  ;;  %2014 = vmatprep.mubr.f32.mxu0 %v4087_v1 }
 0xb1c   :  { %3419 = vmatprep.subr.bf16.mxu0 %v4613_v56 }
 0xb1f   :  { %3421 = vmatpush1.bf16.msra.mxu0 %v4615_v59 }
 0xb20   :  { %3423 = vmatprep.subr.bf16.mxu0 %v4619_v62 }
 0xb23   :  { %3425 = vmatpush1.bf16.msra.mxu0 %v4621_v2 }
 0xb24   :  { %3427 = vmatprep.subr.bf16.mxu0 %v4625_v5 }
 0xb27   :  { %3429 = vmatpush1.bf16.msra.mxu0 %v4627_v8 }
 0xbed   :  { %v1789_v37 = vpop.f32.mrb[12].mxu0 }
 0xbee   :  { %v1794_v38 = vadd.f32 %v1789_v37, %v4677_v34  ;;  %v1791_v45 = vpop.f32.mrb[13].mxu0 }
 0xbef   :  { %v1795_v47 = vadd.f32 %v1791_v45, %v4685_v39 }
 0xbf0   :  { %v2952_v46 = vmul.f32 -1.442695, %v1794_v38 }
 0xbf1   :  { %v2953_v58 = vmul.f32 -1.442695, %v1795_v47 }
 0xbf2   :  { %3607 = vpow2.f32 %v2952_v46 }
 0xbf3   :  { %3609 = vtanh.f32 %v1795_v47 }
 0xbfc   :  { %v3608_v48 = vpop.eup %3607 }
 0xbfd   :  { %v1799_v49 = vadd.f32 1.0, %v3608_v48  ;;  %v3610_v51 = vpop.eup %3609 }
 0xbff   :  { %3611 = vrcp.f32 %v1799_v49 }
 0xc00   :  { %3613 = vpow2.f32 %v2953_v58 }
 0xc09   :  { %v3612_v54 = vpop.eup %3611 }
 0xc0a   :  { %v1813_v55 = vmul.f32 %v3612_v54, %v3610_v51  ;;  %v1812_v57 = vmul.f32 %v3612_v54, %v1810_v52  ;;  %v3614_v60 = vpop.eup %3613 }
 0xc0b   :  { %v1806_v61 = vadd.f32 1.0, %v3614_v60 }
 0xc0c   :  { %1815 = vrot.lane.b32.xlu0 %v1813_v55, %s4077_s20 }
 0xc0d   :  { %3615 = vrcp.f32 %v1806_v61 }
 0xc17   :  { %v3616_v41 = vpop.eup %3615 }
 0xc7e   :  { %v1816_v63 = vpop.permute.xlu0 %1815 }
 0xc7f   :  { %v1818_v0 = vadd.f32 %v1816_v63, %v1812_v57 }
 0xc81   :  { %3617 = vtanh.f32 %v1818_v0 }
 0xc8b   :  { %v3618_v3 = vpop.eup %3617 }
 0xc8c   :  { %v1820_v4 = vmul.f32 %v3618_v3, %v3616_v41 }
 0xc8e   :  { %1822 = vrot.lane.b32.xlu1 %v1820_v4, %s4077_s20 }
 0xd00   :  { %v4777_v43 = vpop.permute.xlu1 %1822 }
 0xd01   :  { %2954 = vmatmul.mubr.msk.f32.vlgmr.msra.gmra.mrb[8].mxu1 %vm632_vm3, %v4777_v43 }
 0xd02   :  { %3433 = vmatpush1.bf16.msra.mxu1 %v4608_v53  ;;  %2129 = vmatprep.mubr.f32.mxu1 %v4087_v1 }
 0xd03   :  { %3435 = vmatprep.subr.bf16.mxu1 %v4613_v56 }
 0xd06   :  { %3437 = vmatpush1.bf16.msra.mxu1 %v4615_v59 }
 0xd07   :  { %3439 = vmatprep.subr.bf16.mxu1 %v4619_v62 }
 0xd0a   :  { %3441 = vmatpush1.bf16.msra.mxu1 %v4621_v2  ;;  %v1928_v2 = vrot.slane %v1818_v0, 6 }
 0xd0b   :  { %3443 = vmatprep.subr.bf16.mxu1 %v4625_v5 }
 0xd0e   :  { %3445 = vmatpush1.bf16.msra.mxu1 %v4627_v8 }
 0xdd4   :  { %v1901_v6 = vpop.f32.mrb[8].mxu1 }
 0xdd5   :  { %v1908_v9 = vrot.slane %v1901_v6, 6  ;;  %v1903_v10 = vpop.f32.mrb[9].mxu1 }
 0xdd6   :  { %v1909_v12 = vrot.slane %v1903_v10, 6 }
 0xdd7   :  { %v1912_v11 = vadd.f32 %v1908_v9, %v4681_v35 }
 0xdd8   :  { %v1913_v56 = vadd.f32 %v1909_v12, %v4689_v40 }
 0xdd9   :  { %v2955_v53 = vmul.f32 -1.442695, %v1912_v11 }
 0xdda   :  { %v2956_v8 = vmul.f32 -1.442695, %v1913_v56 }
 0xddb   :  { %3619 = vpow2.f32 %v2955_v53 }
 0xddc   :  { %3621 = vtanh.f32 %v1913_v56 }
 0xde5   :  { %v3620_v13 = vpop.eup %3619 }
 0xde6   :  { %v1917_v59 = vadd.f32 1.0, %v3620_v13  ;;  %v3622_v62 = vpop.eup %3621  ;;  %v2178_v13 = vld [vmem:[%s5044_s10 + $0x8] sm:$0xff] }
 0xde8   :  { %3623 = vrcp.f32 %v1917_v59 }
 0xde9   :  { %3625 = vpow2.f32 %v2956_v8 }
 0xdf2   :  { %v3624_v15 = vpop.eup %3623 }
 0xdf3   :  { %v1931_v5 = vmul.f32 %v3624_v15, %v3622_v62  ;;  %v1930_v16 = vmul.f32 %v3624_v15, %v1928_v2  ;;  %v3626_v17 = vpop.eup %3625  ;;  %v2180_v62 = vld [vmem:[%s5044_s10 + $0x18] sm:$0xff] }
 0xdf4   :  { %v1924_v18 = vadd.f32 1.0, %v3626_v17 }
 0xdf5   :  { %1933 = vrot.lane.b32.xlu0 %v1931_v5, %s4077_s20 }
 0xdf6   :  { %3627 = vrcp.f32 %v1924_v18  ;;  %v2181_v18 = vld [vmem:[%s5044_s10 + $0x20] sm:$0xff] }
 0xe00   :  { %v3628_v21 = vpop.eup %3627 }
 0xe67   :  { %v1934_v19 = vpop.permute.xlu0 %1933 }
 0xe68   :  { %v1936_v20 = vadd.f32 %v1934_v19, %v1930_v16 }
 0xe6a   :  { %3629 = vtanh.f32 %v1936_v20  ;;  %v2043_v38 = vrot.slane %v1936_v20, 6  ;;  %v2183_v20 = vld [vmem:[%s5044_s10 + $0x30] sm:$0xff] }
 0xe74   :  { %v3630_v22 = vpop.eup %3629 }
 0xe75   :  { %v4792_v23 = vmul.f32 %v3630_v22, %v3628_v21  ;;  %v2184_v21 = vld [vmem:[%s5044_s10 + $0x38] sm:$0xff] }
 0xe77   :  { %v1945_v25 = vrot.slane %v4792_v23, 2 }
 0xe79   :  { %1946 = vrot.lane.b32.xlu1 %v1945_v25, %s4077_s20 }
 0xeeb   :  { %v1947_v26 = vpop.permute.xlu1 %1946 }
 0xeec   :  { %2957 = vmatmul.mubr.msk.f32.vlgmr.msra.gmra.mrb[14].mxu0 %vm632_vm3, %v1947_v26 }
 0xfbf   :  { %v2016_v50 = vpop.f32.mrb[14].mxu0 }
 0xfc0   :  { %v2023_v14 = vrot.slane %v2016_v50, 4  ;;  %v2018_v42 = vpop.f32.mrb[15].mxu0  ;;  %v2185_v50 = vld [vmem:[#allocation5] sm:$0x1] }
 0xfc1   :  { %v2024_v44 = vrot.slane %v2018_v42, 4  ;;  %3526 = vpush %v2185_v50 }
 0xfc2   :  { %v2027_v27 = vadd.f32 %v2023_v14, %v4677_v34 }
 0xfc3   :  { %v2028_v29 = vadd.f32 %v2024_v44, %v4685_v39 }
 0xfc4   :  { %v2958_v28 = vmul.f32 -1.442695, %v2027_v27 }
 0xfc5   :  { %v2959_v48 = vmul.f32 -1.442695, %v2028_v29 }
 0xfc6   :  { %3631 = vpow2.f32 %v2958_v28 }
 0xfc7   :  { %3633 = vtanh.f32 %v2028_v29  ;;  %v4089_v29 = vmov 0  }
 0xfc8   :  { %3556 = vset.pattern.permute.xlu0 %v4089_v29  ;;  %3555 = vset.pattern.permute.xlu1 %v4089_v29 }
 0xfd0   :  { %v3632_v31 = vpop.eup %3631 }
 0xfd1   :  { %v2032_v33 = vadd.f32 1.0, %v3632_v31  ;;  %v3634_v37 = vpop.eup %3633 }
 0xfd3   :  { %3635 = vrcp.f32 %v2032_v33 }
 0xfd4   :  { %3637 = vpow2.f32 %v2959_v48 }
 0xfdd   :  { %v3636_v45 = vpop.eup %3635 }
 0xfde   :  { %v2046_v46 = vmul.f32 %v3636_v45, %v3634_v37  ;;  %v2045_v47 = vmul.f32 %v3636_v45, %v2043_v38  ;;  %v3638_v49 = vpop.eup %3637 }
 0xfdf   :  { %v2039_v34 = vadd.f32 1.0, %v3638_v49 }
 0xfe0   :  { %2048 = vrot.lane.b32.xlu0 %v2046_v46, %s4077_s20 }
 0xfe1   :  { %3639 = vrcp.f32 %v2039_v34 }
 0xfeb   :  { %v3640_v39 = vpop.eup %3639 }
0x1052   :  { %v2049_v51 = vpop.permute.xlu0 %2048 }
0x1053   :  { %v2051_v52 = vadd.f32 %v2049_v51, %v2045_v47 }
0x1055   :  { %3641 = vtanh.f32 %v2051_v52  ;;  %v2158_v11 = vrot.slane %v2051_v52, 6 }
0x105f   :  { %v3642_v54 = vpop.eup %3641 }
0x1060   :  { %v2053_v55 = vmul.f32 %v3642_v54, %v3640_v39 }
0x1062   :  { %v2060_v57 = vrot.slane %v2053_v55, 4 }
0x1064   :  { %2061 = vrot.lane.b32.xlu1 %v2060_v57, %s4077_s20 }
0x1068   :  { %1469 = vrot.lane.b32.xlu1 %v4726_v32, %s4077_s20 }
0x106c   :  { %1703 = vrot.lane.b32.xlu1 %v4760_v30, %s4077_s20 }
0x1070   :  { %2055 = vrot.lane.b32.xlu1 %v2053_v55, %s4077_s20 }
0x10d6   :  { %v2062_v58 = vpop.permute.xlu1 %2061 }
0x10d7   :  { %2960 = vmatmul.mubr.msk.f32.vlgmr.msra.gmra.mrb[10].mxu1 %vm632_vm3, %v2062_v58 }
0x10d8   :  { %3197 = vmatprep.mubr.msk.f32.mxu1 %vm4091_vm0, %v4087_v1 }
0x10da   :  { %v1470_v60 = vpop.permute.xlu1 %1469 }
0x10db   :  { %1473 = vst.msk [vmem:[#allocation4] sm:$0xc] %vm1472_vm9, %v1470_v60 }
0x10dc   :  { %1475 = vst.msk [vmem:[#allocation4 + $0xa] sm:$0xc] %vm1474_vm10, %v1470_v60 }
0x10de   :  { %v1704_v61 = vpop.permute.xlu1 %1703 }
0x10df   :  { %1707 = vst.msk [vmem:[#allocation4] sm:$0xc0] %vm1706_vm11, %v1704_v61 }
0x10e0   :  { %1709 = vst.msk [vmem:[#allocation4 + $0x2] sm:$0xc0] %vm1708_vm12, %v1704_v61 }
0x10e1   :  { %1825 = vst.msk [vmem:[#allocation4 + $0x8] sm:$0x3] %vm1352_vm7, %v4777_v43 }
0x10e2   :  { %1826 = vst.msk [vmem:[#allocation4 + $0x6] sm:$0x3] %vm1354_vm8, %v4777_v43  ;;  %v2056_v32 = vpop.permute.xlu1 %2055 }
0x10e3   :  { %2058 = vst.msk [vmem:[#allocation4 + $0x8] sm:$0x30] %vm1589_vm13, %v2056_v32 }
0x10e4   :  { %2059 = vst.msk [vmem:[#allocation4 - $0x2] sm:$0x30] %vm1591_vm14, %v2056_v32 }
0x11aa   :  { %v2131_v30 = vpop.f32.mrb[10].mxu1 }
0x11ab   :  { %v2138_v63 = vrot.slane %v2131_v30, 2  ;;  %v2133_v0 = vpop.f32.mrb[11].mxu1 }
0x11ac   :  { %v2139_v4 = vrot.slane %v2133_v0, 2 }
0x11ad   :  { %v2142_v41 = vadd.f32 %v2138_v63, %v4681_v35  ;;  %v2177_v35 = vld [vmem:[%s5044_s10] sm:$0xff] }
0x11ae   :  { %v2143_v6 = vadd.f32 %v2139_v4, %v4689_v40  ;;  %v2179_v40 = vld [vmem:[%s5044_s10 + $0x10] sm:$0xff]  ;;  %v3446_v59 = vpack.c.bf16 %v2178_v13, %v2177_v35 }
0x11af   :  { %v2961_v3 = vmul.f32 -1.442695, %v2142_v41  ;;  %v3450_v2 = vpack.c.bf16 %v2180_v62, %v2179_v40 }
0x11b0   :  { %3447 = vmatprep.subr.bf16.mxu0 %v3446_v59  ;;  %v2962_v15 = vmul.f32 -1.442695, %v2143_v6 }
0x11b1   :  { %3643 = vpow2.f32 %v2961_v3  ;;  %3449 = vmatpush3.bf16.msra.mxu0 %v3446_v59 }
0x11b2   :  { %3645 = vtanh.f32 %v2143_v6  ;;  %3451 = vmatprep.subr.bf16.mxu0 %v3450_v2 }
0x11b5   :  { %3453 = vmatpush3.bf16.msra.mxu0 %v3450_v2 }
0x11bb   :  { %v3644_v9 = vpop.eup %3643 }
0x11bc   :  { %v2147_v10 = vadd.f32 1.0, %v3644_v9  ;;  %v3646_v43 = vpop.eup %3645 }
0x11be   :  { %3647 = vrcp.f32 %v2147_v10 }
0x11bf   :  { %3649 = vpow2.f32 %v2962_v15 }
0x11c8   :  { %v3648_v53 = vpop.eup %3647 }
0x11c9   :  { %v2161_v12 = vmul.f32 %v3648_v53, %v3646_v43  ;;  %v2160_v56 = vmul.f32 %v3648_v53, %v2158_v11  ;;  %v3650_v5 = vpop.eup %3649 }
0x11ca   :  { %v2154_v16 = vadd.f32 1.0, %v3650_v5 }
0x11cb   :  { %2163 = vrot.lane.b32.xlu0 %v2161_v12, %s4077_s20 }
0x11cc   :  { %3651 = vrcp.f32 %v2154_v16 }
0x11cf   :  { %1586 = vrot.lane.b32.xlu0 %v4743_v7, %s4077_s20  ;;  %v2182_v7 = vld [vmem:[%s5044_s10 + $0x28] sm:$0xff]  ;;  %s3527_s10 = spop %3526 }
0x11d0   :  { %v3454_v19 = vpack.c.bf16 %v2182_v7, %v2181_v18  ;;  %v2187_v31 = vstv %s3527_s10 }
0x11d2   :  { %3455 = vmatprep.subr.bf16.mxu0 %v3454_v19 }
0x11d3   :  { %1940 = vrot.lane.b32.xlu0 %v4792_v23, %s4077_s20  ;;  %v3458_v23 = vpack.c.bf16 %v2184_v21, %v2183_v20  ;;  %3457 = vmatpush3.bf16.msra.mxu0 %v3454_v19 }
0x11d5   :  { %3459 = vmatprep.subr.bf16.mxu0 %v3458_v23 }
0x11d6   :  { %v3652_v26 = vpop.eup %3651 }
0x11d7   :  { %3461 = vmatpush3.bf16.msra.mxu0 %v3458_v23 }
0x123d   :  { %v2164_v8 = vpop.permute.xlu0 %2163 }
0x123e   :  { %v2166_v17 = vadd.f32 %v2164_v8, %v2160_v56 }
0x1240   :  { %3653 = vtanh.f32 %v2166_v17 }
0x1241   :  { %v1587_v22 = vpop.permute.xlu0 %1586 }
0x1242   :  { %1590 = vst.msk [vmem:[#allocation4] sm:$0x30] %vm1589_vm13, %v1587_v22 }
0x1243   :  { %1592 = vst.msk [vmem:[#allocation4 + $0x6] sm:$0x30] %vm1591_vm14, %v1587_v22 }
0x1245   :  { %v1941_v25 = vpop.permute.xlu0 %1940 }
0x1246   :  { %1943 = vst.msk [vmem:[#allocation4 + $0x8] sm:$0xc] %vm1472_vm9, %v1941_v25 }
0x1247   :  { %1944 = vst.msk [vmem:[#allocation4 + $0x2] sm:$0xc] %vm1474_vm10, %v1941_v25 }
0x124a   :  { %v3654_v14 = vpop.eup %3653 }
0x124b   :  { %v2168_v42 = vmul.f32 %v3654_v14, %v3652_v26 }
0x124d   :  { %2170 = vrot.lane.b32.xlu0 %v2168_v42, %s4077_s20 }
0x12bf   :  { %v2171_v27 = vpop.permute.xlu0 %2170 }
0x12c0   :  { %2173 = vst.msk [vmem:[#allocation4 + $0x8] sm:$0xc0] %vm1706_vm11, %v2171_v27 }
0x12c1   :  { %2174 = vst.msk [vmem:[#allocation4 - $0x6] sm:$0xc0] %vm1708_vm12, %v2171_v27 }
0x12c7   :  { %v4857_v44 = vld [vmem:[#allocation4 + $0x8] sm:$0xff] }
0x12c8   :  { %v4855_v28 = vld [vmem:[#allocation4] sm:$0xff] }
0x12c9   :  { %3178 = vmatprep.mubr.msk.f32.mxu0 %vm632_vm3, %v4855_v28 }
0x12ca   :  { %3179 = vmatmul.mubr.msk.f32.vlgmr.msra.gmra.mrb[16].mxu0 %vm632_vm3, %v4857_v44 }
0x12cb   :  { %3232 = vmatprep.mubr.msk.f32.mxu0 %vm4091_vm0, %v4087_v1 }
0x139d   :  { %v3180_v33 = vpop.f32.mrb[16].mxu0 }
0x139e   :  { %v2266_v37 = vadd.f32 %v3180_v33, %v2187_v31  ;;  %v2260_v38 = vpop.f32.mrb[17].mxu0 }
0x139f   :  { %v2261_v45 = vadd.f32 %v2260_v38, %v2187_v31 }
0x13a0   :  { %v2288_v46 = vcombine.high %v2266_v37, %v2266_v37  ;;  %v2295_v47 = vrot.slane %v2266_v37, %v4636_v36 }
0x13a1   :  { %v2271_v48 = vcombine.high %v2261_v45, %v2261_v45  ;;  %v2278_v49 = vrot.slane %v2261_v45, %v4636_v36 }
0x13a2   :  { %v2302_v34 = vrot.slane %v2288_v46, %v4636_v36  ;;  %v2303_v51 = vcombine.high %v2295_v47, %v2295_v47  ;;  %v2318_v52 = vsel %vm2313_vm15, %v2295_v47, -inf }
0x13a3   :  { %v2285_v39 = vrot.slane %v2271_v48, %v4636_v36  ;;  %v2286_v54 = vcombine.high %v2278_v49, %v2278_v49  ;;  %v2314_v55 = vsel %vm2313_vm15, %v2278_v49, -inf }
0x13a4   :  { %v2304_v57 = vcombine.high %v2302_v34, %v2302_v34  ;;  %v2320_v58 = vsel %vm2313_vm15, %v2303_v51, -inf  ;;  %v2322_v60 = vsel %vm2313_vm15, %v2302_v34, -inf  ;;  %v2319_v61 = vmax.f32 %v2314_v55, %v2318_v52 }
0x13a5   :  { %v2287_v32 = vcombine.high %v2285_v39, %v2285_v39  ;;  %v2315_v30 = vsel %vm2313_vm15, %v2286_v54, -inf  ;;  %v2316_v63 = vsel %vm2313_vm15, %v2285_v39, -inf }
0x13a6   :  { %v2324_v0 = vsel %vm2313_vm15, %v2304_v57, -inf  ;;  %v2321_v41 = vmax.f32 %v2315_v30, %v2320_v58  ;;  %v2323_v3 = vmax.f32 %v2316_v63, %v2322_v60  ;;  %v2555_v30 = vld [vmem:[%s5048_s14] sm:$0xff]  ;;  %v2556_v63 = vld [vmem:[%s5048_s14 + $0x8] sm:$0xff] }
0x13a7   :  { %v2317_v4 = vsel %vm2313_vm15, %v2287_v32, -inf }
0x13a8   :  { %v2325_v6 = vmax.f32 %v2317_v4, %v2324_v0  ;;  %v2326_v9 = vmax.f32 %v2319_v61, %v2321_v41  ;;  %v3463_v0 = vpack.c.bf16 %v2556_v63, %v2555_v30  ;;  %v2557_v41 = vld [vmem:[%s5048_s14 + $0x10] sm:$0xff] }
0x13aa   :  { %v2327_v10 = vmax.f32 %v2323_v3, %v2325_v6  ;;  %v2558_v3 = vld [vmem:[%s5048_s14 + $0x18] sm:$0xff]  ;;  %v2559_v6 = vld [vmem:[%s5048_s14 + $0x20] sm:$0xff] }
0x13ab   :  { %v3466_v4 = vpack.c.bf16 %v2558_v3, %v2557_v41 }
0x13ac   :  { %v2328_v43 = vmax.f32 %v2326_v9, %v2327_v10  ;;  %v2560_v9 = vld [vmem:[%s5048_s14 + $0x28] sm:$0xff] }
0x13ad   :  { %v3469_v10 = vpack.c.bf16 %v2560_v9, %v2559_v6 }
0x13ae   :  { %v2329_v11 = vsub.f32 %v2278_v49, %v2328_v43  ;;  %v2330_v53 = vsub.f32 %v2286_v54, %v2328_v43  ;;  %v2331_v12 = vsub.f32 %v2285_v39, %v2328_v43  ;;  %v2332_v56 = vsub.f32 %v2287_v32, %v2328_v43 }
0x13af   :  { %v2333_v35 = vsub.f32 %v2295_v47, %v2328_v43  ;;  %v2334_v13 = vsub.f32 %v2303_v51, %v2328_v43  ;;  %v2335_v40 = vsub.f32 %v2302_v34, %v2328_v43  ;;  %v2336_v59 = vsub.f32 %v2304_v57, %v2328_v43  ;;  %v2561_v43 = vld [vmem:[%s5048_s14 + $0x30] sm:$0xff] }
0x13b0   :  { %v2337_v62 = vmul.f32 1.442695, %v2329_v11  ;;  %v2339_v2 = vmul.f32 1.442695, %v2330_v53  ;;  %v2341_v15 = vmul.f32 1.442695, %v2331_v12 }
0x13b1   :  { %v2343_v5 = vmul.f32 1.442695, %v2332_v56  ;;  %v2345_v16 = vmul.f32 1.442695, %v2333_v35  ;;  %v2347_v8 = vmul.f32 1.442695, %v2334_v13 }
0x13b2   :  { %3655 = vpow2.f32 %v2337_v62  ;;  %v2349_v17 = vmul.f32 1.442695, %v2335_v40  ;;  %v2351_v18 = vmul.f32 1.442695, %v2336_v59  ;;  %v4090_v32 = vmov 0.0|0.0   ;;  %v2562_v11 = vld [vmem:[%s5048_s14 + $0x38] sm:$0xff] }
0x13b3   :  { %3657 = vpow2.f32 %v2339_v2  ;;  %3462 = vmatprep.subr.bf16.mxu1 %v4090_v32  ;;  %3474 = vmatprep.subr.bf16.mxu0 %v4090_v32  ;;  %v3472_v53 = vpack.c.bf16 %v2562_v11, %v2561_v43  ;;  %v2660_v12 = vld [vmem:[%s5052_s18] sm:$0xff]  ;;  %v2661_v56 = vld [vmem:[%s5052_s18 + $0x8] sm:$0xff]  ;;  %v2662_v35 = vld [vmem:[%s5052_s18 + $0x10] sm:$0xff] }
0x13b4   :  { %3659 = vpow2.f32 %v2341_v15  ;;  %3464 = vmatpush3.bf16.msra.mxu1 %v3463_v0  ;;  %v3475_v13 = vpack.c.bf16 %v2661_v56, %v2660_v12  ;;  %v2663_v40 = vld [vmem:[%s5052_s18 + $0x18] sm:$0xff]  ;;  %v2664_v62 = vld [vmem:[%s5052_s18 + $0x20] sm:$0xff]  ;;  %v2665_v2 = vld [vmem:[%s5052_s18 + $0x28] sm:$0xff] }
0x13b5   :  { %3661 = vpow2.f32 %v2343_v5  ;;  %3465 = vmatprep.subr.bf16.mxu1 %v4090_v32  ;;  %v3478_v59 = vpack.c.bf16 %v2663_v40, %v2662_v35  ;;  %v3481_v15 = vpack.c.bf16 %v2665_v2, %v2664_v62  ;;  %v2666_v5 = vld [vmem:[%s5052_s18 + $0x30] sm:$0xff] }
0x13b6   :  { %3663 = vpow2.f32 %v2345_v16  ;;  %3476 = vmatpush3.bf16.msra.mxu0 %v3475_v13  ;;  %v2667_v16 = vld [vmem:[%s5052_s18 + $0x38] sm:$0xff]  ;;  %v2965_v2 = vld [vmem:[#allocation18] ss:$0 sm:$0xff] }
0x13b7   :  { %3665 = vpow2.f32 %v2347_v8  ;;  %3477 = vmatprep.subr.bf16.mxu0 %v4090_v32  ;;  %v3484_v8 = vpack.c.bf16 %v2667_v16, %v2666_v5  ;;  %v2966_v16 = vld [vmem:[#allocation20] ss:$0 sm:$0xff] }
0x13b8   :  { %3667 = vpow2.f32 %v2349_v17  ;;  %3467 = vmatpush3.bf16.msra.mxu1 %v3466_v4  ;;  %v2668_v17 = vld [vmem:[%s5052_s18 + $0x40] sm:$0xff] }
0x13b9   :  { %3669 = vpow2.f32 %v2351_v18  ;;  %3468 = vmatprep.subr.bf16.mxu1 %v4090_v32  ;;  %v2669_v18 = vld [vmem:[%s5052_s18 + $0x48] sm:$0xff] }
0x13ba   :  { %3479 = vmatpush3.bf16.msra.mxu0 %v3478_v59 }
0x13bb   :  { %3480 = vmatprep.subr.bf16.mxu0 %v4090_v32 }
0x13bc   :  { %v3656_v7 = vpop.eup %3655  ;;  %3470 = vmatpush3.bf16.msra.mxu1 %v3469_v10 }
0x13bd   :  { %v3658_v19 = vpop.eup %3657  ;;  %v2353_v20 = vsel %vm2313_vm15, %v3656_v7, 0.0  ;;  %3471 = vmatprep.subr.bf16.mxu1 %v4090_v32 }
0x13be   :  { %v3660_v21 = vpop.eup %3659  ;;  %v2354_v22 = vsel %vm2313_vm15, %v3658_v19, 0.0  ;;  %3482 = vmatpush3.bf16.msra.mxu0 %v3481_v15 }
0x13bf   :  { %v3662_v23 = vpop.eup %3661  ;;  %v2355_v25 = vadd.f32 %v2354_v22, %v2353_v20  ;;  %v2356_v26 = vsel %vm2313_vm15, %v3660_v21, 0.0  ;;  %3483 = vmatprep.subr.bf16.mxu0 %v4090_v32  ;;  %v2671_v20 = vld [vmem:[%s5052_s18 + $0x58] sm:$0xff]  ;;  %v4092_v22 = vmov 269488144  }
0x13c0   :  { %v3664_v50 = vpop.eup %3663  ;;  %v2358_v42 = vsel %vm2313_vm15, %v3662_v23, 0.0  ;;  %3473 = vmatpush3.bf16.msra.mxu1 %v3472_v53 }
0x13c1   :  { %v2357_v14 = vadd.f32 %v2356_v26, %v2355_v25  ;;  %v3666_v27 = vpop.eup %3665  ;;  %v2360_v31 = vsel %vm2313_vm15, %v3664_v50, 0.0  ;;  %3498 = vmatprep.subr.bf16.mxu1 %v4090_v32  ;;  %v2384_v26 = vrot.slane %v4855_v28, %v4636_v36 }
0x13c2   :  { %v3668_v33 = vpop.eup %3667  ;;  %v2362_v38 = vsel %vm2313_vm15, %v3666_v27, 0.0  ;;  %3485 = vmatpush3.bf16.msra.mxu0 %v3484_v8 }
0x13c3   :  { %v2359_v29 = vadd.f32 %v2358_v42, %v2357_v14  ;;  %v3670_v45 = vpop.eup %3669  ;;  %v2364_v47 = vsel %vm2313_vm15, %v3668_v33, 0.0  ;;  %3486 = vmatprep.subr.bf16.mxu0 %v4090_v32 }
0x13c4   :  { %v2366_v49 = vsel %vm2313_vm15, %v3670_v45, 0.0 }
0x13c5   :  { %v2361_v37 = vadd.f32 %v2360_v31, %v2359_v29  ;;  %v2392_v29 = vcombine.high %v2384_v26, %v2384_v26 }
0x13c7   :  { %v2363_v46 = vadd.f32 %v2362_v38, %v2361_v37 }
0x13c9   :  { %v2365_v48 = vadd.f32 %v2364_v47, %v2363_v46 }
0x13cb   :  { %v2367_v34 = vadd.f32 %v2366_v49, %v2365_v48 }
0x13cd   :  { %3671 = vrcp.f32 %v2367_v34 }
0x13d7   :  { %v3672_v51 = vpop.eup %3671 }
0x13d8   :  { %v2370_v52 = vmul.f32 %v3672_v51, %v3658_v19  ;;  %v2369_v39 = vmul.f32 %v3672_v51, %v3656_v7  ;;  %v2373_v54 = vmul.f32 %v3672_v51, %v3664_v50  ;;  %v2371_v55 = vmul.f32 %v3672_v51, %v3660_v21  ;;  %v2670_v19 = vld [vmem:[%s5052_s18 + $0x50] sm:$0xff] }
0x13d9   :  { %v2375_v57 = vmul.f32 %v3672_v51, %v3668_v33  ;;  %v2372_v58 = vmul.f32 %v3672_v51, %v3662_v23  ;;  %v2374_v60 = vmul.f32 %v3672_v51, %v3666_v27  ;;  %v2376_v61 = vmul.f32 %v3672_v51, %v3670_v45 }
0x13da   :  { %2433 = vperm.xlu0 %3556, %v2370_v52   ;;  %2421 = vperm.xlu1 %3555, %v2369_v39   ;;  %v3487_v7 = vpack.c.bf16 %v2669_v18, %v2668_v17  ;;  %v3490_v21 = vpack.c.bf16 %v2671_v20, %v2670_v19  ;;  %v2425_v23 = vunpack.c.l.s4 %v4092_v22  ;;  %v2377_v27 = vcombine.high %v4855_v28, %v4855_v28  ;;  %v2672_v18 = vld [vmem:[%s5052_s18 + $0x60] sm:$0xff]  ;;  %v2674_v20 = vld [vmem:[%s5052_s18 + $0x70] sm:$0xff] }
0x13db   :  { %v2401_v28 = vrot.slane %v4857_v44, %v4636_v36 }
0x13dc   :  { %3488 = vmatpush3.bf16.msra.mxu0 %v3487_v7  ;;  %v2426_v25 = vunpack.c.0.s8 %v2425_v23  ;;  %v2391_v47 = vrot.slane %v2377_v27, %v4636_v36  ;;  %v2673_v7 = vld [vmem:[%s5052_s18 + $0x68] sm:$0xff] }
0x13dd   :  { %3489 = vmatprep.subr.bf16.mxu0 %v4090_v32  ;;  %v2409_v6 = vcombine.high %v2401_v28, %v2401_v28  ;;  %v3493_v19 = vpack.c.bf16 %v2673_v7, %v2672_v18  ;;  %v2771_v23 = vld [vmem:[%s5056_s22 + $0x8] sm:$0xff] }
0x13de   :  { %2469 = vperm.xlu0 %3556, %v2373_v54   ;;  %2445 = vperm.xlu1 %3555, %v2371_v55   ;;  %v2429_v50 = vsub.s32 %v2426_v25, %v4633_v24  ;;  %v2394_v55 = vcombine.high %v4857_v44, %v4857_v44  ;;  %v2772_v25 = vld [vmem:[%s5056_s22 + $0x10] sm:$0xff] }
0x13e0   :  { %3491 = vmatpush3.bf16.msra.mxu0 %v3490_v21  ;;  %v2408_v3 = vrot.slane %v2394_v55, %v4636_v36  ;;  %v2675_v21 = vld [vmem:[%s5052_s18 + $0x78] sm:$0xff] }
0x13e1   :  { %3492 = vmatprep.subr.bf16.mxu0 %v4090_v32  ;;  %v3496_v22 = vpack.c.bf16 %v2675_v21, %v2674_v20 }
0x13e2   :  { %2493 = vperm.xlu0 %3556, %v2375_v57   ;;  %2457 = vperm.xlu1 %3555, %v2372_v58   ;;  %v2393_v57 = vcombine.high %v2391_v47, %v2391_v47  ;;  %v2410_v35 = vcombine.high %v2408_v3, %v2408_v3 }
0x13e4   :  { %3494 = vmatpush3.bf16.msra.mxu0 %v3493_v19 }
0x13e5   :  { %3495 = vmatprep.subr.bf16.mxu0 %v4090_v32 }
0x13e6   :  { %2481 = vperm.xlu1 %3555, %v2374_v60  }
0x13e8   :  { %3497 = vmatpush3.bf16.msra.mxu0 %v3496_v22 }
0x13ea   :  { %2505 = vperm.xlu1 %3555, %v2376_v61  }
0x1459   :  { %v2434_v14 = vpop.permute.xlu0 %2433  ;;  %v2422_v42 = vpop.permute.xlu1 %2421 }
0x145a   :  { %v2442_v31 = vrot.slane %v2434_v14, %v2429_v50  ;;  %v2430_v33 = vrot.slane %v2422_v42, %v2429_v50  ;;  %v2967_v42 = vld [vmem:[#allocation21] ss:$0 sm:$0xff] }
0x145c   :  { %v2516_v37 = vmul.f32 %v2442_v31, %v2392_v29  ;;  %v2515_v38 = vmul.f32 %v2430_v33, %v2384_v26  ;;  %v2969_v29 = vld [vmem:[#allocation23] ss:$0 sm:$0xff] }
0x145d   :  { %v2470_v45 = vpop.permute.xlu0 %2469  ;;  %v2446_v46 = vpop.permute.xlu1 %2445 }
0x145e   :  { %v2454_v48 = vrot.slane %v2446_v46, %v2429_v50  ;;  %v2525_v49 = vsel %vm2523_vm1, %v2516_v37, 0.0  ;;  %v2524_v24 = vsel %vm2523_vm1, %v2515_v38, 0.0  ;;  %v2478_v34 = vrot.slane %v2470_v45, %v2429_v50  ;;  %v2970_v37 = vld [vmem:[#allocation24] ss:$0 sm:$0xff] }
0x145f   :  { %v2526_v60 = vadd.f32 %v2525_v49, %v2524_v24  ;;  %v2776_v24 = vld [vmem:[%s5056_s22 + $0x30] sm:$0xff] }
0x1460   :  { %v2517_v51 = vmul.f32 %v2454_v48, %v2391_v47  ;;  %v2519_v61 = vmul.f32 %v2478_v34, %v2401_v28  ;;  %v2774_v47 = vld [vmem:[%s5056_s22 + $0x20] sm:$0xff]  ;;  %v2775_v48 = vld [vmem:[%s5056_s22 + $0x28] sm:$0xff]  ;;  %v2777_v34 = vld [vmem:[%s5056_s22 + $0x38] sm:$0xff] }
0x1461   :  { %v2494_v52 = vpop.permute.xlu0 %2493  ;;  %v2458_v39 = vpop.permute.xlu1 %2457  ;;  %v3505_v49 = vpack.c.bf16 %v2775_v48, %v2774_v47  ;;  %v2971_v28 = vld [vmem:[#allocation26] ss:$0 sm:$0xff] }
0x1462   :  { %v2527_v54 = vsel %vm2523_vm1, %v2517_v51, 0.0  ;;  %v2466_v58 = vrot.slane %v2458_v39, %v2429_v50  ;;  %v2502_v30 = vrot.slane %v2494_v52, %v2429_v50  ;;  %v2531_v43 = vsel %vm2523_vm1, %v2519_v61, 0.0  ;;  %v2972_v39 = vld [vmem:[#allocation27] ss:$0 sm:$0xff] }
0x1463   :  { %v2528_v0 = vadd.f32 %v2527_v54, %v2526_v60  ;;  %v3508_v51 = vpack.c.bf16 %v2777_v34, %v2776_v24 }
0x1464   :  { %v2518_v63 = vmul.f32 %v2466_v58, %v2393_v57  ;;  %v2521_v11 = vmul.f32 %v2502_v30, %v2408_v3  ;;  %v2973_v57 = vld [vmem:[#allocation29] ss:$0 sm:$0xff]  ;;  %v2974_v30 = vld [vmem:[#allocation30] ss:$0 sm:$0xff] }
0x1465   :  { %v2482_v41 = vpop.permute.xlu1 %2481 }
0x1466   :  { %v2529_v4 = vsel %vm2523_vm1, %v2518_v63, 0.0  ;;  %v2490_v9 = vrot.slane %v2482_v41, %v2429_v50  ;;  %v2535_v59 = vsel %vm2523_vm1, %v2521_v11, 0.0 }
0x1467   :  { %v2530_v10 = vadd.f32 %v2529_v4, %v2528_v0 }
0x1468   :  { %v2520_v53 = vmul.f32 %v2490_v9, %v2409_v6 }
0x1469   :  { %v2532_v44 = vadd.f32 %v2531_v43, %v2530_v10  ;;  %v2506_v12 = vpop.permute.xlu1 %2505 }
0x146a   :  { %v2533_v56 = vsel %vm2523_vm1, %v2520_v53, 0.0  ;;  %v2514_v13 = vrot.slane %v2506_v12, %v2429_v50  ;;  %v2773_v50 = vld [vmem:[%s5056_s22 + $0x18] sm:$0xff] }
0x146b   :  { %v2534_v40 = vadd.f32 %v2533_v56, %v2532_v44  ;;  %v3502_v14 = vpack.c.bf16 %v2773_v50, %v2772_v25 }
0x146c   :  { %v2522_v62 = vmul.f32 %v2514_v13, %v2410_v35 }
0x146d   :  { %v2536_v36 = vadd.f32 %v2535_v59, %v2534_v40 }
0x146e   :  { %v2537_v15 = vsel %vm2523_vm1, %v2522_v62, 0.0 }
0x146f   :  { %v2538_v5 = vadd.f32 %v2537_v15, %v2536_v36 }
0x1471   :  { %v2546_v8 = vmul.f32 %v2965_v2, %v2538_v5 }
0x1473   :  { %v2554_v17 = vadd.f32 %v2966_v16, %v2546_v8 }
0x1475   :  { %3198 = vmatmul.mubr.msk.f32.vlgmr.msra.gmra.mrb[12].mxu1 %vm632_vm3, %v2554_v17 }
0x1476   :  { %3251 = vmatprep.mubr.msk.f32.mxu1 %vm4091_vm0, %v4087_v1  ;;  %v2770_v1 = vld [vmem:[%s5056_s22] sm:$0xff]  ;;  %s4025_s22 = scalar_lea.vmem %s2867_s11, 32 }
0x1477   :  { %v3499_v26 = vpack.c.bf16 %v2771_v23, %v2770_v1  ;;  %p4026_p2 = scmp.ne.s32.totalorder %s2867_s11, %s4025_s22  ;;  %p4031_p4 = scmp.lt.s32.totalorder %s4025_s22, %s4025_s22 }
0x1479   :  { %3500 = vmatpush3.bf16.msra.mxu1 %v3499_v26  ;;  %p4032_p5 = por %p4031_p4, %p4030_p3 }
0x147a   :  { %3501 = vmatprep.subr.bf16.mxu1 %v4090_v32 }
0x147b   :  { %p4033_p6 = pnand %p4032_p5, %p4026_p2 }
0x147d   :  { %3503 = vmatpush3.bf16.msra.mxu1 %v3502_v14 }
0x147e   :  { %3504 = vmatprep.subr.bf16.mxu1 %v4090_v32 }
0x1481   :  { %3506 = vmatpush3.bf16.msra.mxu1 %v3505_v49 }
0x1482   :  { %3507 = vmatprep.subr.bf16.mxu1 %v4090_v32 }
0x1485   :  { %3509 = vmatpush3.bf16.msra.mxu1 %v3508_v51 }
0x1548   :  { %v2639_v27 = vpop.f32.mrb[12].mxu1 }
0x1549   :  { %v2640_v31 = vadd.f32 %v2967_v42, %v2639_v27  ;;  %v3199_v33 = vpop.f32.mrb[13].mxu1 }
0x154b   :  { %v2650_v38 = vmul.f32 %v2969_v29, %v2640_v31 }
0x154d   :  { %v2658_v45 = vadd.f32 %v2970_v37, %v2650_v38 }
0x154f   :  { %v2659_v46 = vmax.f32 %v2658_v45, 0.0 }
0x1551   :  { %3233 = vmatmul.mubr.f32.vlgmr.msra.gmra.mrb[18].mxu0 %v2659_v46 }
0x1624   :  { %v2749_v52 = vpop.f32.mrb[18].mxu0 }
0x1625   :  { %v2750_v54 = vadd.f32 %v2971_v28, %v2749_v52  ;;  %v3234_v55 = vpop.f32.mrb[19].mxu0 }
0x1627   :  { %v2760_v58 = vmul.f32 %v2972_v39, %v2750_v54 }
0x1629   :  { %v2768_v60 = vadd.f32 %v2973_v57, %v2760_v58 }
0x162b   :  { %v2769_v61 = vmax.f32 %v2768_v60, 0.0 }
0x162d   :  { %3252 = vmatmul.mubr.msk.f32.vlgmr.msra.gmra.mrb[14].mxu1 %vm632_vm3, %v2769_v61 }
0x1700   :  { %v2854_v63 = vpop.f32.mrb[14].mxu1 }
0x1701   :  { %v2855_v0 = vadd.f32 %v2974_v30, %v2854_v63  ;;  %v3253_v41 = vpop.f32.mrb[15].mxu1 }
0x1703   :  { %2859 = vst.msk [vmem:[#allocation32] sm:$0x3] %vm2858_vm2, %v2855_v0 }
0x1704   :  { %4036 = shalt.err (!%p4033_p6)
}
0x1705   :  { %s5092_s2 = sld [smem:[#allocation52_spill]] }
0x170b   :  { %s4037_s28 = scalar_lea.hbm %s5092_s2, 32 }
0x170c   :  { %p4038_p7 = scmp.ne.s32.totalorder %s5092_s2, %s4037_s28  ;;  %p4041_p8 = scmp.lt.u32.totalorder %s4037_s28, %s5092_s2 }
0x170e   :  { %p4043_p9 = pnand %p4041_p8, %p4038_p7 }
0x1710   :  { %4046 = shalt.err (!%p4043_p9)
}
0x1711   :  { %2869 = dma.vmem_to_hbm [thread:$0]  %s2867_s11, 32, %s5092_s2, [#allocation8]  }
0x1712   :  { %4065 = dma.done.wait [#allocation8], 32  }
0x1713   :  { %4066 = vsyncadd [#allocation8], 4294967264 }
0x1714   :  { %2873 = vsyncpa [#allocation7], 1 }
0x1715   :  { %2874 = vsyncpa [#allocation10], 1 }
0x1716   :  { %2875 = vsyncpa [#allocation13], 1 }
0x1717   :  { %2876 = vsyncpa [#allocation16], 1 }
0x1718   :  { %2877 = vsyncpa [#allocation19], 1 }
0x1719   :  { %2878 = vsyncpa [#allocation22], 1 }
0x171a   :  { %2879 = vsyncpa [#allocation25], 1 }
0x171b   :  { %2880 = vsyncpa [#allocation28], 1 }
0x171c   :  { %2881 = vsyncpa [#allocation31], 1 }
0x171d   :  { %2882 = vsyncpa [#allocation8], 1 }

</bundles_post_ra>
